<compile_context>
chip_gen: v5e
topology: v5e:2x2
jax: 0.10.0
libtpu: 0.0.40
codegen_flags: <defaults>
</compile_context>

<pallas_src>
import functools

import numpy as np
import jax
import jax.numpy as jnp
from jax.experimental import pallas as pl
from jax.experimental.pallas import tpu as pltpu


# ----------------------------- small helpers -------------------------------

def _relu(x):
    return jnp.maximum(x, 0.0)


def _hard_swish(x):                     # nn.Hardswish: x * relu6(x+3)/6
    return x * (jnp.clip(x + 3.0, 0.0, 6.0) * (1.0 / 6.0))


def _hard_sigmoid(x):                   # F.hardsigmoid: relu6(x+3)/6
    return jnp.clip(x + 3.0, 0.0, 6.0) * (1.0 / 6.0)


def _shift_mats(H, W, stride):
    """Nine 0/1 matrices G[k] of shape (H*W, Ho*Wo).

    (x @ G[k])[c, q] is the zero-padded input pixel that kernel tap k of a
    3x3 / stride-s depthwise conv reads for output position q, so the whole
    conv becomes  sum_k (x @ G[k]) * w_k[c] + b[c]  -- shift, stride and zero
    padding all folded into one MXU op per tap.
    """
    Ho = (H + 2 - 3) // stride + 1
    Wo = (W + 2 - 3) // stride + 1
    g = np.zeros((9, H * W, Ho * Wo), np.float32)
    for k in range(9):
        kh, kw = divmod(k, 3)
        for qh in range(Ho):
            for qw in range(Wo):
                ih = qh * stride + kh - 1
                iw = qw * stride + kw - 1
                if 0 <= ih < H and 0 <= iw < W:
                    g[k, ih * W + iw, qh * Wo + qw] = 1.0
    return g


# --------------------------- fused block kernel ----------------------------

def _make_kernel(Ci, mid2, out2, Co, cr, P, Po, boff):
    f32 = jnp.float32

    def dw3x3(x, g_ref, taps_c, bias_c):
        # x: (C, Pin); g_ref: (9, Pin, Pout); taps_c: (C, 9); bias_c: (C, 1)
        acc = None
        for k in range(9):
            term = jnp.dot(x, g_ref[k], preferred_element_type=f32)
            term = term * taps_c[:, k:k + 1]
            acc = term if acc is None else acc + term
        return acc + bias_c

    def pw1x1(x, w_ref, bias_c):
        # w_ref: (Cout, Cin) BN-folded; x: (Cin, Pq); bias_c: (Cout, 1)
        return jnp.dot(w_ref[...], x, preferred_element_type=f32) + bias_c

    def kernel(x_ref, g1_ref, g2_ref, taps_ref, bias_ref, se1b_ref,
               lin1_ref, pw2_ref, lin2_ref, pwm_ref, se1w_ref, se2w_ref,
               o_ref):
        x = x_ref[0].astype(f32)                       # (Ci, P)
        taps = taps_ref[...]                           # (Ci+mid2+Co, 9)
        biases = bias_ref[...]                         # (52, 1)

        def bias(name, lo=0, hi=None):
            off, c = boff[name]
            hi = c if hi is None else hi
            return biases[off + lo:off + hi, :]

        # ---- branch 1: dw1 (linear) -> lin1 (relu) ------------------------
        x1 = dw3x3(x, g1_ref, taps[0:Ci, :], bias("dw1"))            # (Ci, Po)
        x1 = _relu(pw1x1(x1, lin1_ref, bias("lin1")))                # (out2, Po)

        # ---- branch 2: pw2 (relu) -> dw2 (linear) -> SE -> lin2 (relu) ----
        x2 = _relu(pw1x1(x, pw2_ref, bias("pw2")))                   # (mid2, P)
        x2 = dw3x3(x2, g1_ref, taps[Ci:Ci + mid2, :], bias("dw2"))   # (mid2, Po)

        # SE: global avg pool -> fc(relu) -> fc(hardsigmoid) -> gate multiply
        pooled = jnp.sum(x2, axis=1, keepdims=True) * (1.0 / Po)     # (mid2, 1)
        s1 = jnp.sum(se1w_ref[...] * pooled, axis=0, keepdims=True)  # (1, cr)
        s1 = _relu(s1 + se1b_ref[...])
        s2 = jnp.sum(se2w_ref[...] * s1, axis=1, keepdims=True)      # (mid2, 1)
        gate = _hard_sigmoid(s2 + bias("se2"))
        x2 = x2 * gate

        x2 = _relu(pw1x1(x2, lin2_ref, bias("lin2")))                # (out2, Po)

        # ---- concat -> dw_mv1 (hard_swish) -> pw_mv1 (hard_swish) ---------
        # dw_mv1 is depthwise, so evaluate it per concat half; pw_mv1 mixes
        # channels, so split its columns instead of materializing a concat.
        t0 = Ci + mid2
        h1 = _hard_swish(dw3x3(x1, g2_ref, taps[t0:t0 + out2, :],
                               bias("dwm", 0, out2)))                # (out2, Po)
        h2 = _hard_swish(dw3x3(x2, g2_ref, taps[t0 + out2:t0 + Co, :],
                               bias("dwm", out2, Co)))               # (out2, Po)
        pwm = pwm_ref[...]                                           # (Co, Co)
        y = (jnp.dot(pwm[:, 0:out2], h1, preferred_element_type=f32)
             + jnp.dot(pwm[:, out2:Co], h2, preferred_element_type=f32)
             + bias("pwm"))
        o_ref[0] = _hard_swish(y).astype(o_ref.dtype)

    return kernel


# ---------------------------- full forward pass -----------------------------

@functools.partial(jax.jit, static_argnames=("stride",))
def inverted_residual_ds(x_nchw, params, stride):
    N, Ci, H, W = x_nchw.shape
    Ho = (H + 2 - 3) // stride + 1
    Wo = (W + 2 - 3) // stride + 1
    P, Po = H * W, Ho * Wo

    def fold_pw(w, scale):              # (Cin, Cout) -> BN-folded (Cout, Cin)
        return (w * scale[None, :]).T.astype(jnp.float32)

    def fold_dw(w, scale):              # (9,1,1,C) -> BN-folded (C, 9) taps
        c = w.shape[-1]
        return (w.reshape(9, c) * scale[None, :]).T.astype(jnp.float32)

    dw1_w, dw1_s, dw1_b = params["dw1"]
    lin1_w, lin1_s, lin1_b = params["lin1"]
    pw2_w, pw2_s, pw2_b = params["pw2"]
    dw2_w, dw2_s, dw2_b = params["dw2"]
    se_w1, se_b1, se_w2, se_b2 = params["se"]
    lin2_w, lin2_s, lin2_b = params["lin2"]
    dwm_w, dwm_s, dwm_b = params["dw_mv1"]
    pwm_w, pwm_s, pwm_b = params["pw_mv1"]

    mid2, cr = se_w1.shape
    out2 = lin1_w.shape[1]
    Co = dwm_w.shape[-1]

    taps = jnp.concatenate(
        [fold_dw(dw1_w, dw1_s), fold_dw(dw2_w, dw2_s), fold_dw(dwm_w, dwm_s)],
        axis=0)                                         # (Ci + mid2 + Co, 9)

    bias_parts = [("dw1", dw1_b), ("lin1", lin1_b), ("pw2", pw2_b),
                  ("dw2", dw2_b), ("se2", se_b2), ("lin2", lin2_b),
                  ("dwm", dwm_b), ("pwm", pwm_b)]
    boff, off = {}, 0
    for name, b in bias_parts:
        boff[name] = (off, b.shape[0])
        off += b.shape[0]
    biases = jnp.concatenate([b for _, b in bias_parts]).astype(
        jnp.float32)[:, None]                           # (52, 1)

    consts = (
        jnp.asarray(_shift_mats(H, W, stride)),         # g1: (9, P, Po)
        jnp.asarray(_shift_mats(Ho, Wo, 1)),            # g2: (9, Po, Po)
        taps,                                           # (Ci+mid2+Co, 9)
        biases,                                         # (52, 1)
        se_b1[None, :].astype(jnp.float32),             # (1, cr)
        fold_pw(lin1_w, lin1_s),                        # (out2, Ci)
        fold_pw(pw2_w, pw2_s),                          # (mid2, Ci)
        fold_pw(lin2_w, lin2_s),                        # (out2, mid2)
        fold_pw(pwm_w, pwm_s),                          # (Co, Co)
        se_w1.astype(jnp.float32),                      # (mid2, cr)
        se_w2.T.astype(jnp.float32),                    # (mid2, cr)
    )

    def cspec(a):
        zeros = (0,) * a.ndim
        return pl.BlockSpec(a.shape, lambda n: zeros)

    out = pl.pallas_call(
        _make_kernel(Ci, mid2, out2, Co, cr, P, Po, boff),
        out_shape=jax.ShapeDtypeStruct((N, Co, Po), x_nchw.dtype),
        grid_spec=pltpu.PrefetchScalarGridSpec(
            num_scalar_prefetch=0,
            grid=(N,),
            in_specs=[pl.BlockSpec((1, Ci, P), lambda n: (n, 0, 0))]
                     + [cspec(a) for a in consts],
            out_specs=pl.BlockSpec((1, Co, Po), lambda n: (n, 0, 0)),
        ),
        compiler_params=pltpu.CompilerParams(
            dimension_semantics=("parallel",)),          # v7x: batch over 2 TCs
    )(x_nchw.reshape(N, Ci, P), *consts)

    return out.reshape(N, Co, Ho, Wo)                    # contiguous: free


# ------------------------- plain-JAX reference (check) ----------------------

def _apply_act(y, act):
    if act is None:
        return y
    if act == "relu":
        return jnp.maximum(y, 0.0)
    if act == "hard_swish":
        return y * (jnp.clip(y + 3.0, 0.0, 6.0) / 6.0)
    raise ValueError(act)


def _ref_dw(x, w, scale, bias, stride, act):
    C = x.shape[-1]
    k = w.reshape(3, 3, 1, C)
    y = jax.lax.conv_general_dilated(
        x, k, window_strides=(stride, stride), padding=((1, 1), (1, 1)),
        dimension_numbers=("NHWC", "HWIO", "NHWC"), feature_group_count=C)
    return _apply_act(y * scale + bias, act)


def _ref_pw(x, w, scale, bias, act):
    y = jnp.einsum("nhwc,cd->nhwd", x, w)
    return _apply_act(y * scale + bias, act)


def _ref_se(x, w1, b1, w2, b2):
    p = jnp.mean(x, axis=(1, 2), keepdims=True)
    s1 = jnp.maximum(jnp.einsum("nijc,cd->nijd", p, w1) + b1, 0.0)
    s2 = jnp.einsum("nijd,dc->nijc", s1, w2) + b2
    return x * (jnp.clip(s2 + 3.0, 0.0, 6.0) / 6.0)


def reference_forward(x_nhwc, params, stride):
    x1 = _ref_dw(x_nhwc, *params["dw1"], stride, None)
    x1 = _ref_pw(x1, *params["lin1"], "relu")
    x2 = _ref_pw(x_nhwc, *params["pw2"], "relu")
    x2 = _ref_dw(x2, *params["dw2"], stride, None)
    x2 = _ref_se(x2, *params["se"])
    x2 = _ref_pw(x2, *params["lin2"], "relu")
    out = jnp.concatenate([x1, x2], axis=-1)
    out = _ref_dw(out, *params["dw_mv1"], 1, "hard_swish")
    out = _ref_pw(out, *params["pw_mv1"], "hard_swish")
    return out


# ------------------------- deterministic parameters -------------------------

def _conv_bn_params(key, cin, cout, depthwise=False):
    ks = jax.random.split(key, 5)
    if depthwise:
        w = jax.random.normal(ks[0], (9, 1, 1, cout), jnp.float32) * 0.2
    else:
        w = jax.random.normal(ks[0], (cin, cout), jnp.float32) * 0.2
    gamma = jax.random.uniform(ks[1], (cout,), jnp.float32, 0.5, 1.5)
    beta = jax.random.normal(ks[2], (cout,), jnp.float32) * 0.1
    mean = jax.random.normal(ks[3], (cout,), jnp.float32) * 0.1
    var = jax.random.uniform(ks[4], (cout,), jnp.float32, 0.5, 1.5)
    eps = 1e-5                       # PyTorch BatchNorm2d default
    scale = gamma / jnp.sqrt(var + eps)
    bias = beta - mean * scale
    return (w, scale, bias)


def init_params(key, in_channels, mid_channels, out_channels):
    ks = jax.random.split(key, 8)
    mid2 = mid_channels // 2
    out2 = out_channels // 2
    cr = mid2 // 4                   # SEModule reduction=4
    se_ks = jax.random.split(ks[4], 4)
    return {
        "dw1": _conv_bn_params(ks[0], in_channels, in_channels, depthwise=True),
        "lin1": _conv_bn_params(ks[1], in_channels, out2),
        "pw2": _conv_bn_params(ks[2], in_channels, mid2),
        "dw2": _conv_bn_params(ks[3], mid2, mid2, depthwise=True),
        "se": (
            jax.random.normal(se_ks[0], (mid2, cr), jnp.float32) * 0.3,
            jax.random.normal(se_ks[1], (cr,), jnp.float32) * 0.1,
            jax.random.normal(se_ks[2], (cr, mid2), jnp.float32) * 0.3,
            jax.random.normal(se_ks[3], (mid2,), jnp.float32) * 0.1,
        ),
        "lin2": _conv_bn_params(ks[5], mid2, out2),
        "dw_mv1": _conv_bn_params(ks[6], out_channels, out_channels, depthwise=True),
        "pw_mv1": _conv_bn_params(ks[7], out_channels, out_channels),
    }


# ------------------------------------ main -----------------------------------

if __name__ == "__main__":
    key = jax.random.PRNGKey(0)
    k_x, k_p = jax.random.split(key)

    N, H, W = 2, 16, 16
    in_channels, mid_channels, out_channels, stride = 4, 16, 8, 2

    x = jax.random.normal(k_x, (N, in_channels, H, W), jnp.float32)   # NCHW
    params = init_params(k_p, in_channels, mid_channels, out_channels)

    out = inverted_residual_ds(x, params, stride=stride)
    out = jax.block_until_ready(out)

    ref_nhwc = reference_forward(jnp.transpose(x, (0, 2, 3, 1)), params, stride)
    ref = jnp.transpose(ref_nhwc, (0, 3, 1, 2))
    err = float(jnp.max(jnp.abs(out - ref)))

    assert out.shape == (N, out_channels, H // stride, W // stride), out.shape
    assert err < 1e-3, f"max abs error vs reference = {err}"
    print("KERNEL_OK")
</pallas_src>

<mosaic_0001>
module attributes {stable_mosaic.version = 11 : i64} {
  func.func @kernel(%arg0: i32, %arg1: memref<1x4x256xf32, #tpu.memory_space<vmem>>, %arg2: memref<9x256x64xf32, #tpu.memory_space<vmem>>, %arg3: memref<9x64x64xf32, #tpu.memory_space<vmem>>, %arg4: memref<20x9xf32, #tpu.memory_space<vmem>>, %arg5: memref<52x1xf32, #tpu.memory_space<vmem>>, %arg6: memref<1x2xf32, #tpu.memory_space<vmem>>, %arg7: memref<4x4xf32, #tpu.memory_space<vmem>>, %arg8: memref<8x4xf32, #tpu.memory_space<vmem>>, %arg9: memref<4x8xf32, #tpu.memory_space<vmem>>, %arg10: memref<8x8xf32, #tpu.memory_space<vmem>>, %arg11: memref<8x2xf32, #tpu.memory_space<vmem>>, %arg12: memref<8x2xf32, #tpu.memory_space<vmem>>, %arg13: memref<1x8x64xf32, #tpu.memory_space<vmem>>) attributes {dimension_semantics = [#tpu.dimension_semantics<parallel>], iteration_bounds = array<i64: 2>, scalar_prefetch = 0 : i64, scratch_operands = 0 : i64, tpu.core_type = #tpu.core_type<tc>, window_params = [{transform_indices = @transform_0, window_bounds = array<i64: 1, 4, 256>}, {pipeline_mode = #tpu.pipeline_mode<synchronous>, transform_indices = @transform_1, window_bounds = array<i64: 9, 256, 64>}, {pipeline_mode = #tpu.pipeline_mode<synchronous>, transform_indices = @transform_2, window_bounds = array<i64: 9, 64, 64>}, {pipeline_mode = #tpu.pipeline_mode<synchronous>, transform_indices = @transform_3, window_bounds = array<i64: 20, 9>}, {pipeline_mode = #tpu.pipeline_mode<synchronous>, transform_indices = @transform_4, window_bounds = array<i64: 52, 1>}, {pipeline_mode = #tpu.pipeline_mode<synchronous>, transform_indices = @transform_5, window_bounds = array<i64: 1, 2>}, {pipeline_mode = #tpu.pipeline_mode<synchronous>, transform_indices = @transform_6, window_bounds = array<i64: 4, 4>}, {pipeline_mode = #tpu.pipeline_mode<synchronous>, transform_indices = @transform_7, window_bounds = array<i64: 8, 4>}, {pipeline_mode = #tpu.pipeline_mode<synchronous>, transform_indices = @transform_8, window_bounds = array<i64: 4, 8>}, {pipeline_mode = #tpu.pipeline_mode<synchronous>, transform_indices = @transform_9, window_bounds = array<i64: 8, 8>}, {pipeline_mode = #tpu.pipeline_mode<synchronous>, transform_indices = @transform_10, window_bounds = array<i64: 8, 2>}, {pipeline_mode = #tpu.pipeline_mode<synchronous>, transform_indices = @transform_11, window_bounds = array<i64: 8, 2>}, {transform_indices = @transform_12, window_bounds = array<i64: 1, 8, 64>}]} {
    %c0 = arith.constant 0 : index
    %c0_0 = arith.constant 0 : index
    %c0_1 = arith.constant 0 : index
    %0 = vector.load %arg1[%c0, %c0_0, %c0_1] : memref<1x4x256xf32, #tpu.memory_space<vmem>>, vector<1x4x256xf32>
    %1 = vector.shape_cast %0 : vector<1x4x256xf32> to vector<4x256xf32>
    %c0_2 = arith.constant 0 : index
    %c0_3 = arith.constant 0 : index
    %2 = vector.load %arg4[%c0_2, %c0_3] : memref<20x9xf32, #tpu.memory_space<vmem>>, vector<20x9xf32>
    %c0_4 = arith.constant 0 : index
    %c0_5 = arith.constant 0 : index
    %3 = vector.load %arg5[%c0_4, %c0_5] : memref<52x1xf32, #tpu.memory_space<vmem>>, vector<52x1xf32>
    %4 = vector.extract_strided_slice %2 {offsets = [0, 0], sizes = [4, 9], strides = [1, 1]} : vector<20x9xf32> to vector<4x9xf32>
    %5 = vector.extract_strided_slice %3 {offsets = [0, 0], sizes = [4, 1], strides = [1, 1]} : vector<52x1xf32> to vector<4x1xf32>
    %c0_6 = arith.constant 0 : index
    %c0_7 = arith.constant 0 : index
    %c0_8 = arith.constant 0 : index
    %6 = vector.load %arg2[%c0_6, %c0_7, %c0_8] : memref<9x256x64xf32, #tpu.memory_space<vmem>>, vector<1x256x64xf32>
    %7 = vector.shape_cast %6 : vector<1x256x64xf32> to vector<256x64xf32>
    %cst = arith.constant dense<0.000000e+00> : vector<4x64xf32>
    %8 = tpu.matmul %1, %7, %cst {dimension_numbers = #tpu.dot_dimension_numbers<[1], [0], [0], [1], [0, 0, 1, 1], [], []>} : vector<4x256xf32>, vector<256x64xf32>, vector<4x64xf32> -> vector<4x64xf32>
    %9 = vector.extract_strided_slice %4 {offsets = [0, 0], sizes = [4, 1], strides = [1, 1]} : vector<4x9xf32> to vector<4x1xf32>
    %10 = vector.broadcast %9 : vector<4x1xf32> to vector<4x64xf32>
    %11 = arith.mulf %8, %10 : vector<4x64xf32>
    %c1 = arith.constant 1 : index
    %c0_9 = arith.constant 0 : index
    %c0_10 = arith.constant 0 : index
    %12 = vector.load %arg2[%c1, %c0_9, %c0_10] : memref<9x256x64xf32, #tpu.memory_space<vmem>>, vector<1x256x64xf32>
    %13 = vector.shape_cast %12 : vector<1x256x64xf32> to vector<256x64xf32>
    %cst_11 = arith.constant dense<0.000000e+00> : vector<4x64xf32>
    %14 = tpu.matmul %1, %13, %cst_11 {dimension_numbers = #tpu.dot_dimension_numbers<[1], [0], [0], [1], [0, 0, 1, 1], [], []>} : vector<4x256xf32>, vector<256x64xf32>, vector<4x64xf32> -> vector<4x64xf32>
    %15 = vector.extract_strided_slice %4 {offsets = [0, 1], sizes = [4, 1], strides = [1, 1]} : vector<4x9xf32> to vector<4x1xf32>
    %16 = vector.broadcast %15 : vector<4x1xf32> to vector<4x64xf32>
    %17 = arith.mulf %14, %16 : vector<4x64xf32>
    %18 = arith.addf %11, %17 : vector<4x64xf32>
    %c2 = arith.constant 2 : index
    %c0_12 = arith.constant 0 : index
    %c0_13 = arith.constant 0 : index
    %19 = vector.load %arg2[%c2, %c0_12, %c0_13] : memref<9x256x64xf32, #tpu.memory_space<vmem>>, vector<1x256x64xf32>
    %20 = vector.shape_cast %19 : vector<1x256x64xf32> to vector<256x64xf32>
    %cst_14 = arith.constant dense<0.000000e+00> : vector<4x64xf32>
    %21 = tpu.matmul %1, %20, %cst_14 {dimension_numbers = #tpu.dot_dimension_numbers<[1], [0], [0], [1], [0, 0, 1, 1], [], []>} : vector<4x256xf32>, vector<256x64xf32>, vector<4x64xf32> -> vector<4x64xf32>
    %22 = vector.extract_strided_slice %4 {offsets = [0, 2], sizes = [4, 1], strides = [1, 1]} : vector<4x9xf32> to vector<4x1xf32>
    %23 = vector.broadcast %22 : vector<4x1xf32> to vector<4x64xf32>
    %24 = arith.mulf %21, %23 : vector<4x64xf32>
    %25 = arith.addf %18, %24 : vector<4x64xf32>
    %c3 = arith.constant 3 : index
    %c0_15 = arith.constant 0 : index
    %c0_16 = arith.constant 0 : index
    %26 = vector.load %arg2[%c3, %c0_15, %c0_16] : memref<9x256x64xf32, #tpu.memory_space<vmem>>, vector<1x256x64xf32>
    %27 = vector.shape_cast %26 : vector<1x256x64xf32> to vector<256x64xf32>
    %cst_17 = arith.constant dense<0.000000e+00> : vector<4x64xf32>
    %28 = tpu.matmul %1, %27, %cst_17 {dimension_numbers = #tpu.dot_dimension_numbers<[1], [0], [0], [1], [0, 0, 1, 1], [], []>} : vector<4x256xf32>, vector<256x64xf32>, vector<4x64xf32> -> vector<4x64xf32>
    %29 = vector.extract_strided_slice %4 {offsets = [0, 3], sizes = [4, 1], strides = [1, 1]} : vector<4x9xf32> to vector<4x1xf32>
    %30 = vector.broadcast %29 : vector<4x1xf32> to vector<4x64xf32>
    %31 = arith.mulf %28, %30 : vector<4x64xf32>
    %32 = arith.addf %25, %31 : vector<4x64xf32>
    %c4 = arith.constant 4 : index
    %c0_18 = arith.constant 0 : index
    %c0_19 = arith.constant 0 : index
    %33 = vector.load %arg2[%c4, %c0_18, %c0_19] : memref<9x256x64xf32, #tpu.memory_space<vmem>>, vector<1x256x64xf32>
    %34 = vector.shape_cast %33 : vector<1x256x64xf32> to vector<256x64xf32>
    %cst_20 = arith.constant dense<0.000000e+00> : vector<4x64xf32>
    %35 = tpu.matmul %1, %34, %cst_20 {dimension_numbers = #tpu.dot_dimension_numbers<[1], [0], [0], [1], [0, 0, 1, 1], [], []>} : vector<4x256xf32>, vector<256x64xf32>, vector<4x64xf32> -> vector<4x64xf32>
    %36 = vector.extract_strided_slice %4 {offsets = [0, 4], sizes = [4, 1], strides = [1, 1]} : vector<4x9xf32> to vector<4x1xf32>
    %37 = vector.broadcast %36 : vector<4x1xf32> to vector<4x64xf32>
    %38 = arith.mulf %35, %37 : vector<4x64xf32>
    %39 = arith.addf %32, %38 : vector<4x64xf32>
    %c5 = arith.constant 5 : index
    %c0_21 = arith.constant 0 : index
    %c0_22 = arith.constant 0 : index
    %40 = vector.load %arg2[%c5, %c0_21, %c0_22] : memref<9x256x64xf32, #tpu.memory_space<vmem>>, vector<1x256x64xf32>
    %41 = vector.shape_cast %40 : vector<1x256x64xf32> to vector<256x64xf32>
    %cst_23 = arith.constant dense<0.000000e+00> : vector<4x64xf32>
    %42 = tpu.matmul %1, %41, %cst_23 {dimension_numbers = #tpu.dot_dimension_numbers<[1], [0], [0], [1], [0, 0, 1, 1], [], []>} : vector<4x256xf32>, vector<256x64xf32>, vector<4x64xf32> -> vector<4x64xf32>
    %43 = vector.extract_strided_slice %4 {offsets = [0, 5], sizes = [4, 1], strides = [1, 1]} : vector<4x9xf32> to vector<4x1xf32>
    %44 = vector.broadcast %43 : vector<4x1xf32> to vector<4x64xf32>
    %45 = arith.mulf %42, %44 : vector<4x64xf32>
    %46 = arith.addf %39, %45 : vector<4x64xf32>
    %c6 = arith.constant 6 : index
    %c0_24 = arith.constant 0 : index
    %c0_25 = arith.constant 0 : index
    %47 = vector.load %arg2[%c6, %c0_24, %c0_25] : memref<9x256x64xf32, #tpu.memory_space<vmem>>, vector<1x256x64xf32>
    %48 = vector.shape_cast %47 : vector<1x256x64xf32> to vector<256x64xf32>
    %cst_26 = arith.constant dense<0.000000e+00> : vector<4x64xf32>
    %49 = tpu.matmul %1, %48, %cst_26 {dimension_numbers = #tpu.dot_dimension_numbers<[1], [0], [0], [1], [0, 0, 1, 1], [], []>} : vector<4x256xf32>, vector<256x64xf32>, vector<4x64xf32> -> vector<4x64xf32>
    %50 = vector.extract_strided_slice %4 {offsets = [0, 6], sizes = [4, 1], strides = [1, 1]} : vector<4x9xf32> to vector<4x1xf32>
    %51 = vector.broadcast %50 : vector<4x1xf32> to vector<4x64xf32>
    %52 = arith.mulf %49, %51 : vector<4x64xf32>
    %53 = arith.addf %46, %52 : vector<4x64xf32>
    %c7 = arith.constant 7 : index
    %c0_27 = arith.constant 0 : index
    %c0_28 = arith.constant 0 : index
    %54 = vector.load %arg2[%c7, %c0_27, %c0_28] : memref<9x256x64xf32, #tpu.memory_space<vmem>>, vector<1x256x64xf32>
    %55 = vector.shape_cast %54 : vector<1x256x64xf32> to vector<256x64xf32>
    %cst_29 = arith.constant dense<0.000000e+00> : vector<4x64xf32>
    %56 = tpu.matmul %1, %55, %cst_29 {dimension_numbers = #tpu.dot_dimension_numbers<[1], [0], [0], [1], [0, 0, 1, 1], [], []>} : vector<4x256xf32>, vector<256x64xf32>, vector<4x64xf32> -> vector<4x64xf32>
    %57 = vector.extract_strided_slice %4 {offsets = [0, 7], sizes = [4, 1], strides = [1, 1]} : vector<4x9xf32> to vector<4x1xf32>
    %58 = vector.broadcast %57 : vector<4x1xf32> to vector<4x64xf32>
    %59 = arith.mulf %56, %58 : vector<4x64xf32>
    %60 = arith.addf %53, %59 : vector<4x64xf32>
    %c8 = arith.constant 8 : index
    %c0_30 = arith.constant 0 : index
    %c0_31 = arith.constant 0 : index
    %61 = vector.load %arg2[%c8, %c0_30, %c0_31] : memref<9x256x64xf32, #tpu.memory_space<vmem>>, vector<1x256x64xf32>
    %62 = vector.shape_cast %61 : vector<1x256x64xf32> to vector<256x64xf32>
    %cst_32 = arith.constant dense<0.000000e+00> : vector<4x64xf32>
    %63 = tpu.matmul %1, %62, %cst_32 {dimension_numbers = #tpu.dot_dimension_numbers<[1], [0], [0], [1], [0, 0, 1, 1], [], []>} : vector<4x256xf32>, vector<256x64xf32>, vector<4x64xf32> -> vector<4x64xf32>
    %64 = vector.extract_strided_slice %4 {offsets = [0, 8], sizes = [4, 1], strides = [1, 1]} : vector<4x9xf32> to vector<4x1xf32>
    %65 = vector.broadcast %64 : vector<4x1xf32> to vector<4x64xf32>
    %66 = arith.mulf %63, %65 : vector<4x64xf32>
    %67 = arith.addf %60, %66 : vector<4x64xf32>
    %68 = vector.broadcast %5 : vector<4x1xf32> to vector<4x64xf32>
    %69 = arith.addf %67, %68 : vector<4x64xf32>
    %70 = vector.extract_strided_slice %3 {offsets = [4, 0], sizes = [4, 1], strides = [1, 1]} : vector<52x1xf32> to vector<4x1xf32>
    %c0_33 = arith.constant 0 : index
    %c0_34 = arith.constant 0 : index
    %71 = vector.load %arg7[%c0_33, %c0_34] : memref<4x4xf32, #tpu.memory_space<vmem>>, vector<4x4xf32>
    %cst_35 = arith.constant dense<0.000000e+00> : vector<4x64xf32>
    %72 = tpu.matmul %71, %69, %cst_35 {dimension_numbers = #tpu.dot_dimension_numbers<[1], [0], [0], [1], [0, 0, 1, 1], [], []>} : vector<4x4xf32>, vector<4x64xf32>, vector<4x64xf32> -> vector<4x64xf32>
    %73 = vector.broadcast %70 : vector<4x1xf32> to vector<4x64xf32>
    %74 = arith.addf %72, %73 : vector<4x64xf32>
    %cst_36 = arith.constant 0.000000e+00 : f32
    %75 = vector.broadcast %cst_36 : f32 to vector<4x64xf32>
    %76 = arith.maximumf %74, %75 : vector<4x64xf32>
    %77 = vector.extract_strided_slice %3 {offsets = [8, 0], sizes = [8, 1], strides = [1, 1]} : vector<52x1xf32> to vector<8x1xf32>
    %c0_37 = arith.constant 0 : index
    %c0_38 = arith.constant 0 : index
    %78 = vector.load %arg8[%c0_37, %c0_38] : memref<8x4xf32, #tpu.memory_space<vmem>>, vector<8x4xf32>
    %cst_39 = arith.constant dense<0.000000e+00> : vector<8x256xf32>
    %79 = tpu.matmul %78, %1, %cst_39 {dimension_numbers = #tpu.dot_dimension_numbers<[1], [0], [0], [1], [0, 0, 1, 1], [], []>} : vector<8x4xf32>, vector<4x256xf32>, vector<8x256xf32> -> vector<8x256xf32>
    %80 = vector.broadcast %77 : vector<8x1xf32> to vector<8x256xf32>
    %81 = arith.addf %79, %80 : vector<8x256xf32>
    %cst_40 = arith.constant 0.000000e+00 : f32
    %82 = vector.broadcast %cst_40 : f32 to vector<8x256xf32>
    %83 = arith.maximumf %81, %82 : vector<8x256xf32>
    %84 = vector.extract_strided_slice %2 {offsets = [4, 0], sizes = [8, 9], strides = [1, 1]} : vector<20x9xf32> to vector<8x9xf32>
    %85 = vector.extract_strided_slice %3 {offsets = [16, 0], sizes = [8, 1], strides = [1, 1]} : vector<52x1xf32> to vector<8x1xf32>
    %c0_41 = arith.constant 0 : index
    %c0_42 = arith.constant 0 : index
    %c0_43 = arith.constant 0 : index
    %86 = vector.load %arg2[%c0_41, %c0_42, %c0_43] : memref<9x256x64xf32, #tpu.memory_space<vmem>>, vector<1x256x64xf32>
    %87 = vector.shape_cast %86 : vector<1x256x64xf32> to vector<256x64xf32>
    %cst_44 = arith.constant dense<0.000000e+00> : vector<8x64xf32>
    %88 = tpu.matmul %83, %87, %cst_44 {dimension_numbers = #tpu.dot_dimension_numbers<[1], [0], [0], [1], [0, 0, 1, 1], [], []>} : vector<8x256xf32>, vector<256x64xf32>, vector<8x64xf32> -> vector<8x64xf32>
    %89 = vector.extract_strided_slice %84 {offsets = [0, 0], sizes = [8, 1], strides = [1, 1]} : vector<8x9xf32> to vector<8x1xf32>
    %90 = vector.broadcast %89 : vector<8x1xf32> to vector<8x64xf32>
    %91 = arith.mulf %88, %90 : vector<8x64xf32>
    %c1_45 = arith.constant 1 : index
    %c0_46 = arith.constant 0 : index
    %c0_47 = arith.constant 0 : index
    %92 = vector.load %arg2[%c1_45, %c0_46, %c0_47] : memref<9x256x64xf32, #tpu.memory_space<vmem>>, vector<1x256x64xf32>
    %93 = vector.shape_cast %92 : vector<1x256x64xf32> to vector<256x64xf32>
    %cst_48 = arith.constant dense<0.000000e+00> : vector<8x64xf32>
    %94 = tpu.matmul %83, %93, %cst_48 {dimension_numbers = #tpu.dot_dimension_numbers<[1], [0], [0], [1], [0, 0, 1, 1], [], []>} : vector<8x256xf32>, vector<256x64xf32>, vector<8x64xf32> -> vector<8x64xf32>
    %95 = vector.extract_strided_slice %84 {offsets = [0, 1], sizes = [8, 1], strides = [1, 1]} : vector<8x9xf32> to vector<8x1xf32>
    %96 = vector.broadcast %95 : vector<8x1xf32> to vector<8x64xf32>
    %97 = arith.mulf %94, %96 : vector<8x64xf32>
    %98 = arith.addf %91, %97 : vector<8x64xf32>
    %c2_49 = arith.constant 2 : index
    %c0_50 = arith.constant 0 : index
    %c0_51 = arith.constant 0 : index
    %99 = vector.load %arg2[%c2_49, %c0_50, %c0_51] : memref<9x256x64xf32, #tpu.memory_space<vmem>>, vector<1x256x64xf32>
    %100 = vector.shape_cast %99 : vector<1x256x64xf32> to vector<256x64xf32>
    %cst_52 = arith.constant dense<0.000000e+00> : vector<8x64xf32>
    %101 = tpu.matmul %83, %100, %cst_52 {dimension_numbers = #tpu.dot_dimension_numbers<[1], [0], [0], [1], [0, 0, 1, 1], [], []>} : vector<8x256xf32>, vector<256x64xf32>, vector<8x64xf32> -> vector<8x64xf32>
    %102 = vector.extract_strided_slice %84 {offsets = [0, 2], sizes = [8, 1], strides = [1, 1]} : vector<8x9xf32> to vector<8x1xf32>
    %103 = vector.broadcast %102 : vector<8x1xf32> to vector<8x64xf32>
    %104 = arith.mulf %101, %103 : vector<8x64xf32>
    %105 = arith.addf %98, %104 : vector<8x64xf32>
    %c3_53 = arith.constant 3 : index
    %c0_54 = arith.constant 0 : index
    %c0_55 = arith.constant 0 : index
    %106 = vector.load %arg2[%c3_53, %c0_54, %c0_55] : memref<9x256x64xf32, #tpu.memory_space<vmem>>, vector<1x256x64xf32>
    %107 = vector.shape_cast %106 : vector<1x256x64xf32> to vector<256x64xf32>
    %cst_56 = arith.constant dense<0.000000e+00> : vector<8x64xf32>
    %108 = tpu.matmul %83, %107, %cst_56 {dimension_numbers = #tpu.dot_dimension_numbers<[1], [0], [0], [1], [0, 0, 1, 1], [], []>} : vector<8x256xf32>, vector<256x64xf32>, vector<8x64xf32> -> vector<8x64xf32>
    %109 = vector.extract_strided_slice %84 {offsets = [0, 3], sizes = [8, 1], strides = [1, 1]} : vector<8x9xf32> to vector<8x1xf32>
    %110 = vector.broadcast %109 : vector<8x1xf32> to vector<8x64xf32>
    %111 = arith.mulf %108, %110 : vector<8x64xf32>
    %112 = arith.addf %105, %111 : vector<8x64xf32>
    %c4_57 = arith.constant 4 : index
    %c0_58 = arith.constant 0 : index
    %c0_59 = arith.constant 0 : index
    %113 = vector.load %arg2[%c4_57, %c0_58, %c0_59] : memref<9x256x64xf32, #tpu.memory_space<vmem>>, vector<1x256x64xf32>
    %114 = vector.shape_cast %113 : vector<1x256x64xf32> to vector<256x64xf32>
    %cst_60 = arith.constant dense<0.000000e+00> : vector<8x64xf32>
    %115 = tpu.matmul %83, %114, %cst_60 {dimension_numbers = #tpu.dot_dimension_numbers<[1], [0], [0], [1], [0, 0, 1, 1], [], []>} : vector<8x256xf32>, vector<256x64xf32>, vector<8x64xf32> -> vector<8x64xf32>
    %116 = vector.extract_strided_slice %84 {offsets = [0, 4], sizes = [8, 1], strides = [1, 1]} : vector<8x9xf32> to vector<8x1xf32>
    %117 = vector.broadcast %116 : vector<8x1xf32> to vector<8x64xf32>
    %118 = arith.mulf %115, %117 : vector<8x64xf32>
    %119 = arith.addf %112, %118 : vector<8x64xf32>
    %c5_61 = arith.constant 5 : index
    %c0_62 = arith.constant 0 : index
    %c0_63 = arith.constant 0 : index
    %120 = vector.load %arg2[%c5_61, %c0_62, %c0_63] : memref<9x256x64xf32, #tpu.memory_space<vmem>>, vector<1x256x64xf32>
    %121 = vector.shape_cast %120 : vector<1x256x64xf32> to vector<256x64xf32>
    %cst_64 = arith.constant dense<0.000000e+00> : vector<8x64xf32>
    %122 = tpu.matmul %83, %121, %cst_64 {dimension_numbers = #tpu.dot_dimension_numbers<[1], [0], [0], [1], [0, 0, 1, 1], [], []>} : vector<8x256xf32>, vector<256x64xf32>, vector<8x64xf32> -> vector<8x64xf32>
    %123 = vector.extract_strided_slice %84 {offsets = [0, 5], sizes = [8, 1], strides = [1, 1]} : vector<8x9xf32> to vector<8x1xf32>
    %124 = vector.broadcast %123 : vector<8x1xf32> to vector<8x64xf32>
    %125 = arith.mulf %122, %124 : vector<8x64xf32>
    %126 = arith.addf %119, %125 : vector<8x64xf32>
    %c6_65 = arith.constant 6 : index
    %c0_66 = arith.constant 0 : index
    %c0_67 = arith.constant 0 : index
    %127 = vector.load %arg2[%c6_65, %c0_66, %c0_67] : memref<9x256x64xf32, #tpu.memory_space<vmem>>, vector<1x256x64xf32>
    %128 = vector.shape_cast %127 : vector<1x256x64xf32> to vector<256x64xf32>
    %cst_68 = arith.constant dense<0.000000e+00> : vector<8x64xf32>
    %129 = tpu.matmul %83, %128, %cst_68 {dimension_numbers = #tpu.dot_dimension_numbers<[1], [0], [0], [1], [0, 0, 1, 1], [], []>} : vector<8x256xf32>, vector<256x64xf32>, vector<8x64xf32> -> vector<8x64xf32>
    %130 = vector.extract_strided_slice %84 {offsets = [0, 6], sizes = [8, 1], strides = [1, 1]} : vector<8x9xf32> to vector<8x1xf32>
    %131 = vector.broadcast %130 : vector<8x1xf32> to vector<8x64xf32>
    %132 = arith.mulf %129, %131 : vector<8x64xf32>
    %133 = arith.addf %126, %132 : vector<8x64xf32>
    %c7_69 = arith.constant 7 : index
    %c0_70 = arith.constant 0 : index
    %c0_71 = arith.constant 0 : index
    %134 = vector.load %arg2[%c7_69, %c0_70, %c0_71] : memref<9x256x64xf32, #tpu.memory_space<vmem>>, vector<1x256x64xf32>
    %135 = vector.shape_cast %134 : vector<1x256x64xf32> to vector<256x64xf32>
    %cst_72 = arith.constant dense<0.000000e+00> : vector<8x64xf32>
    %136 = tpu.matmul %83, %135, %cst_72 {dimension_numbers = #tpu.dot_dimension_numbers<[1], [0], [0], [1], [0, 0, 1, 1], [], []>} : vector<8x256xf32>, vector<256x64xf32>, vector<8x64xf32> -> vector<8x64xf32>
    %137 = vector.extract_strided_slice %84 {offsets = [0, 7], sizes = [8, 1], strides = [1, 1]} : vector<8x9xf32> to vector<8x1xf32>
    %138 = vector.broadcast %137 : vector<8x1xf32> to vector<8x64xf32>
    %139 = arith.mulf %136, %138 : vector<8x64xf32>
    %140 = arith.addf %133, %139 : vector<8x64xf32>
    %c8_73 = arith.constant 8 : index
    %c0_74 = arith.constant 0 : index
    %c0_75 = arith.constant 0 : index
    %141 = vector.load %arg2[%c8_73, %c0_74, %c0_75] : memref<9x256x64xf32, #tpu.memory_space<vmem>>, vector<1x256x64xf32>
    %142 = vector.shape_cast %141 : vector<1x256x64xf32> to vector<256x64xf32>
    %cst_76 = arith.constant dense<0.000000e+00> : vector<8x64xf32>
    %143 = tpu.matmul %83, %142, %cst_76 {dimension_numbers = #tpu.dot_dimension_numbers<[1], [0], [0], [1], [0, 0, 1, 1], [], []>} : vector<8x256xf32>, vector<256x64xf32>, vector<8x64xf32> -> vector<8x64xf32>
    %144 = vector.extract_strided_slice %84 {offsets = [0, 8], sizes = [8, 1], strides = [1, 1]} : vector<8x9xf32> to vector<8x1xf32>
    %145 = vector.broadcast %144 : vector<8x1xf32> to vector<8x64xf32>
    %146 = arith.mulf %143, %145 : vector<8x64xf32>
    %147 = arith.addf %140, %146 : vector<8x64xf32>
    %148 = vector.broadcast %85 : vector<8x1xf32> to vector<8x64xf32>
    %149 = arith.addf %147, %148 : vector<8x64xf32>
    %cst_77 = arith.constant dense<0.000000e+00> : vector<8xf32>
    %150 = vector.multi_reduction <add>, %149, %cst_77 [1] : vector<8x64xf32> to vector<8xf32>
    %151 = vector.shape_cast %150 : vector<8xf32> to vector<8x1xf32>
    %cst_78 = arith.constant 1.562500e-02 : f32
    %152 = vector.broadcast %cst_78 : f32 to vector<8x1xf32>
    %153 = arith.mulf %151, %152 : vector<8x1xf32>
    %c0_79 = arith.constant 0 : index
    %c0_80 = arith.constant 0 : index
    %154 = vector.load %arg11[%c0_79, %c0_80] : memref<8x2xf32, #tpu.memory_space<vmem>>, vector<8x2xf32>
    %155 = vector.broadcast %153 : vector<8x1xf32> to vector<8x2xf32>
    %156 = arith.mulf %154, %155 : vector<8x2xf32>
    %cst_81 = arith.constant dense<0.000000e+00> : vector<2xf32>
    %157 = vector.multi_reduction <add>, %156, %cst_81 [0] : vector<8x2xf32> to vector<2xf32>
    %158 = vector.shape_cast %157 : vector<2xf32> to vector<1x2xf32>
    %c0_82 = arith.constant 0 : index
    %c0_83 = arith.constant 0 : index
    %159 = vector.load %arg6[%c0_82, %c0_83] : memref<1x2xf32, #tpu.memory_space<vmem>>, vector<1x2xf32>
    %160 = arith.addf %158, %159 : vector<1x2xf32>
    %cst_84 = arith.constant 0.000000e+00 : f32
    %161 = vector.broadcast %cst_84 : f32 to vector<1x2xf32>
    %162 = arith.maximumf %160, %161 : vector<1x2xf32>
    %c0_85 = arith.constant 0 : index
    %c0_86 = arith.constant 0 : index
    %163 = vector.load %arg12[%c0_85, %c0_86] : memref<8x2xf32, #tpu.memory_space<vmem>>, vector<8x2xf32>
    %164 = vector.broadcast %162 : vector<1x2xf32> to vector<8x2xf32>
    %165 = arith.mulf %163, %164 : vector<8x2xf32>
    %cst_87 = arith.constant dense<0.000000e+00> : vector<8xf32>
    %166 = vector.multi_reduction <add>, %165, %cst_87 [1] : vector<8x2xf32> to vector<8xf32>
    %167 = vector.shape_cast %166 : vector<8xf32> to vector<8x1xf32>
    %168 = vector.extract_strided_slice %3 {offsets = [24, 0], sizes = [8, 1], strides = [1, 1]} : vector<52x1xf32> to vector<8x1xf32>
    %169 = arith.addf %167, %168 : vector<8x1xf32>
    %cst_88 = arith.constant 3.000000e+00 : f32
    %170 = vector.broadcast %cst_88 : f32 to vector<8x1xf32>
    %171 = arith.addf %169, %170 : vector<8x1xf32>
    %cst_89 = arith.constant 0.000000e+00 : f32
    %cst_90 = arith.constant 6.000000e+00 : f32
    %172 = vector.broadcast %cst_89 : f32 to vector<8x1xf32>
    %173 = arith.maximumf %172, %171 : vector<8x1xf32>
    %174 = vector.broadcast %cst_90 : f32 to vector<8x1xf32>
    %175 = arith.minimumf %174, %173 : vector<8x1xf32>
    %cst_91 = arith.constant 0.166666672 : f32
    %176 = vector.broadcast %cst_91 : f32 to vector<8x1xf32>
    %177 = arith.mulf %175, %176 : vector<8x1xf32>
    %178 = vector.broadcast %177 : vector<8x1xf32> to vector<8x64xf32>
    %179 = arith.mulf %149, %178 : vector<8x64xf32>
    %180 = vector.extract_strided_slice %3 {offsets = [32, 0], sizes = [4, 1], strides = [1, 1]} : vector<52x1xf32> to vector<4x1xf32>
    %c0_92 = arith.constant 0 : index
    %c0_93 = arith.constant 0 : index
    %181 = vector.load %arg9[%c0_92, %c0_93] : memref<4x8xf32, #tpu.memory_space<vmem>>, vector<4x8xf32>
    %cst_94 = arith.constant dense<0.000000e+00> : vector<4x64xf32>
    %182 = tpu.matmul %181, %179, %cst_94 {dimension_numbers = #tpu.dot_dimension_numbers<[1], [0], [0], [1], [0, 0, 1, 1], [], []>} : vector<4x8xf32>, vector<8x64xf32>, vector<4x64xf32> -> vector<4x64xf32>
    %183 = vector.broadcast %180 : vector<4x1xf32> to vector<4x64xf32>
    %184 = arith.addf %182, %183 : vector<4x64xf32>
    %cst_95 = arith.constant 0.000000e+00 : f32
    %185 = vector.broadcast %cst_95 : f32 to vector<4x64xf32>
    %186 = arith.maximumf %184, %185 : vector<4x64xf32>
    %187 = vector.extract_strided_slice %2 {offsets = [12, 0], sizes = [4, 9], strides = [1, 1]} : vector<20x9xf32> to vector<4x9xf32>
    %188 = vector.extract_strided_slice %3 {offsets = [36, 0], sizes = [4, 1], strides = [1, 1]} : vector<52x1xf32> to vector<4x1xf32>
    %c0_96 = arith.constant 0 : index
    %c0_97 = arith.constant 0 : index
    %c0_98 = arith.constant 0 : index
    %189 = vector.load %arg3[%c0_96, %c0_97, %c0_98] : memref<9x64x64xf32, #tpu.memory_space<vmem>>, vector<1x64x64xf32>
    %190 = vector.shape_cast %189 : vector<1x64x64xf32> to vector<64x64xf32>
    %cst_99 = arith.constant dense<0.000000e+00> : vector<4x64xf32>
    %191 = tpu.matmul %76, %190, %cst_99 {dimension_numbers = #tpu.dot_dimension_numbers<[1], [0], [0], [1], [0, 0, 1, 1], [], []>} : vector<4x64xf32>, vector<64x64xf32>, vector<4x64xf32> -> vector<4x64xf32>
    %192 = vector.extract_strided_slice %187 {offsets = [0, 0], sizes = [4, 1], strides = [1, 1]} : vector<4x9xf32> to vector<4x1xf32>
    %193 = vector.broadcast %192 : vector<4x1xf32> to vector<4x64xf32>
    %194 = arith.mulf %191, %193 : vector<4x64xf32>
    %c1_100 = arith.constant 1 : index
    %c0_101 = arith.constant 0 : index
    %c0_102 = arith.constant 0 : index
    %195 = vector.load %arg3[%c1_100, %c0_101, %c0_102] : memref<9x64x64xf32, #tpu.memory_space<vmem>>, vector<1x64x64xf32>
    %196 = vector.shape_cast %195 : vector<1x64x64xf32> to vector<64x64xf32>
    %cst_103 = arith.constant dense<0.000000e+00> : vector<4x64xf32>
    %197 = tpu.matmul %76, %196, %cst_103 {dimension_numbers = #tpu.dot_dimension_numbers<[1], [0], [0], [1], [0, 0, 1, 1], [], []>} : vector<4x64xf32>, vector<64x64xf32>, vector<4x64xf32> -> vector<4x64xf32>
    %198 = vector.extract_strided_slice %187 {offsets = [0, 1], sizes = [4, 1], strides = [1, 1]} : vector<4x9xf32> to vector<4x1xf32>
    %199 = vector.broadcast %198 : vector<4x1xf32> to vector<4x64xf32>
    %200 = arith.mulf %197, %199 : vector<4x64xf32>
    %201 = arith.addf %194, %200 : vector<4x64xf32>
    %c2_104 = arith.constant 2 : index
    %c0_105 = arith.constant 0 : index
    %c0_106 = arith.constant 0 : index
    %202 = vector.load %arg3[%c2_104, %c0_105, %c0_106] : memref<9x64x64xf32, #tpu.memory_space<vmem>>, vector<1x64x64xf32>
    %203 = vector.shape_cast %202 : vector<1x64x64xf32> to vector<64x64xf32>
    %cst_107 = arith.constant dense<0.000000e+00> : vector<4x64xf32>
    %204 = tpu.matmul %76, %203, %cst_107 {dimension_numbers = #tpu.dot_dimension_numbers<[1], [0], [0], [1], [0, 0, 1, 1], [], []>} : vector<4x64xf32>, vector<64x64xf32>, vector<4x64xf32> -> vector<4x64xf32>
    %205 = vector.extract_strided_slice %187 {offsets = [0, 2], sizes = [4, 1], strides = [1, 1]} : vector<4x9xf32> to vector<4x1xf32>
    %206 = vector.broadcast %205 : vector<4x1xf32> to vector<4x64xf32>
    %207 = arith.mulf %204, %206 : vector<4x64xf32>
    %208 = arith.addf %201, %207 : vector<4x64xf32>
    %c3_108 = arith.constant 3 : index
    %c0_109 = arith.constant 0 : index
    %c0_110 = arith.constant 0 : index
    %209 = vector.load %arg3[%c3_108, %c0_109, %c0_110] : memref<9x64x64xf32, #tpu.memory_space<vmem>>, vector<1x64x64xf32>
    %210 = vector.shape_cast %209 : vector<1x64x64xf32> to vector<64x64xf32>
    %cst_111 = arith.constant dense<0.000000e+00> : vector<4x64xf32>
    %211 = tpu.matmul %76, %210, %cst_111 {dimension_numbers = #tpu.dot_dimension_numbers<[1], [0], [0], [1], [0, 0, 1, 1], [], []>} : vector<4x64xf32>, vector<64x64xf32>, vector<4x64xf32> -> vector<4x64xf32>
    %212 = vector.extract_strided_slice %187 {offsets = [0, 3], sizes = [4, 1], strides = [1, 1]} : vector<4x9xf32> to vector<4x1xf32>
    %213 = vector.broadcast %212 : vector<4x1xf32> to vector<4x64xf32>
    %214 = arith.mulf %211, %213 : vector<4x64xf32>
    %215 = arith.addf %208, %214 : vector<4x64xf32>
    %c4_112 = arith.constant 4 : index
    %c0_113 = arith.constant 0 : index
    %c0_114 = arith.constant 0 : index
    %216 = vector.load %arg3[%c4_112, %c0_113, %c0_114] : memref<9x64x64xf32, #tpu.memory_space<vmem>>, vector<1x64x64xf32>
    %217 = vector.shape_cast %216 : vector<1x64x64xf32> to vector<64x64xf32>
    %cst_115 = arith.constant dense<0.000000e+00> : vector<4x64xf32>
    %218 = tpu.matmul %76, %217, %cst_115 {dimension_numbers = #tpu.dot_dimension_numbers<[1], [0], [0], [1], [0, 0, 1, 1], [], []>} : vector<4x64xf32>, vector<64x64xf32>, vector<4x64xf32> -> vector<4x64xf32>
    %219 = vector.extract_strided_slice %187 {offsets = [0, 4], sizes = [4, 1], strides = [1, 1]} : vector<4x9xf32> to vector<4x1xf32>
    %220 = vector.broadcast %219 : vector<4x1xf32> to vector<4x64xf32>
    %221 = arith.mulf %218, %220 : vector<4x64xf32>
    %222 = arith.addf %215, %221 : vector<4x64xf32>
    %c5_116 = arith.constant 5 : index
    %c0_117 = arith.constant 0 : index
    %c0_118 = arith.constant 0 : index
    %223 = vector.load %arg3[%c5_116, %c0_117, %c0_118] : memref<9x64x64xf32, #tpu.memory_space<vmem>>, vector<1x64x64xf32>
    %224 = vector.shape_cast %223 : vector<1x64x64xf32> to vector<64x64xf32>
    %cst_119 = arith.constant dense<0.000000e+00> : vector<4x64xf32>
    %225 = tpu.matmul %76, %224, %cst_119 {dimension_numbers = #tpu.dot_dimension_numbers<[1], [0], [0], [1], [0, 0, 1, 1], [], []>} : vector<4x64xf32>, vector<64x64xf32>, vector<4x64xf32> -> vector<4x64xf32>
    %226 = vector.extract_strided_slice %187 {offsets = [0, 5], sizes = [4, 1], strides = [1, 1]} : vector<4x9xf32> to vector<4x1xf32>
    %227 = vector.broadcast %226 : vector<4x1xf32> to vector<4x64xf32>
    %228 = arith.mulf %225, %227 : vector<4x64xf32>
    %229 = arith.addf %222, %228 : vector<4x64xf32>
    %c6_120 = arith.constant 6 : index
    %c0_121 = arith.constant 0 : index
    %c0_122 = arith.constant 0 : index
    %230 = vector.load %arg3[%c6_120, %c0_121, %c0_122] : memref<9x64x64xf32, #tpu.memory_space<vmem>>, vector<1x64x64xf32>
    %231 = vector.shape_cast %230 : vector<1x64x64xf32> to vector<64x64xf32>
    %cst_123 = arith.constant dense<0.000000e+00> : vector<4x64xf32>
    %232 = tpu.matmul %76, %231, %cst_123 {dimension_numbers = #tpu.dot_dimension_numbers<[1], [0], [0], [1], [0, 0, 1, 1], [], []>} : vector<4x64xf32>, vector<64x64xf32>, vector<4x64xf32> -> vector<4x64xf32>
    %233 = vector.extract_strided_slice %187 {offsets = [0, 6], sizes = [4, 1], strides = [1, 1]} : vector<4x9xf32> to vector<4x1xf32>
    %234 = vector.broadcast %233 : vector<4x1xf32> to vector<4x64xf32>
    %235 = arith.mulf %232, %234 : vector<4x64xf32>
    %236 = arith.addf %229, %235 : vector<4x64xf32>
    %c7_124 = arith.constant 7 : index
    %c0_125 = arith.constant 0 : index
    %c0_126 = arith.constant 0 : index
    %237 = vector.load %arg3[%c7_124, %c0_125, %c0_126] : memref<9x64x64xf32, #tpu.memory_space<vmem>>, vector<1x64x64xf32>
    %238 = vector.shape_cast %237 : vector<1x64x64xf32> to vector<64x64xf32>
    %cst_127 = arith.constant dense<0.000000e+00> : vector<4x64xf32>
    %239 = tpu.matmul %76, %238, %cst_127 {dimension_numbers = #tpu.dot_dimension_numbers<[1], [0], [0], [1], [0, 0, 1, 1], [], []>} : vector<4x64xf32>, vector<64x64xf32>, vector<4x64xf32> -> vector<4x64xf32>
    %240 = vector.extract_strided_slice %187 {offsets = [0, 7], sizes = [4, 1], strides = [1, 1]} : vector<4x9xf32> to vector<4x1xf32>
    %241 = vector.broadcast %240 : vector<4x1xf32> to vector<4x64xf32>
    %242 = arith.mulf %239, %241 : vector<4x64xf32>
    %243 = arith.addf %236, %242 : vector<4x64xf32>
    %c8_128 = arith.constant 8 : index
    %c0_129 = arith.constant 0 : index
    %c0_130 = arith.constant 0 : index
    %244 = vector.load %arg3[%c8_128, %c0_129, %c0_130] : memref<9x64x64xf32, #tpu.memory_space<vmem>>, vector<1x64x64xf32>
    %245 = vector.shape_cast %244 : vector<1x64x64xf32> to vector<64x64xf32>
    %cst_131 = arith.constant dense<0.000000e+00> : vector<4x64xf32>
    %246 = tpu.matmul %76, %245, %cst_131 {dimension_numbers = #tpu.dot_dimension_numbers<[1], [0], [0], [1], [0, 0, 1, 1], [], []>} : vector<4x64xf32>, vector<64x64xf32>, vector<4x64xf32> -> vector<4x64xf32>
    %247 = vector.extract_strided_slice %187 {offsets = [0, 8], sizes = [4, 1], strides = [1, 1]} : vector<4x9xf32> to vector<4x1xf32>
    %248 = vector.broadcast %247 : vector<4x1xf32> to vector<4x64xf32>
    %249 = arith.mulf %246, %248 : vector<4x64xf32>
    %250 = arith.addf %243, %249 : vector<4x64xf32>
    %251 = vector.broadcast %188 : vector<4x1xf32> to vector<4x64xf32>
    %252 = arith.addf %250, %251 : vector<4x64xf32>
    %cst_132 = arith.constant 3.000000e+00 : f32
    %253 = vector.broadcast %cst_132 : f32 to vector<4x64xf32>
    %254 = arith.addf %252, %253 : vector<4x64xf32>
    %cst_133 = arith.constant 0.000000e+00 : f32
    %cst_134 = arith.constant 6.000000e+00 : f32
    %255 = vector.broadcast %cst_133 : f32 to vector<4x64xf32>
    %256 = arith.maximumf %255, %254 : vector<4x64xf32>
    %257 = vector.broadcast %cst_134 : f32 to vector<4x64xf32>
    %258 = arith.minimumf %257, %256 : vector<4x64xf32>
    %cst_135 = arith.constant 0.166666672 : f32
    %259 = vector.broadcast %cst_135 : f32 to vector<4x64xf32>
    %260 = arith.mulf %258, %259 : vector<4x64xf32>
    %261 = arith.mulf %252, %260 : vector<4x64xf32>
    %262 = vector.extract_strided_slice %2 {offsets = [16, 0], sizes = [4, 9], strides = [1, 1]} : vector<20x9xf32> to vector<4x9xf32>
    %263 = vector.extract_strided_slice %3 {offsets = [40, 0], sizes = [4, 1], strides = [1, 1]} : vector<52x1xf32> to vector<4x1xf32>
    %c0_136 = arith.constant 0 : index
    %c0_137 = arith.constant 0 : index
    %c0_138 = arith.constant 0 : index
    %264 = vector.load %arg3[%c0_136, %c0_137, %c0_138] : memref<9x64x64xf32, #tpu.memory_space<vmem>>, vector<1x64x64xf32>
    %265 = vector.shape_cast %264 : vector<1x64x64xf32> to vector<64x64xf32>
    %cst_139 = arith.constant dense<0.000000e+00> : vector<4x64xf32>
    %266 = tpu.matmul %186, %265, %cst_139 {dimension_numbers = #tpu.dot_dimension_numbers<[1], [0], [0], [1], [0, 0, 1, 1], [], []>} : vector<4x64xf32>, vector<64x64xf32>, vector<4x64xf32> -> vector<4x64xf32>
    %267 = vector.extract_strided_slice %262 {offsets = [0, 0], sizes = [4, 1], strides = [1, 1]} : vector<4x9xf32> to vector<4x1xf32>
    %268 = vector.broadcast %267 : vector<4x1xf32> to vector<4x64xf32>
    %269 = arith.mulf %266, %268 : vector<4x64xf32>
    %c1_140 = arith.constant 1 : index
    %c0_141 = arith.constant 0 : index
    %c0_142 = arith.constant 0 : index
    %270 = vector.load %arg3[%c1_140, %c0_141, %c0_142] : memref<9x64x64xf32, #tpu.memory_space<vmem>>, vector<1x64x64xf32>
    %271 = vector.shape_cast %270 : vector<1x64x64xf32> to vector<64x64xf32>
    %cst_143 = arith.constant dense<0.000000e+00> : vector<4x64xf32>
    %272 = tpu.matmul %186, %271, %cst_143 {dimension_numbers = #tpu.dot_dimension_numbers<[1], [0], [0], [1], [0, 0, 1, 1], [], []>} : vector<4x64xf32>, vector<64x64xf32>, vector<4x64xf32> -> vector<4x64xf32>
    %273 = vector.extract_strided_slice %262 {offsets = [0, 1], sizes = [4, 1], strides = [1, 1]} : vector<4x9xf32> to vector<4x1xf32>
    %274 = vector.broadcast %273 : vector<4x1xf32> to vector<4x64xf32>
    %275 = arith.mulf %272, %274 : vector<4x64xf32>
    %276 = arith.addf %269, %275 : vector<4x64xf32>
    %c2_144 = arith.constant 2 : index
    %c0_145 = arith.constant 0 : index
    %c0_146 = arith.constant 0 : index
    %277 = vector.load %arg3[%c2_144, %c0_145, %c0_146] : memref<9x64x64xf32, #tpu.memory_space<vmem>>, vector<1x64x64xf32>
    %278 = vector.shape_cast %277 : vector<1x64x64xf32> to vector<64x64xf32>
    %cst_147 = arith.constant dense<0.000000e+00> : vector<4x64xf32>
    %279 = tpu.matmul %186, %278, %cst_147 {dimension_numbers = #tpu.dot_dimension_numbers<[1], [0], [0], [1], [0, 0, 1, 1], [], []>} : vector<4x64xf32>, vector<64x64xf32>, vector<4x64xf32> -> vector<4x64xf32>
    %280 = vector.extract_strided_slice %262 {offsets = [0, 2], sizes = [4, 1], strides = [1, 1]} : vector<4x9xf32> to vector<4x1xf32>
    %281 = vector.broadcast %280 : vector<4x1xf32> to vector<4x64xf32>
    %282 = arith.mulf %279, %281 : vector<4x64xf32>
    %283 = arith.addf %276, %282 : vector<4x64xf32>
    %c3_148 = arith.constant 3 : index
    %c0_149 = arith.constant 0 : index
    %c0_150 = arith.constant 0 : index
    %284 = vector.load %arg3[%c3_148, %c0_149, %c0_150] : memref<9x64x64xf32, #tpu.memory_space<vmem>>, vector<1x64x64xf32>
    %285 = vector.shape_cast %284 : vector<1x64x64xf32> to vector<64x64xf32>
    %cst_151 = arith.constant dense<0.000000e+00> : vector<4x64xf32>
    %286 = tpu.matmul %186, %285, %cst_151 {dimension_numbers = #tpu.dot_dimension_numbers<[1], [0], [0], [1], [0, 0, 1, 1], [], []>} : vector<4x64xf32>, vector<64x64xf32>, vector<4x64xf32> -> vector<4x64xf32>
    %287 = vector.extract_strided_slice %262 {offsets = [0, 3], sizes = [4, 1], strides = [1, 1]} : vector<4x9xf32> to vector<4x1xf32>
    %288 = vector.broadcast %287 : vector<4x1xf32> to vector<4x64xf32>
    %289 = arith.mulf %286, %288 : vector<4x64xf32>
    %290 = arith.addf %283, %289 : vector<4x64xf32>
    %c4_152 = arith.constant 4 : index
    %c0_153 = arith.constant 0 : index
    %c0_154 = arith.constant 0 : index
    %291 = vector.load %arg3[%c4_152, %c0_153, %c0_154] : memref<9x64x64xf32, #tpu.memory_space<vmem>>, vector<1x64x64xf32>
    %292 = vector.shape_cast %291 : vector<1x64x64xf32> to vector<64x64xf32>
    %cst_155 = arith.constant dense<0.000000e+00> : vector<4x64xf32>
    %293 = tpu.matmul %186, %292, %cst_155 {dimension_numbers = #tpu.dot_dimension_numbers<[1], [0], [0], [1], [0, 0, 1, 1], [], []>} : vector<4x64xf32>, vector<64x64xf32>, vector<4x64xf32> -> vector<4x64xf32>
    %294 = vector.extract_strided_slice %262 {offsets = [0, 4], sizes = [4, 1], strides = [1, 1]} : vector<4x9xf32> to vector<4x1xf32>
    %295 = vector.broadcast %294 : vector<4x1xf32> to vector<4x64xf32>
    %296 = arith.mulf %293, %295 : vector<4x64xf32>
    %297 = arith.addf %290, %296 : vector<4x64xf32>
    %c5_156 = arith.constant 5 : index
    %c0_157 = arith.constant 0 : index
    %c0_158 = arith.constant 0 : index
    %298 = vector.load %arg3[%c5_156, %c0_157, %c0_158] : memref<9x64x64xf32, #tpu.memory_space<vmem>>, vector<1x64x64xf32>
    %299 = vector.shape_cast %298 : vector<1x64x64xf32> to vector<64x64xf32>
    %cst_159 = arith.constant dense<0.000000e+00> : vector<4x64xf32>
    %300 = tpu.matmul %186, %299, %cst_159 {dimension_numbers = #tpu.dot_dimension_numbers<[1], [0], [0], [1], [0, 0, 1, 1], [], []>} : vector<4x64xf32>, vector<64x64xf32>, vector<4x64xf32> -> vector<4x64xf32>
    %301 = vector.extract_strided_slice %262 {offsets = [0, 5], sizes = [4, 1], strides = [1, 1]} : vector<4x9xf32> to vector<4x1xf32>
    %302 = vector.broadcast %301 : vector<4x1xf32> to vector<4x64xf32>
    %303 = arith.mulf %300, %302 : vector<4x64xf32>
    %304 = arith.addf %297, %303 : vector<4x64xf32>
    %c6_160 = arith.constant 6 : index
    %c0_161 = arith.constant 0 : index
    %c0_162 = arith.constant 0 : index
    %305 = vector.load %arg3[%c6_160, %c0_161, %c0_162] : memref<9x64x64xf32, #tpu.memory_space<vmem>>, vector<1x64x64xf32>
    %306 = vector.shape_cast %305 : vector<1x64x64xf32> to vector<64x64xf32>
    %cst_163 = arith.constant dense<0.000000e+00> : vector<4x64xf32>
    %307 = tpu.matmul %186, %306, %cst_163 {dimension_numbers = #tpu.dot_dimension_numbers<[1], [0], [0], [1], [0, 0, 1, 1], [], []>} : vector<4x64xf32>, vector<64x64xf32>, vector<4x64xf32> -> vector<4x64xf32>
    %308 = vector.extract_strided_slice %262 {offsets = [0, 6], sizes = [4, 1], strides = [1, 1]} : vector<4x9xf32> to vector<4x1xf32>
    %309 = vector.broadcast %308 : vector<4x1xf32> to vector<4x64xf32>
    %310 = arith.mulf %307, %309 : vector<4x64xf32>
    %311 = arith.addf %304, %310 : vector<4x64xf32>
    %c7_164 = arith.constant 7 : index
    %c0_165 = arith.constant 0 : index
    %c0_166 = arith.constant 0 : index
    %312 = vector.load %arg3[%c7_164, %c0_165, %c0_166] : memref<9x64x64xf32, #tpu.memory_space<vmem>>, vector<1x64x64xf32>
    %313 = vector.shape_cast %312 : vector<1x64x64xf32> to vector<64x64xf32>
    %cst_167 = arith.constant dense<0.000000e+00> : vector<4x64xf32>
    %314 = tpu.matmul %186, %313, %cst_167 {dimension_numbers = #tpu.dot_dimension_numbers<[1], [0], [0], [1], [0, 0, 1, 1], [], []>} : vector<4x64xf32>, vector<64x64xf32>, vector<4x64xf32> -> vector<4x64xf32>
    %315 = vector.extract_strided_slice %262 {offsets = [0, 7], sizes = [4, 1], strides = [1, 1]} : vector<4x9xf32> to vector<4x1xf32>
    %316 = vector.broadcast %315 : vector<4x1xf32> to vector<4x64xf32>
    %317 = arith.mulf %314, %316 : vector<4x64xf32>
    %318 = arith.addf %311, %317 : vector<4x64xf32>
    %c8_168 = arith.constant 8 : index
    %c0_169 = arith.constant 0 : index
    %c0_170 = arith.constant 0 : index
    %319 = vector.load %arg3[%c8_168, %c0_169, %c0_170] : memref<9x64x64xf32, #tpu.memory_space<vmem>>, vector<1x64x64xf32>
    %320 = vector.shape_cast %319 : vector<1x64x64xf32> to vector<64x64xf32>
    %cst_171 = arith.constant dense<0.000000e+00> : vector<4x64xf32>
    %321 = tpu.matmul %186, %320, %cst_171 {dimension_numbers = #tpu.dot_dimension_numbers<[1], [0], [0], [1], [0, 0, 1, 1], [], []>} : vector<4x64xf32>, vector<64x64xf32>, vector<4x64xf32> -> vector<4x64xf32>
    %322 = vector.extract_strided_slice %262 {offsets = [0, 8], sizes = [4, 1], strides = [1, 1]} : vector<4x9xf32> to vector<4x1xf32>
    %323 = vector.broadcast %322 : vector<4x1xf32> to vector<4x64xf32>
    %324 = arith.mulf %321, %323 : vector<4x64xf32>
    %325 = arith.addf %318, %324 : vector<4x64xf32>
    %326 = vector.broadcast %263 : vector<4x1xf32> to vector<4x64xf32>
    %327 = arith.addf %325, %326 : vector<4x64xf32>
    %cst_172 = arith.constant 3.000000e+00 : f32
    %328 = vector.broadcast %cst_172 : f32 to vector<4x64xf32>
    %329 = arith.addf %327, %328 : vector<4x64xf32>
    %cst_173 = arith.constant 0.000000e+00 : f32
    %cst_174 = arith.constant 6.000000e+00 : f32
    %330 = vector.broadcast %cst_173 : f32 to vector<4x64xf32>
    %331 = arith.maximumf %330, %329 : vector<4x64xf32>
    %332 = vector.broadcast %cst_174 : f32 to vector<4x64xf32>
    %333 = arith.minimumf %332, %331 : vector<4x64xf32>
    %cst_175 = arith.constant 0.166666672 : f32
    %334 = vector.broadcast %cst_175 : f32 to vector<4x64xf32>
    %335 = arith.mulf %333, %334 : vector<4x64xf32>
    %336 = arith.mulf %327, %335 : vector<4x64xf32>
    %c0_176 = arith.constant 0 : index
    %c0_177 = arith.constant 0 : index
    %337 = vector.load %arg10[%c0_176, %c0_177] : memref<8x8xf32, #tpu.memory_space<vmem>>, vector<8x8xf32>
    %338 = vector.extract_strided_slice %337 {offsets = [0, 0], sizes = [8, 4], strides = [1, 1]} : vector<8x8xf32> to vector<8x4xf32>
    %cst_178 = arith.constant dense<0.000000e+00> : vector<8x64xf32>
    %339 = tpu.matmul %338, %261, %cst_178 {dimension_numbers = #tpu.dot_dimension_numbers<[1], [0], [0], [1], [0, 0, 1, 1], [], []>} : vector<8x4xf32>, vector<4x64xf32>, vector<8x64xf32> -> vector<8x64xf32>
    %340 = vector.extract_strided_slice %337 {offsets = [0, 4], sizes = [8, 4], strides = [1, 1]} : vector<8x8xf32> to vector<8x4xf32>
    %cst_179 = arith.constant dense<0.000000e+00> : vector<8x64xf32>
    %341 = tpu.matmul %340, %336, %cst_179 {dimension_numbers = #tpu.dot_dimension_numbers<[1], [0], [0], [1], [0, 0, 1, 1], [], []>} : vector<8x4xf32>, vector<4x64xf32>, vector<8x64xf32> -> vector<8x64xf32>
    %342 = arith.addf %339, %341 : vector<8x64xf32>
    %343 = vector.extract_strided_slice %3 {offsets = [44, 0], sizes = [8, 1], strides = [1, 1]} : vector<52x1xf32> to vector<8x1xf32>
    %344 = vector.broadcast %343 : vector<8x1xf32> to vector<8x64xf32>
    %345 = arith.addf %342, %344 : vector<8x64xf32>
    %cst_180 = arith.constant 3.000000e+00 : f32
    %346 = vector.broadcast %cst_180 : f32 to vector<8x64xf32>
    %347 = arith.addf %345, %346 : vector<8x64xf32>
    %cst_181 = arith.constant 0.000000e+00 : f32
    %cst_182 = arith.constant 6.000000e+00 : f32
    %348 = vector.broadcast %cst_181 : f32 to vector<8x64xf32>
    %349 = arith.maximumf %348, %347 : vector<8x64xf32>
    %350 = vector.broadcast %cst_182 : f32 to vector<8x64xf32>
    %351 = arith.minimumf %350, %349 : vector<8x64xf32>
    %cst_183 = arith.constant 0.166666672 : f32
    %352 = vector.broadcast %cst_183 : f32 to vector<8x64xf32>
    %353 = arith.mulf %351, %352 : vector<8x64xf32>
    %354 = arith.mulf %345, %353 : vector<8x64xf32>
    %c0_184 = arith.constant 0 : index
    %c0_185 = arith.constant 0 : index
    %c0_186 = arith.constant 0 : index
    %355 = vector.load %arg13[%c0_184, %c0_185, %c0_186] : memref<1x8x64xf32, #tpu.memory_space<vmem>>, vector<1x8x64xf32>
    %356 = vector.shape_cast %355 : vector<1x8x64xf32> to vector<8x64xf32>
    %357 = vector.shape_cast %354 : vector<8x64xf32> to vector<1x8x64xf32>
    tpu.vector_store %arg13[%c0_184, %c0_185, %c0_186], %357 {strides = array<i32>} : memref<1x8x64xf32, #tpu.memory_space<vmem>>, vector<1x8x64xf32>,
    return
  }
  func.func @transform_0(%arg0: i32) -> (i32, i32, i32) {
    %c0_i32 = arith.constant 0 : i32
    %c0_i32_0 = arith.constant 0 : i32
    %c0_i32_1 = arith.constant 0 : i32
    return %arg0, %c0_i32, %c0_i32_0 : i32, i32, i32
  }
  func.func @transform_1(%arg0: i32) -> (i32, i32, i32) {
    %c0_i32 = arith.constant 0 : i32
    %c0_i32_0 = arith.constant 0 : i32
    %c0_i32_1 = arith.constant 0 : i32
    %c0_i32_2 = arith.constant 0 : i32
    return %c0_i32, %c0_i32_0, %c0_i32_1 : i32, i32, i32
  }
  func.func @transform_2(%arg0: i32) -> (i32, i32, i32) {
    %c0_i32 = arith.constant 0 : i32
    %c0_i32_0 = arith.constant 0 : i32
    %c0_i32_1 = arith.constant 0 : i32
    %c0_i32_2 = arith.constant 0 : i32
    return %c0_i32, %c0_i32_0, %c0_i32_1 : i32, i32, i32
  }
  func.func @transform_3(%arg0: i32) -> (i32, i32) {
    %c0_i32 = arith.constant 0 : i32
    %c0_i32_0 = arith.constant 0 : i32
    %c0_i32_1 = arith.constant 0 : i32
    return %c0_i32, %c0_i32_0 : i32, i32
  }
  func.func @transform_4(%arg0: i32) -> (i32, i32) {
    %c0_i32 = arith.constant 0 : i32
    %c0_i32_0 = arith.constant 0 : i32
    %c0_i32_1 = arith.constant 0 : i32
    return %c0_i32, %c0_i32_0 : i32, i32
  }
  func.func @transform_5(%arg0: i32) -> (i32, i32) {
    %c0_i32 = arith.constant 0 : i32
    %c0_i32_0 = arith.constant 0 : i32
    %c0_i32_1 = arith.constant 0 : i32
    return %c0_i32, %c0_i32_0 : i32, i32
  }
  func.func @transform_6(%arg0: i32) -> (i32, i32) {
    %c0_i32 = arith.constant 0 : i32
    %c0_i32_0 = arith.constant 0 : i32
    %c0_i32_1 = arith.constant 0 : i32
    return %c0_i32, %c0_i32_0 : i32, i32
  }
  func.func @transform_7(%arg0: i32) -> (i32, i32) {
    %c0_i32 = arith.constant 0 : i32
    %c0_i32_0 = arith.constant 0 : i32
    %c0_i32_1 = arith.constant 0 : i32
    return %c0_i32, %c0_i32_0 : i32, i32
  }
  func.func @transform_8(%arg0: i32) -> (i32, i32) {
    %c0_i32 = arith.constant 0 : i32
    %c0_i32_0 = arith.constant 0 : i32
    %c0_i32_1 = arith.constant 0 : i32
    return %c0_i32, %c0_i32_0 : i32, i32
  }
  func.func @transform_9(%arg0: i32) -> (i32, i32) {
    %c0_i32 = arith.constant 0 : i32
    %c0_i32_0 = arith.constant 0 : i32
    %c0_i32_1 = arith.constant 0 : i32
    return %c0_i32, %c0_i32_0 : i32, i32
  }
  func.func @transform_10(%arg0: i32) -> (i32, i32) {
    %c0_i32 = arith.constant 0 : i32
    %c0_i32_0 = arith.constant 0 : i32
    %c0_i32_1 = arith.constant 0 : i32
    return %c0_i32, %c0_i32_0 : i32, i32
  }
  func.func @transform_11(%arg0: i32) -> (i32, i32) {
    %c0_i32 = arith.constant 0 : i32
    %c0_i32_0 = arith.constant 0 : i32
    %c0_i32_1 = arith.constant 0 : i32
    return %c0_i32, %c0_i32_0 : i32, i32
  }
  func.func @transform_12(%arg0: i32) -> (i32, i32, i32) {
    %c0_i32 = arith.constant 0 : i32
    %c0_i32_0 = arith.constant 0 : i32
    %c0_i32_1 = arith.constant 0 : i32
    return %arg0, %c0_i32, %c0_i32_0 : i32, i32, i32
  }
}

</mosaic_0001>

<bundles_post_ra>
// kernel: inverted_residual_ds.1
= control target key start
LH: loop header
LB: loop body
LE: loop exit
PB: predicated region body
PF: predicated region fallthrough
CT: control target
= control target key end

     0   :  { %17 = vsyncpa [#allocation3], 0  ;;  %s3983_s0 = inlined_call_operand.vmem [shape: f32[2,4,256], index: 0, kind: input, shape index: {}]   ;;  %s3984_s1 = inlined_call_operand.hbm [shape: f32[9,256,64], index: 1, kind: input, shape index: {}]   ;;  %s3985_s2 = inlined_call_operand.hbm [shape: f32[9,64,64], index: 2, kind: input, shape index: {}]   ;;  %s3986_s3 = inlined_call_operand.vmem [shape: f32[20,9], index: 3, kind: input, shape index: {}]   ;;  %s3987_s4 = inlined_call_operand.vmem [shape: f32[52,1], index: 4, kind: input, shape index: {}]   ;;  %s3988_s5 = inlined_call_operand.hbm [shape: f32[1,2], index: 5, kind: input, shape index: {}]   ;;  %s3989_s6 = inlined_call_operand.vmem [shape: f32[4,4], index: 6, kind: input, shape index: {}]   ;;  %s3990_s7 = inlined_call_operand.vmem [shape: f32[8,4], index: 7, kind: input, shape index: {}]   ;;  %s3991_s8 = inlined_call_operand.vmem [shape: f32[4,8], index: 8, kind: input, shape index: {}]   ;;  %s3992_s9 = inlined_call_operand.vmem [shape: f32[8,8], index: 9, kind: input, shape index: {}]   ;;  %s3993_s10 = inlined_call_operand.vmem [shape: f32[8,2], index: 10, kind: input, shape index: {}]   ;;  %s3994_s11 = inlined_call_operand.vmem [shape: f32[8,2], index: 11, kind: input, shape index: {}]   ;;  %s3995_s12 = inlined_call_operand.vmem [shape: f32[2,8,64], index: 12, kind: output, shape index: {}]  }
   0x1   :  { %18 = vsyncpa [#allocation5], 0  ;;  %s3058_s21 = smov 0  }
   0x2 LB: > { %s3064_s22 = sadd.s32 4294967295, %s2976_s21   ;;  %p2536_p0 = scmp.ge.s32.totalorder %s2976_s21, 1  ;;  %s2976_s21 = sphi %s3058_s21, %s24_s21  }
   0x3   : > { %p312_p1 = scmp.lt.s32.totalorder %s2976_s21, 3  ;;  %p2602_p2 = scmp.eq.s32.totalorder %s3064_s22, 0 }
   0x4   : > { %s337_s25 = sshll.u32 %s3985_s2, 4  ;;  %s323_s29 = sshll.u32 %s3984_s1, 4  ;;  %s338_s25 = int_to_ptr.hbm [resolvable:$true] %s337_s25  ;;  %s324_s29 = int_to_ptr.hbm [resolvable:$true] %s323_s29 }
   0x5   : > { %p3072_p3 = pnand %p2536_p0, %p312_p1  ;;  %s2978_s30 = smov [#allocation4]  }
   0x6   : > { %s339_s13 = sshll.u32 %s2978_s30, 4  ;;  %s2979_s14 = smov [#allocation2]   ;;  %s340_s13 = int_to_ptr.vmem [resolvable:$true] %s339_s13 }
   0x7   : > { %p2592_p4 = pneg %p3072_p3  ;;  %s325_s15 = sshll.u32 %s2979_s14, 4  ;;  %s326_s15 = int_to_ptr.vmem [resolvable:$true] %s325_s15 }
   0x8   : > { %s358_s18 = sshll.u32 %s3988_s5, 4  ;;  %s2980_s19 = smov 128   ;;  %s359_s18 = int_to_ptr.hbm [resolvable:$true] %s358_s18 }
   0x9   : > { %p2593_p5 = pnand %p2602_p2, %p2592_p4  ;;  %s2981_s20 = smov 8  }
   0xa   : > { %s2982_s23 = smov [#allocation6]   ;;  %399 = sbr.rel (%p3072_p3) target bundleno = 1535 (0x5ff), region = 68 }
   0xb   : > { %2598 = dma.hbm_to_vmem [thread:$0]  (!%p2593_p5), %s338_s25, 9216, %s340_s13, [#allocation5], %s2980_s19, %s2980_s19, %s2981_s20  }
   0xc   : > { %2595 = dma.hbm_to_vmem [thread:$0]  (!%p2593_p5), %s324_s29, 36864, %s326_s15, [#allocation3], %s2980_s19, %s2980_s19, %s2981_s20  }
   0xd   : > { %s360_s24 = sshll.u32 %s2982_s23, 4  ;;  %s361_s24 = int_to_ptr.vmem [resolvable:$true] %s360_s24 }
   0xe   : > { %2601 = dma.hbm_to_vmem [thread:$0]  (!%p2593_p5), %s359_s18, 16, %s361_s24, [#allocation5]  }
   0xf   : > { %2967 = dma.done.wait (%p2602_p2), [#allocation3], 36864  }
  0x10   : > { %2969 = vsyncadd (%p2602_p2), [#allocation3], 4294930432 }
  0x11   : > { %2971 = dma.done.wait (%p2602_p2), [#allocation5], 9232  }
  0x12   : > { %2973 = vsyncadd (%p2602_p2), [#allocation5], 4294958064  ;;  %v486_v0 = vld [vmem:[#allocation2 + $0x78] sm:$0xff]  ;;  %v485_v4 = vld [vmem:[#allocation2 + $0x70] sm:$0xff]  ;;  %p451_p6 = scmp.lt.s32.totalorder %s3064_s22, 1  ;;  %vm1240_vm0 = vcmask 1043456  }
  0x13   : > { %v502_v1 = vld [vmem:[#allocation2 + $0xf8] sm:$0xff]  ;;  %509 = vmatpush.msra.mxu0 %v486_v0  ;;  %v501_v5 = vld [vmem:[#allocation2 + $0xf0] sm:$0xff]  ;;  %v484_v8 = vld [vmem:[#allocation2 + $0x68] sm:$0xff]  ;;  %vm1236_vm1 = vcmask 31744   ;;  %vm1770_vm2 = vcmask 523264   ;;  %vm1777_vm3 = vcmask 15360  }
  0x14   : > { %v571_v2 = vld [vmem:[#allocation2 + $0x178] sm:$0xff]  ;;  %529 = vmatpush.msra.mxu1 %v502_v1  ;;  %v570_v6 = vld [vmem:[#allocation2 + $0x170] sm:$0xff]  ;;  %v500_v9 = vld [vmem:[#allocation2 + $0xe8] sm:$0xff]  ;;  %s4190_s22 = smov (!%p451_p6, %s3064_s22), 1  ;;  %vm1811_vm4 = vcmask 64512   ;;  %s2992_s13 = smov 124  }
  0x15   : > { %v587_v3 = vld [vmem:[#allocation2 + $0x1f8] sm:$0xff]  ;;  %593 = vmatpush.msra.mxu2 %v571_v2  ;;  %v586_v7 = vld [vmem:[#allocation2 + $0x1f0] sm:$0xff]  ;;  %510 = vmatpush.msra.mxu0 %v485_v4  ;;  %v569_v10 = vld [vmem:[#allocation2 + $0x168] sm:$0xff]  ;;  %s2579_s25 = sshll.u32 %s4190_s22, 3 }
  0x16   : > { %613 = vmatpush.msra.mxu3 %v587_v3  ;;  %530 = vmatpush.msra.mxu1 %v501_v5  ;;  %v585_v11 = vld [vmem:[#allocation2 + $0x1e8] sm:$0xff]  ;;  %v483_v12 = vld [vmem:[#allocation2 + $0x60] sm:$0xff]  ;;  %v482_v16 = vld [vmem:[#allocation2 + $0x58] sm:$0xff]  ;;  %s455_s28 = scalar_lea.vmem %s3983_s0, %s2579_s25  ;;  %s459_s16 = scalar_lea.vmem %s3995_s12, %s2579_s25 }
  0x17   : > { %594 = vmatpush.msra.mxu2 %v570_v6  ;;  %v499_v13 = vld [vmem:[#allocation2 + $0xe0] sm:$0xff]  ;;  %511 = vmatpush.msra.mxu0 %v484_v8  ;;  %v498_v17 = vld [vmem:[#allocation2 + $0xd8] sm:$0xff]  ;;  %v481_v20 = vld [vmem:[#allocation2 + $0x50] sm:$0xff] }
  0x18   : > { %614 = vmatpush.msra.mxu3 %v586_v7  ;;  %531 = vmatpush.msra.mxu1 %v500_v9  ;;  %v568_v14 = vld [vmem:[#allocation2 + $0x160] sm:$0xff]  ;;  %v567_v18 = vld [vmem:[#allocation2 + $0x158] sm:$0xff]  ;;  %v497_v21 = vld [vmem:[#allocation2 + $0xd0] sm:$0xff] }
  0x19   : > { %v584_v15 = vld [vmem:[#allocation2 + $0x1e0] sm:$0xff]  ;;  %595 = vmatpush.msra.mxu2 %v569_v10  ;;  %512 = vmatpush.msra.mxu0 %v483_v12  ;;  %v583_v19 = vld [vmem:[#allocation2 + $0x1d8] sm:$0xff]  ;;  %v566_v22 = vld [vmem:[#allocation2 + $0x150] sm:$0xff] }
  0x1a   : > { %615 = vmatpush.msra.mxu3 %v585_v11  ;;  %532 = vmatpush.msra.mxu1 %v499_v13  ;;  %v582_v23 = vld [vmem:[#allocation2 + $0x1d0] sm:$0xff]  ;;  %v480_v24 = vld [vmem:[#allocation2 + $0x48] sm:$0xff]  ;;  %v479_v28 = vld [vmem:[#allocation2 + $0x40] sm:$0xff] }
  0x1b   : > { %596 = vmatpush.msra.mxu2 %v568_v14  ;;  %513 = vmatpush.msra.mxu0 %v482_v16  ;;  %v496_v25 = vld [vmem:[#allocation2 + $0xc8] sm:$0xff]  ;;  %v495_v29 = vld [vmem:[#allocation2 + $0xc0] sm:$0xff]  ;;  %v478_v32 = vld [vmem:[#allocation2 + $0x38] sm:$0xff] }
  0x1c   : > { %616 = vmatpush.msra.mxu3 %v584_v15  ;;  %533 = vmatpush.msra.mxu1 %v498_v17  ;;  %v565_v26 = vld [vmem:[#allocation2 + $0x148] sm:$0xff]  ;;  %v564_v30 = vld [vmem:[#allocation2 + $0x140] sm:$0xff]  ;;  %v494_v33 = vld [vmem:[#allocation2 + $0xb8] sm:$0xff] }
  0x1d   : > { %597 = vmatpush.msra.mxu2 %v567_v18  ;;  %514 = vmatpush.msra.mxu0 %v481_v20  ;;  %v581_v27 = vld [vmem:[#allocation2 + $0x1c8] sm:$0xff]  ;;  %v580_v31 = vld [vmem:[#allocation2 + $0x1c0] sm:$0xff]  ;;  %v563_v34 = vld [vmem:[#allocation2 + $0x138] sm:$0xff] }
  0x1e   : > { %617 = vmatpush.msra.mxu3 %v583_v19  ;;  %534 = vmatpush.msra.mxu1 %v497_v21  ;;  %v579_v35 = vld [vmem:[#allocation2 + $0x1b8] sm:$0xff]  ;;  %v477_v36 = vld [vmem:[#allocation2 + $0x30] sm:$0xff]  ;;  %v476_v40 = vld [vmem:[#allocation2 + $0x28] sm:$0xff] }
  0x1f   : > { %598 = vmatpush.msra.mxu2 %v566_v22  ;;  %515 = vmatpush.msra.mxu0 %v480_v24  ;;  %v493_v37 = vld [vmem:[#allocation2 + $0xb0] sm:$0xff]  ;;  %v492_v41 = vld [vmem:[#allocation2 + $0xa8] sm:$0xff]  ;;  %v475_v44 = vld [vmem:[#allocation2 + $0x20] sm:$0xff] }
  0x20   : > { %618 = vmatpush.msra.mxu3 %v582_v23  ;;  %535 = vmatpush.msra.mxu1 %v496_v25  ;;  %v562_v38 = vld [vmem:[#allocation2 + $0x130] sm:$0xff]  ;;  %v561_v42 = vld [vmem:[#allocation2 + $0x128] sm:$0xff]  ;;  %v491_v45 = vld [vmem:[#allocation2 + $0xa0] sm:$0xff] }
  0x21   : > { %599 = vmatpush.msra.mxu2 %v565_v26  ;;  %516 = vmatpush.msra.mxu0 %v479_v28  ;;  %v578_v39 = vld [vmem:[#allocation2 + $0x1b0] sm:$0xff]  ;;  %v577_v43 = vld [vmem:[#allocation2 + $0x1a8] sm:$0xff]  ;;  %v560_v46 = vld [vmem:[#allocation2 + $0x120] sm:$0xff] }
  0x22   : > { %619 = vmatpush.msra.mxu3 %v581_v27  ;;  %536 = vmatpush.msra.mxu1 %v495_v29  ;;  %v576_v47 = vld [vmem:[#allocation2 + $0x1a0] sm:$0xff]  ;;  %v474_v48 = vld [vmem:[#allocation2 + $0x18] sm:$0xff]  ;;  %v473_v52 = vld [vmem:[#allocation2 + $0x10] sm:$0xff] }
  0x23   : > { %600 = vmatpush.msra.mxu2 %v564_v30  ;;  %517 = vmatpush.msra.mxu0 %v478_v32  ;;  %v490_v49 = vld [vmem:[#allocation2 + $0x98] sm:$0xff]  ;;  %v489_v53 = vld [vmem:[#allocation2 + $0x90] sm:$0xff]  ;;  %v472_v56 = vld [vmem:[#allocation2 + $0x8] sm:$0xff] }
  0x24   : > { %620 = vmatpush.msra.mxu3 %v580_v31  ;;  %537 = vmatpush.msra.mxu1 %v494_v33  ;;  %v559_v50 = vld [vmem:[#allocation2 + $0x118] sm:$0xff]  ;;  %v558_v54 = vld [vmem:[#allocation2 + $0x110] sm:$0xff]  ;;  %v488_v57 = vld [vmem:[#allocation2 + $0x88] sm:$0xff] }
  0x25   : > { %601 = vmatpush.msra.mxu2 %v563_v34  ;;  %518 = vmatpush.msra.mxu0 %v477_v36  ;;  %v575_v51 = vld [vmem:[#allocation2 + $0x198] sm:$0xff]  ;;  %v574_v55 = vld [vmem:[#allocation2 + $0x190] sm:$0xff]  ;;  %v557_v58 = vld [vmem:[#allocation2 + $0x108] sm:$0xff] }
  0x26   : > { %621 = vmatpush.msra.mxu3 %v579_v35  ;;  %538 = vmatpush.msra.mxu1 %v493_v37  ;;  %v573_v59 = vld [vmem:[#allocation2 + $0x188] sm:$0xff]  ;;  %v471_v60 = vld [vmem:[#allocation2] sm:$0xff]  ;;  %v655_v0 = vld [vmem:[#allocation2 + $0x278] sm:$0xff] }
  0x27   : > { %602 = vmatpush.msra.mxu2 %v562_v38  ;;  %519 = vmatpush.msra.mxu0 %v476_v40  ;;  %v487_v61 = vld [vmem:[#allocation2 + $0x80] sm:$0xff]  ;;  %v671_v1 = vld [vmem:[#allocation2 + $0x2f8] sm:$0xff]  ;;  %v654_v4 = vld [vmem:[#allocation2 + $0x270] sm:$0xff] }
  0x28   : > { %622 = vmatpush.msra.mxu3 %v578_v39  ;;  %539 = vmatpush.msra.mxu1 %v492_v41  ;;  %v556_v62 = vld [vmem:[#allocation2 + $0x100] sm:$0xff]  ;;  %v739_v2 = vld [vmem:[#allocation2 + $0x378] sm:$0xff]  ;;  %v670_v5 = vld [vmem:[#allocation2 + $0x2f0] sm:$0xff] }
  0x29   : > { %603 = vmatpush.msra.mxu2 %v561_v42  ;;  %520 = vmatpush.msra.mxu0 %v475_v44  ;;  %v572_v63 = vld [vmem:[#allocation2 + $0x180] sm:$0xff]  ;;  %v755_v3 = vld [vmem:[#allocation2 + $0x3f8] sm:$0xff]  ;;  %v738_v6 = vld [vmem:[#allocation2 + $0x370] sm:$0xff] }
  0x2a   : > { %623 = vmatpush.msra.mxu3 %v577_v43  ;;  %540 = vmatpush.msra.mxu1 %v491_v45  ;;  %v754_v7 = vld [vmem:[#allocation2 + $0x3f0] sm:$0xff]  ;;  %v653_v8 = vld [vmem:[#allocation2 + $0x268] sm:$0xff]  ;;  %v652_v12 = vld [vmem:[#allocation2 + $0x260] sm:$0xff] }
  0x2b   : > { %604 = vmatpush.msra.mxu2 %v560_v46  ;;  %521 = vmatpush.msra.mxu0 %v474_v48  ;;  %v669_v9 = vld [vmem:[#allocation2 + $0x2e8] sm:$0xff]  ;;  %v668_v13 = vld [vmem:[#allocation2 + $0x2e0] sm:$0xff]  ;;  %v3108_v16 = vld [vmem:[%s455_s28] sm:$0xff] }
  0x2c   : > { %624 = vmatpush.msra.mxu3 %v576_v47  ;;  %541 = vmatpush.msra.mxu1 %v490_v49  ;;  %v737_v10 = vld [vmem:[#allocation2 + $0x368] sm:$0xff]  ;;  %v736_v14 = vld [vmem:[#allocation2 + $0x360] sm:$0xff]  ;;  %v651_v17 = vld [vmem:[#allocation2 + $0x258] sm:$0xff]  ;;  %504 = vst [vmem:[#allocation1] ss:$2 sm:$0xff] %v3108_v16 }
  0x2d   : > { %605 = vmatpush.msra.mxu2 %v559_v50  ;;  %522 = vmatpush.msra.mxu0 %v473_v52  ;;  %v753_v11 = vld [vmem:[#allocation2 + $0x3e8] sm:$0xff]  ;;  %v752_v15 = vld [vmem:[#allocation2 + $0x3e0] sm:$0xff]  ;;  %v667_v18 = vld [vmem:[#allocation2 + $0x2d8] sm:$0xff] }
  0x2e   : > { %625 = vmatpush.msra.mxu3 %v575_v51  ;;  %542 = vmatpush.msra.mxu1 %v489_v53  ;;  %v735_v19 = vld [vmem:[#allocation2 + $0x358] sm:$0xff]  ;;  %v650_v21 = vld [vmem:[#allocation2 + $0x250] sm:$0xff]  ;;  %v649_v25 = vld [vmem:[#allocation2 + $0x248] sm:$0xff] }
  0x2f   : > { %606 = vmatpush.msra.mxu2 %v558_v54  ;;  %523 = vmatpush.msra.mxu0 %v472_v56  ;;  %v751_v20 = vld [vmem:[#allocation2 + $0x3d8] sm:$0xff]  ;;  %v666_v22 = vld [vmem:[#allocation2 + $0x2d0] sm:$0xff]  ;;  %v665_v26 = vld [vmem:[#allocation2 + $0x2c8] sm:$0xff] }
  0x30   : > { %626 = vmatpush.msra.mxu3 %v574_v55  ;;  %543 = vmatpush.msra.mxu1 %v488_v57  ;;  %v734_v23 = vld [vmem:[#allocation2 + $0x350] sm:$0xff]  ;;  %v733_v27 = vld [vmem:[#allocation2 + $0x348] sm:$0xff]  ;;  %v648_v29 = vld [vmem:[#allocation2 + $0x240] sm:$0xff] }
  0x31   : > { %607 = vmatpush.msra.mxu2 %v557_v58  ;;  %524 = vmatpush.msra.mxu0 %v471_v60  ;;  %v750_v24 = vld [vmem:[#allocation2 + $0x3d0] sm:$0xff]  ;;  %v749_v28 = vld [vmem:[#allocation2 + $0x3c8] sm:$0xff]  ;;  %v664_v30 = vld [vmem:[#allocation2 + $0x2c0] sm:$0xff] }
  0x32   : > { %627 = vmatpush.msra.mxu3 %v573_v59  ;;  %544 = vmatpush.msra.mxu1 %v487_v61  ;;  %v732_v31 = vld [vmem:[#allocation2 + $0x340] sm:$0xff]  ;;  %v647_v35 = vld [vmem:[#allocation2 + $0x238] sm:$0xff]  ;;  %v646_v39 = vld [vmem:[#allocation2 + $0x230] sm:$0xff] }
  0x33   : > { %608 = vmatpush.msra.mxu2 %v556_v62  ;;  %677 = vmatpush.msrb.mxu0 %v655_v0  ;;  %v748_v32 = vld [vmem:[#allocation2 + $0x3c0] sm:$0xff]  ;;  %v505_v33 = vld.sshfl [vmem:[#allocation1] sm:$0xff pattern:$0x75316420]  ;;  %v662_v40 = vld [vmem:[#allocation2 + $0x2b0] sm:$0xff] }
  0x34   : > { %628 = vmatpush.msra.mxu3 %v572_v63  ;;  %697 = vmatpush.msrb.mxu1 %v671_v1  ;;  %v506_v34 = vld.sshfl [vmem:[#allocation1 + $0x8] sm:$0xff pattern:$0x75316420]  ;;  %v663_v36 = vld [vmem:[#allocation2 + $0x2b8] sm:$0xff]  ;;  %v730_v41 = vld [vmem:[#allocation2 + $0x330] sm:$0xff] }
  0x35   : > { %761 = vmatpush.msrb.mxu2 %v739_v2  ;;  %678 = vmatpush.msrb.mxu0 %v654_v4  ;;  %588 = vst [vmem:[#allocation1] ss:$2 sm:$0xff] %v3108_v16  ;;  %v731_v37 = vld [vmem:[#allocation2 + $0x338] sm:$0xff]  ;;  %v746_v42 = vld [vmem:[#allocation2 + $0x3b0] sm:$0xff]  ;;  %v645_v43 = vld [vmem:[#allocation2 + $0x228] sm:$0xff] }
  0x36   : > { %781 = vmatpush.msrb.mxu3 %v755_v3  ;;  %698 = vmatpush.msrb.mxu1 %v670_v5  ;;  %v747_v38 = vld [vmem:[#allocation2 + $0x3b8] sm:$0xff]  ;;  %v661_v44 = vld [vmem:[#allocation2 + $0x2a8] sm:$0xff]  ;;  %v644_v47 = vld [vmem:[#allocation2 + $0x220] sm:$0xff] }
  0x37   : > { %762 = vmatpush.msrb.mxu2 %v738_v6  ;;  %679 = vmatpush.msrb.mxu0 %v653_v8  ;;  %v729_v45 = vld [vmem:[#allocation2 + $0x328] sm:$0xff]  ;;  %v660_v48 = vld [vmem:[#allocation2 + $0x2a0] sm:$0xff]  ;;  %v643_v53 = vld [vmem:[#allocation2 + $0x218] sm:$0xff] }
  0x38   : > { %782 = vmatpush.msrb.mxu3 %v754_v7  ;;  %699 = vmatpush.msrb.mxu1 %v669_v9  ;;  %v745_v46 = vld [vmem:[#allocation2 + $0x3a8] sm:$0xff]  ;;  %v728_v49 = vld [vmem:[#allocation2 + $0x320] sm:$0xff]  ;;  %v659_v54 = vld [vmem:[#allocation2 + $0x298] sm:$0xff] }
  0x39   : > { %763 = vmatpush.msrb.mxu2 %v737_v10  ;;  %680 = vmatpush.msrb.mxu0 %v652_v12  ;;  %v744_v50 = vld [vmem:[#allocation2 + $0x3a0] sm:$0xff]  ;;  %v727_v55 = vld [vmem:[#allocation2 + $0x318] sm:$0xff]  ;;  %v642_v57 = vld [vmem:[#allocation2 + $0x210] sm:$0xff] }
  0x3a   : > { %783 = vmatpush.msrb.mxu3 %v753_v11  ;;  %700 = vmatpush.msrb.mxu1 %v668_v13  ;;  %v743_v56 = vld [vmem:[#allocation2 + $0x398] sm:$0xff]  ;;  %v658_v58 = vld [vmem:[#allocation2 + $0x290] sm:$0xff]  ;;  %v641_v61 = vld [vmem:[#allocation2 + $0x208] sm:$0xff] }
  0x3b   : > { %764 = vmatpush.msrb.mxu2 %v736_v14  ;;  %681 = vmatpush.msrb.mxu0 %v651_v17  ;;  %v726_v59 = vld [vmem:[#allocation2 + $0x310] sm:$0xff]  ;;  %v657_v62 = vld [vmem:[#allocation2 + $0x288] sm:$0xff]  ;;  %v3114_v3 = vld [vmem:[#allocation2 + $0x200] sm:$0xff] }
  0x3c   : > { %784 = vmatpush.msrb.mxu3 %v752_v15  ;;  %701 = vmatpush.msrb.mxu1 %v667_v18  ;;  %v589_v51 = vld.sshfl [vmem:[#allocation1] sm:$0xff pattern:$0x75316420]  ;;  %v590_v52 = vld.sshfl [vmem:[#allocation1 + $0x8] sm:$0xff pattern:$0x75316420] }
  0x3d   : > { %765 = vmatpush.msrb.mxu2 %v735_v19  ;;  %682 = vmatpush.msrb.mxu0 %v650_v21  ;;  %672 = vst [vmem:[#allocation1] ss:$2 sm:$0xff] %v3108_v16  ;;  %v742_v60 = vld [vmem:[#allocation2 + $0x390] sm:$0xff]  ;;  %v725_v63 = vld [vmem:[#allocation2 + $0x308] sm:$0xff]  ;;  %v656_v4 = vld [vmem:[#allocation2 + $0x280] sm:$0xff] }
  0x3e   : > { %785 = vmatpush.msrb.mxu3 %v751_v20  ;;  %702 = vmatpush.msrb.mxu1 %v666_v22  ;;  %v741_v0 = vld [vmem:[#allocation2 + $0x388] sm:$0xff]  ;;  %v724_v5 = vld [vmem:[#allocation2 + $0x300] sm:$0xff]  ;;  %v823_v7 = vld [vmem:[#allocation2 + $0x478] sm:$0xff] }
  0x3f   : > { %766 = vmatpush.msrb.mxu2 %v734_v23  ;;  %683 = vmatpush.msrb.mxu0 %v649_v25  ;;  %v740_v6 = vld [vmem:[#allocation2 + $0x380] sm:$0xff]  ;;  %v839_v8 = vld [vmem:[#allocation2 + $0x4f8] sm:$0xff]  ;;  %v822_v11 = vld [vmem:[#allocation2 + $0x470] sm:$0xff]  ;;  %v4006_v23 = vmov 0  }
  0x40   : > { %786 = vmatpush.msrb.mxu3 %v750_v24  ;;  %703 = vmatpush.msrb.mxu1 %v665_v26  ;;  %v907_v9 = vld [vmem:[#allocation2 + $0x578] sm:$0xff]  ;;  %v838_v12 = vld [vmem:[#allocation2 + $0x4f0] sm:$0xff]  ;;  %v821_v18 = vld [vmem:[#allocation2 + $0x468] sm:$0xff] }
  0x41   : > { %767 = vmatpush.msrb.mxu2 %v733_v27  ;;  %684 = vmatpush.msrb.mxu0 %v648_v29  ;;  %v923_v10 = vld [vmem:[#allocation2 + $0x5f8] sm:$0xff]  ;;  %v906_v13 = vld [vmem:[#allocation2 + $0x570] sm:$0xff]  ;;  %v837_v20 = vld [vmem:[#allocation2 + $0x4e8] sm:$0xff] }
  0x42   : > { %787 = vmatpush.msrb.mxu3 %v749_v28  ;;  %704 = vmatpush.msrb.mxu1 %v664_v30  ;;  %v922_v14 = vld [vmem:[#allocation2 + $0x5f0] sm:$0xff]  ;;  %v3121_v19 = vld [vmem:[%s3986_s3] sm:$0xff]  ;;  %v905_v21 = vld [vmem:[#allocation2 + $0x568] sm:$0xff] }
  0x43   : > { %768 = vmatpush.msrb.mxu2 %v732_v31  ;;  %685 = vmatpush.msrb.mxu0 %v647_v35  ;;  %v921_v22 = vld [vmem:[#allocation2 + $0x5e8] sm:$0xff]  ;;  %v820_v24 = vld [vmem:[#allocation2 + $0x460] sm:$0xff]  ;;  %v819_v28 = vld [vmem:[#allocation2 + $0x458] sm:$0xff] }
  0x44   : > { %788 = vmatpush.msrb.mxu3 %v748_v32  ;;  %705 = vmatpush.msrb.mxu1 %v663_v36  ;;  %v673_v1 = vld.sshfl [vmem:[#allocation1] sm:$0xff pattern:$0x75316420]  ;;  %v674_v2 = vld.sshfl [vmem:[#allocation1 + $0x8] sm:$0xff pattern:$0x75316420] }
  0x45   : > { %769 = vmatpush.msrb.mxu2 %v731_v37  ;;  %686 = vmatpush.msrb.mxu0 %v646_v39  ;;  %756 = vst [vmem:[#allocation1] ss:$2 sm:$0xff] %v3108_v16  ;;  %v836_v25 = vld [vmem:[#allocation2 + $0x4e0] sm:$0xff]  ;;  %v835_v29 = vld [vmem:[#allocation2 + $0x4d8] sm:$0xff]  ;;  %v818_v32 = vld [vmem:[#allocation2 + $0x450] sm:$0xff] }
  0x46   : > { %789 = vmatpush.msrb.mxu3 %v747_v38  ;;  %706 = vmatpush.msrb.mxu1 %v662_v40  ;;  %v904_v26 = vld [vmem:[#allocation2 + $0x560] sm:$0xff]  ;;  %v903_v30 = vld [vmem:[#allocation2 + $0x558] sm:$0xff]  ;;  %v834_v35 = vld [vmem:[#allocation2 + $0x4d0] sm:$0xff]  ;;  %v4008_v38 = vmov 2  }
  0x47   : > { %770 = vmatpush.msrb.mxu2 %v730_v41  ;;  %687 = vmatpush.msrb.mxu0 %v645_v43  ;;  %v920_v27 = vld [vmem:[#allocation2 + $0x5e0] sm:$0xff]  ;;  %v919_v31 = vld [vmem:[#allocation2 + $0x5d8] sm:$0xff]  ;;  %v902_v36 = vld [vmem:[#allocation2 + $0x550] sm:$0xff]  ;;  %v3998_v43 = vmov 1  }
  0x48   : > { %790 = vmatpush.msrb.mxu3 %v746_v42  ;;  %707 = vmatpush.msrb.mxu1 %v661_v44  ;;  %v918_v37 = vld [vmem:[#allocation2 + $0x5d0] sm:$0xff]  ;;  %v817_v39 = vld [vmem:[#allocation2 + $0x448] sm:$0xff]  ;;  %v816_v44 = vld [vmem:[#allocation2 + $0x440] sm:$0xff] }
  0x49   : > { %771 = vmatpush.msrb.mxu2 %v729_v45  ;;  %688 = vmatpush.msrb.mxu0 %v644_v47  ;;  %v833_v40 = vld [vmem:[#allocation2 + $0x4c8] sm:$0xff]  ;;  %v832_v45 = vld [vmem:[#allocation2 + $0x4c0] sm:$0xff] }
  0x4a   : > { %791 = vmatpush.msrb.mxu3 %v745_v46  ;;  %708 = vmatpush.msrb.mxu1 %v660_v48  ;;  %v901_v41 = vld [vmem:[#allocation2 + $0x548] sm:$0xff]  ;;  %v900_v46 = vld [vmem:[#allocation2 + $0x540] sm:$0xff]  ;;  %v815_v48 = vld [vmem:[#allocation2 + $0x438] sm:$0xff] }
  0x4b   : > { %772 = vmatpush.msrb.mxu2 %v728_v49  ;;  %629 = vmatmul.f32.vlgmr.msra.gmra.mxu3 %v590_v52  ;;  %v917_v42 = vld [vmem:[#allocation2 + $0x5c8] sm:$0xff]  ;;  %v916_v47 = vld [vmem:[#allocation2 + $0x5c0] sm:$0xff]  ;;  %v831_v49 = vld [vmem:[#allocation2 + $0x4b8] sm:$0xff] }
  0x4c   : > { %792 = vmatpush.msrb.mxu3 %v744_v50  ;;  %609 = vmatmul.f32.vlgmr.msra.gmra.mxu2 %v589_v51  ;;  %v757_v15 = vld.sshfl [vmem:[#allocation1] sm:$0xff pattern:$0x75316420]  ;;  %v758_v17 = vld.sshfl [vmem:[#allocation1 + $0x8] sm:$0xff pattern:$0x75316420] }
  0x4d   : > { %689 = vmatpush.msrb.mxu0 %v643_v53  ;;  %709 = vmatpush.msrb.mxu1 %v659_v54  ;;  %840 = vst [vmem:[#allocation1] ss:$2 sm:$0xff] %v3108_v16  ;;  %v3138_v52 = vld [vmem:[#allocation2 + $0x538] sm:$0xff]  ;;  %v3141_v54 = vld [vmem:[#allocation2 + $0x430] sm:$0xff] }
  0x4e   : > { %773 = vmatpush.msrb.mxu2 %v727_v55  ;;  %793 = vmatpush.msrb.mxu3 %v743_v56  ;;  %v915_v53 = vld [vmem:[#allocation2 + $0x5b8] sm:$0xff]  ;;  %v830_v55 = vld [vmem:[#allocation2 + $0x4b0] sm:$0xff] }
  0x4f   : > { %525 = vmatmul.f32.vlgmr.msra.gmra.mxu0 %v505_v33  ;;  %545 = vmatmul.f32.vlgmr.msra.gmra.mxu1 %v506_v34  ;;  %v3143_v56 = vld [vmem:[#allocation2 + $0x530] sm:$0xff] }
  0x50   : > { %690 = vmatpush.msrb.mxu0 %v642_v57  ;;  %710 = vmatpush.msrb.mxu1 %v658_v58  ;;  %v914_v57 = vld [vmem:[#allocation2 + $0x5b0] sm:$0xff]  ;;  %v4000_v58 = vmov 3  }
  0x51   : > { %774 = vmatpush.msrb.mxu2 %v726_v59  ;;  %794 = vmatpush.msrb.mxu3 %v742_v60  ;;  %v3148_v59 = vld [vmem:[#allocation2 + $0x428] sm:$0xff] }
  0x52   : > { %691 = vmatpush.msrb.mxu0 %v641_v61  ;;  %711 = vmatpush.msrb.mxu1 %v657_v62  ;;  %v829_v60 = vld [vmem:[#allocation2 + $0x4a8] sm:$0xff] }
  0x53   : > { %775 = vmatpush.msrb.mxu2 %v725_v63  ;;  %795 = vmatpush.msrb.mxu3 %v741_v0  ;;  %v3151_v61 = vld [vmem:[#allocation2 + $0x528] sm:$0xff]  ;;  %v3154_v63 = vld [vmem:[#allocation2 + $0x420] sm:$0xff] }
  0x54   : > { %692 = vmatpush.msrb.mxu0 %v3114_v3  ;;  %712 = vmatpush.msrb.mxu1 %v656_v4  ;;  %v3125_v33 = vld.sshfl [vmem:[#allocation1] sm:$0xff pattern:$0x75316420]  ;;  %v3127_v34 = vld.sshfl [vmem:[#allocation1 + $0x8] sm:$0xff pattern:$0x75316420] }
  0x55   : > { %776 = vmatpush.msrb.mxu2 %v724_v5  ;;  %796 = vmatpush.msrb.mxu3 %v740_v6  ;;  %924 = vst [vmem:[#allocation1] ss:$2 sm:$0xff] %v3108_v16  ;;  %v913_v62 = vld [vmem:[#allocation2 + $0x5a8] sm:$0xff]  ;;  %v828_v0 = vld [vmem:[#allocation2 + $0x4a0] sm:$0xff]  ;;  %v3160_v4 = vld [vmem:[#allocation2 + $0x418] sm:$0xff] }
  0x56   : > { %845 = vmatpush.msra.mxu0 %v823_v7  ;;  %865 = vmatpush.msra.mxu1 %v839_v8  ;;  %v827_v5 = vld [vmem:[#allocation2 + $0x498] sm:$0xff]  ;;  %v3166_v8 = vld [vmem:[#allocation2 + $0x410] sm:$0xff] }
  0x57   : > { %929 = vmatpush.msra.mxu2 %v907_v9  ;;  %949 = vmatpush.msra.mxu3 %v923_v10  ;;  %v3163_v6 = vld [vmem:[#allocation2 + $0x518] sm:$0xff]  ;;  %v826_v9 = vld [vmem:[#allocation2 + $0x490] sm:$0xff] }
  0x58   : > { %693 = vmatmul.f32.vlgmr.msrb.gmra.mxu0 %v673_v1  ;;  %713 = vmatmul.f32.vlgmr.msrb.gmra.mxu1 %v674_v2  ;;  %v3157_v1 = vld [vmem:[#allocation2 + $0x520] sm:$0xff]  ;;  %v911_v7 = vld [vmem:[#allocation2 + $0x598] sm:$0xff]  ;;  %v3169_v10 = vld [vmem:[#allocation2 + $0x510] sm:$0xff] }
  0x59   : > { %777 = vmatmul.f32.vlgmr.msrb.gmra.mxu2 %v757_v15  ;;  %797 = vmatmul.f32.vlgmr.msrb.gmra.mxu3 %v758_v17  ;;  %v912_v2 = vld [vmem:[#allocation2 + $0x5a0] sm:$0xff]  ;;  %v909_v15 = vld [vmem:[#allocation2 + $0x588] sm:$0xff] }
  0x5a   : > { %846 = vmatpush.msra.mxu0 %v822_v11  ;;  %866 = vmatpush.msra.mxu1 %v838_v12  ;;  %v910_v11 = vld [vmem:[#allocation2 + $0x590] sm:$0xff]  ;;  %v3172_v12 = vld [vmem:[#allocation2 + $0x408] sm:$0xff]  ;;  %v3178_v17 = vld [vmem:[#allocation2 + $0x400] sm:$0xff] }
  0x5b   : > { %930 = vmatpush.msra.mxu2 %v906_v13  ;;  %950 = vmatpush.msra.mxu3 %v922_v14  ;;  %v825_v13 = vld [vmem:[#allocation2 + $0x488] sm:$0xff] }
  0x5c   : > { %2631 = vset.pattern.permute.xlu0 %v4006_v23  ;;  %847 = vmatpush.msra.mxu0 %v821_v18  ;;  %v3134_v50 = vld.sshfl [vmem:[#allocation1] sm:$0xff pattern:$0x75316420]  ;;  %v3136_v51 = vld.sshfl [vmem:[#allocation1 + $0x8] sm:$0xff pattern:$0x75316420] }
  0x5d   : > { %551 = vperm.xlu0 %2631, %v3121_v19   ;;  %867 = vmatpush.msra.mxu1 %v837_v20  ;;  %1008 = vst [vmem:[#allocation1] ss:$2 sm:$0xff] %v3108_v16  ;;  %v3175_v14 = vld [vmem:[#allocation2 + $0x508] sm:$0xff]  ;;  %v824_v18 = vld [vmem:[#allocation2 + $0x480] sm:$0xff] }
  0x5e   : > { %931 = vmatpush.msra.mxu2 %v905_v21  ;;  %951 = vmatpush.msra.mxu3 %v921_v22  ;;  %v3183_v21 = vld [vmem:[#allocation2 + $0x500] sm:$0xff] }
  0x5f   : > { %848 = vmatpush.msra.mxu0 %v820_v24  ;;  %868 = vmatpush.msra.mxu1 %v836_v25  ;;  %v908_v22 = vld [vmem:[#allocation2 + $0x580] sm:$0xff]  ;;  %v3191_v25 = vld [vmem:[#allocation2 + $0x678] sm:$0xff] }
  0x60   : > { %932 = vmatpush.msra.mxu2 %v904_v26  ;;  %952 = vmatpush.msra.mxu3 %v920_v27  ;;  %v1007_v26 = vld [vmem:[#allocation2 + $0x6f8] sm:$0xff] }
  0x61   : > { %849 = vmatpush.msra.mxu0 %v819_v28  ;;  %869 = vmatpush.msra.mxu1 %v835_v29  ;;  %v3195_v27 = vld [vmem:[#allocation2 + $0x778] sm:$0xff]  ;;  %v3199_v29 = vld [vmem:[#allocation2 + $0x670] sm:$0xff] }
  0x62   : > { %933 = vmatpush.msra.mxu2 %v903_v30  ;;  %953 = vmatpush.msra.mxu3 %v919_v31  ;;  %v1091_v28 = vld [vmem:[#allocation2 + $0x7f8] sm:$0xff]  ;;  %v1006_v30 = vld [vmem:[#allocation2 + $0x6f0] sm:$0xff] }
  0x63   : > { %2633 = vset.pattern.permute.xlu1 %v4008_v38  ;;  %850 = vmatpush.msra.mxu0 %v818_v32  ;;  %v3202_v31 = vld [vmem:[#allocation2 + $0x770] sm:$0xff]  ;;  %v3352_v38 = vld [vmem:[%s3986_s3 + $0x8] sm:$0xff] }
  0x64   : > { %718 = vperm.xlu1 %2633, %v3121_v19   ;;  %870 = vmatpush.msra.mxu1 %v834_v35  ;;  %v3180_v20 = vld.sshfl [vmem:[#allocation1] sm:$0xff pattern:$0x75316420]  ;;  %v3186_v24 = vld.sshfl [vmem:[#allocation1 + $0x8] sm:$0xff pattern:$0x75316420] }
  0x65   : > { %934 = vmatpush.msra.mxu2 %v902_v36  ;;  %954 = vmatpush.msra.mxu3 %v918_v37  ;;  %1092 = vst [vmem:[#allocation1] ss:$2 sm:$0xff] %v3108_v16  ;;  %v1090_v32 = vld [vmem:[#allocation2 + $0x7f0] sm:$0xff]  ;;  %v3207_v35 = vld [vmem:[#allocation2 + $0x768] sm:$0xff]  ;;  %v3210_v37 = vld [vmem:[#allocation2 + $0x660] sm:$0xff] }
  0x66   : > { %2632 = vset.pattern.permute.xlu0 %v3998_v43  ;;  %851 = vmatpush.msra.mxu0 %v817_v39  ;;  %v1089_v36 = vld [vmem:[#allocation2 + $0x7e8] sm:$0xff]  ;;  %v1004_v39 = vld [vmem:[#allocation2 + $0x6e0] sm:$0xff]  ;;  %v1174_v43 = vld [vmem:[#allocation2 + $0x8f0] sm:$0xff] }
  0x67   : > { %871 = vmatpush.msra.mxu1 %v833_v40  ;;  %935 = vmatpush.msra.mxu2 %v901_v41 }
  0x68   : > { %955 = vmatpush.msra.mxu3 %v917_v42  ;;  %634 = vperm.xlu0 %2632, %v3121_v19   ;;  %v3218_v42 = vld [vmem:[#allocation2 + $0x760] sm:$0xff] }
  0x69   : > { %852 = vmatpush.msra.mxu0 %v816_v44  ;;  %872 = vmatpush.msra.mxu1 %v832_v45  ;;  %v1088_v44 = vld [vmem:[#allocation2 + $0x7e0] sm:$0xff]  ;;  %v3222_v45 = vld [vmem:[#allocation2 + $0x658] sm:$0xff] }
  0x6a   : > { %936 = vmatpush.msra.mxu2 %v900_v46  ;;  %956 = vmatpush.msra.mxu3 %v916_v47  ;;  %v1003_v46 = vld [vmem:[#allocation2 + $0x6d8] sm:$0xff] }
  0x6b   : > { %853 = vmatpush.msra.mxu0 %v815_v48  ;;  %873 = vmatpush.msra.mxu1 %v831_v49  ;;  %v3225_v47 = vld [vmem:[#allocation2 + $0x758] sm:$0xff]  ;;  %v3228_v49 = vld [vmem:[#allocation2 + $0x650] sm:$0xff] }
  0x6c   : > { %937 = vmatpush.msra.mxu2 %v3138_v52  ;;  %957 = vmatpush.msra.mxu3 %v915_v53  ;;  %v3213_v40 = vld.sshfl [vmem:[#allocation1] sm:$0xff pattern:$0x75316420]  ;;  %v3215_v41 = vld.sshfl [vmem:[#allocation1 + $0x8] sm:$0xff pattern:$0x75316420] }
  0x6d   : > { %2634 = vset.pattern.permute.xlu1 %v4000_v58  ;;  %854 = vmatpush.msra.mxu0 %v3141_v54  ;;  %1176 = vst [vmem:[#allocation1] ss:$2 sm:$0xff] %v3108_v16  ;;  %v1087_v48 = vld [vmem:[#allocation2 + $0x7d8] sm:$0xff]  ;;  %v1086_v53 = vld [vmem:[#allocation2 + $0x7d0] sm:$0xff]  ;;  %v4004_v58 = vmov 8  }
  0x6e   : > { %874 = vmatpush.msra.mxu1 %v830_v55  ;;  %938 = vmatpush.msra.mxu2 %v3143_v56  ;;  %v3234_v55 = vld [vmem:[#allocation2 + $0x648] sm:$0xff] }
  0x6f   : > { %958 = vmatpush.msra.mxu3 %v914_v57  ;;  %802 = vperm.xlu1 %2634, %v3121_v19   ;;  %v1001_v57 = vld [vmem:[#allocation2 + $0x6c8] sm:$0xff] }
  0x70   : > { %855 = vmatpush.msra.mxu0 %v3148_v59  ;;  %875 = vmatpush.msra.mxu1 %v829_v60  ;;  %v3237_v60 = vld [vmem:[#allocation2 + $0x748] sm:$0xff] }
  0x71   : > { %939 = vmatpush.msra.mxu2 %v3151_v61  ;;  %959 = vmatpush.msra.mxu3 %v913_v62  ;;  %v1085_v62 = vld [vmem:[#allocation2 + $0x7c8] sm:$0xff] }
  0x72   : > { %856 = vmatpush.msra.mxu0 %v3154_v63  ;;  %876 = vmatpush.msra.mxu1 %v828_v0  ;;  %v3240_v0 = vld [vmem:[#allocation2 + $0x640] sm:$0xff] }
  0x73   : > { %940 = vmatpush.msra.mxu2 %v3157_v1  ;;  %960 = vmatpush.msra.mxu3 %v912_v2  ;;  %v1000_v2 = vld [vmem:[#allocation2 + $0x6c0] sm:$0xff] }
  0x74   : > { %857 = vmatpush.msra.mxu0 %v3160_v4  ;;  %877 = vmatpush.msra.mxu1 %v827_v5  ;;  %v3243_v5 = vld [vmem:[#allocation2 + $0x740] sm:$0xff] }
  0x75   : > { %941 = vmatpush.msra.mxu2 %v3163_v6  ;;  %961 = vmatpush.msra.mxu3 %v911_v7  ;;  %4068 = vst [vmem:[#allocation9_spill] sm:$0xff] %v3243_v5  ;;  %v1084_v7 = vld [vmem:[#allocation2 + $0x7c0] sm:$0xff] }
  0x76   : > { %858 = vmatpush.msra.mxu0 %v3166_v8  ;;  %878 = vmatpush.msra.mxu1 %v826_v9  ;;  %v3246_v9 = vld [vmem:[#allocation2 + $0x638] sm:$0xff] }
  0x77   : > { %942 = vmatpush.msra.mxu2 %v3169_v10  ;;  %962 = vmatpush.msra.mxu3 %v910_v11  ;;  %v999_v11 = vld [vmem:[#allocation2 + $0x6b8] sm:$0xff] }
  0x78   : > { %859 = vmatpush.msra.mxu0 %v3172_v12  ;;  %879 = vmatpush.msra.mxu1 %v825_v13  ;;  %v3249_v13 = vld [vmem:[#allocation2 + $0x738] sm:$0xff] }
  0x79   : > { %943 = vmatpush.msra.mxu2 %v3175_v14  ;;  %963 = vmatpush.msra.mxu3 %v909_v15  ;;  %4069 = vst [vmem:[#allocation10_spill] sm:$0xff] %v3249_v13  ;;  %v1083_v15 = vld [vmem:[#allocation2 + $0x7b8] sm:$0xff] }
  0x7a   : > { %860 = vmatpush.msra.mxu0 %v3178_v17  ;;  %880 = vmatpush.msra.mxu1 %v824_v18  ;;  %v3252_v18 = vld [vmem:[#allocation2 + $0x630] sm:$0xff] }
  0x7b   : > { %944 = vmatpush.msra.mxu2 %v3183_v21  ;;  %964 = vmatpush.msra.mxu3 %v908_v22  ;;  %4070 = vst [vmem:[#allocation11_spill] sm:$0xff] %v3252_v18  ;;  %v998_v22 = vld [vmem:[#allocation2 + $0x6b0] sm:$0xff] }
  0x7c   : > { %861 = vmatmul.f32.vlgmr.msra.gmra.mxu0 %v3125_v33  ;;  %881 = vmatmul.f32.vlgmr.msra.gmra.mxu1 %v3127_v34  ;;  %v3205_v33 = vld [vmem:[#allocation2 + $0x668] sm:$0xff] }
  0x7d   : > { %945 = vmatmul.f32.vlgmr.msra.gmra.mxu2 %v3134_v50  ;;  %965 = vmatmul.f32.vlgmr.msra.gmra.mxu3 %v3136_v51  ;;  %v1005_v34 = vld [vmem:[#allocation2 + $0x6e8] sm:$0xff]  ;;  %v1002_v50 = vld [vmem:[#allocation2 + $0x6d0] sm:$0xff] }
  0x7e   : > { %1013 = vmatpush.msrb.mxu0 %v3191_v25  ;;  %1033 = vmatpush.msrb.mxu1 %v1007_v26  ;;  %v3231_v51 = vld [vmem:[#allocation2 + $0x750] sm:$0xff] }
  0x7f   : > { %1097 = vmatpush.msrb.mxu2 %v3195_v27  ;;  %1117 = vmatpush.msrb.mxu3 %v1091_v28  ;;  %v3255_v26 = vld [vmem:[#allocation2 + $0x730] sm:$0xff] }
  0x80   : > { %1014 = vmatpush.msrb.mxu0 %v3199_v29  ;;  %1034 = vmatpush.msrb.mxu1 %v1006_v30  ;;  %4071 = vst [vmem:[#allocation12_spill] sm:$0xff] %v3255_v26  ;;  %v1082_v28 = vld [vmem:[#allocation2 + $0x7b0] sm:$0xff]  ;;  %v3258_v30 = vld [vmem:[#allocation2 + $0x628] sm:$0xff] }
  0x81   : > { %1098 = vmatpush.msrb.mxu2 %v3202_v31  ;;  %1118 = vmatpush.msrb.mxu3 %v1090_v32  ;;  %4072 = vst [vmem:[#allocation13_spill] sm:$0xff] %v3258_v30  ;;  %v997_v32 = vld [vmem:[#allocation2 + $0x6a8] sm:$0xff] }
  0x82   : > { %1015 = vmatpush.msrb.mxu0 %v3205_v33  ;;  %1035 = vmatpush.msrb.mxu1 %v1005_v34  ;;  %v3261_v34 = vld [vmem:[#allocation2 + $0x728] sm:$0xff] }
  0x83   : > { %1099 = vmatpush.msrb.mxu2 %v3207_v35  ;;  %1119 = vmatpush.msrb.mxu3 %v1089_v36  ;;  %4073 = vst [vmem:[#allocation14_spill] sm:$0xff] %v3261_v34  ;;  %v1081_v36 = vld [vmem:[#allocation2 + $0x7a8] sm:$0xff] }
  0x84   : > { %1016 = vmatpush.msrb.mxu0 %v3210_v37  ;;  %1036 = vmatpush.msrb.mxu1 %v1004_v39  ;;  %v3264_v39 = vld [vmem:[#allocation2 + $0x620] sm:$0xff] }
  0x85   : > { %1100 = vmatpush.msrb.mxu2 %v3218_v42  ;;  %1120 = vmatpush.msrb.mxu3 %v1088_v44  ;;  %4074 = vst [vmem:[#allocation15_spill] sm:$0xff] %v3264_v39  ;;  %v996_v44 = vld [vmem:[#allocation2 + $0x6a0] sm:$0xff] }
  0x86   : > { %1017 = vmatpush.msrb.mxu0 %v3222_v45  ;;  %1037 = vmatpush.msrb.mxu1 %v1003_v46  ;;  %v3267_v46 = vld [vmem:[#allocation2 + $0x720] sm:$0xff] }
  0x87   : > { %1101 = vmatpush.msrb.mxu2 %v3225_v47  ;;  %1121 = vmatpush.msrb.mxu3 %v1087_v48  ;;  %4075 = vst [vmem:[#allocation16_spill] sm:$0xff] %v3267_v46  ;;  %v1080_v48 = vld [vmem:[#allocation2 + $0x7a0] sm:$0xff] }
  0x88   : > { %1018 = vmatpush.msrb.mxu0 %v3228_v49  ;;  %1038 = vmatpush.msrb.mxu1 %v1002_v50  ;;  %v3270_v50 = vld [vmem:[#allocation2 + $0x618] sm:$0xff] }
  0x89   : > { %1102 = vmatpush.msrb.mxu2 %v3231_v51  ;;  %1122 = vmatpush.msrb.mxu3 %v1086_v53  ;;  %4076 = vst [vmem:[#allocation17_spill] sm:$0xff] %v3270_v50  ;;  %v995_v53 = vld [vmem:[#allocation2 + $0x698] sm:$0xff] }
  0x8a   : > { %1019 = vmatpush.msrb.mxu0 %v3234_v55  ;;  %1039 = vmatpush.msrb.mxu1 %v1001_v57  ;;  %v3273_v57 = vld [vmem:[#allocation2 + $0x718] sm:$0xff] }
  0x8b   : > { %1103 = vmatpush.msrb.mxu2 %v3237_v60  ;;  %1123 = vmatpush.msrb.mxu3 %v1085_v62  ;;  %4077 = vst [vmem:[#allocation18_spill] sm:$0xff] %v3273_v57  ;;  %v1079_v62 = vld [vmem:[#allocation2 + $0x798] sm:$0xff] }
  0x8c   : > { %1020 = vmatpush.msrb.mxu0 %v3240_v0  ;;  %1040 = vmatpush.msrb.mxu1 %v1000_v2  ;;  %v3276_v2 = vld [vmem:[#allocation2 + $0x610] sm:$0xff] }
  0x8d   : > { %1104 = vmatpush.msrb.mxu2 %v3243_v5  ;;  %1124 = vmatpush.msrb.mxu3 %v1084_v7  ;;  %4078 = vst [vmem:[#allocation19_spill] sm:$0xff] %v3276_v2  ;;  %v994_v7 = vld [vmem:[#allocation2 + $0x690] sm:$0xff] }
  0x8e   : > { %1021 = vmatpush.msrb.mxu0 %v3246_v9  ;;  %1041 = vmatpush.msrb.mxu1 %v999_v11  ;;  %v3279_v11 = vld [vmem:[#allocation2 + $0x710] sm:$0xff] }
  0x8f   : > { %1105 = vmatpush.msrb.mxu2 %v3249_v13  ;;  %1125 = vmatpush.msrb.mxu3 %v1083_v15  ;;  %4079 = vst [vmem:[#allocation20_spill] sm:$0xff] %v3279_v11  ;;  %v1078_v15 = vld [vmem:[#allocation2 + $0x790] sm:$0xff] }
  0x90   : > { %1022 = vmatpush.msrb.mxu0 %v3252_v18  ;;  %1042 = vmatpush.msrb.mxu1 %v998_v22  ;;  %v3282_v22 = vld [vmem:[#allocation2 + $0x608] sm:$0xff] }
  0x91   : > { %1106 = vmatpush.msrb.mxu2 %v3255_v26  ;;  %1126 = vmatpush.msrb.mxu3 %v1082_v28  ;;  %4080 = vst [vmem:[#allocation21_spill] sm:$0xff] %v3282_v22  ;;  %v993_v28 = vld [vmem:[#allocation2 + $0x688] sm:$0xff] }
  0x92   : > { %1023 = vmatpush.msrb.mxu0 %v3258_v30  ;;  %1043 = vmatpush.msrb.mxu1 %v997_v32  ;;  %v3285_v32 = vld [vmem:[#allocation2 + $0x708] sm:$0xff] }
  0x93   : > { %1107 = vmatpush.msrb.mxu2 %v3261_v34  ;;  %1127 = vmatpush.msrb.mxu3 %v1081_v36  ;;  %4081 = vst [vmem:[#allocation22_spill] sm:$0xff] %v3285_v32  ;;  %v1077_v36 = vld [vmem:[#allocation2 + $0x788] sm:$0xff] }
  0x94   : > { %1024 = vmatpush.msrb.mxu0 %v3264_v39  ;;  %1044 = vmatpush.msrb.mxu1 %v996_v44  ;;  %v3996_v44 = vmov 6  }
  0x95   : > { %1108 = vmatpush.msrb.mxu2 %v3267_v46  ;;  %1128 = vmatpush.msrb.mxu3 %v1080_v48  ;;  %v3290_v48 = vld [vmem:[#allocation2 + $0x600] sm:$0xff] }
  0x96   : > { %1025 = vmatpush.msrb.mxu0 %v3270_v50  ;;  %1045 = vmatpush.msrb.mxu1 %v995_v53  ;;  %4082 = vst [vmem:[#allocation23_spill] sm:$0xff] %v3290_v48  ;;  %v992_v53 = vld [vmem:[#allocation2 + $0x680] sm:$0xff] }
  0x97   : > { %1109 = vmatpush.msrb.mxu2 %v3273_v57  ;;  %1129 = vmatpush.msrb.mxu3 %v1079_v62  ;;  %v3293_v62 = vld [vmem:[#allocation2 + $0x700] sm:$0xff] }
  0x98   : > { %1026 = vmatpush.msrb.mxu0 %v3276_v2  ;;  %1046 = vmatpush.msrb.mxu1 %v994_v7  ;;  %4083 = vst [vmem:[#allocation24_spill] sm:$0xff] %v3293_v62  ;;  %v1076_v7 = vld [vmem:[#allocation2 + $0x780] sm:$0xff] }
  0x99   : > { %1110 = vmatpush.msrb.mxu2 %v3279_v11  ;;  %1130 = vmatpush.msrb.mxu3 %v1078_v15  ;;  %v3298_v15 = vld [vmem:[#allocation2 + $0x878] sm:$0xff] }
  0x9a   : > { %2637 = vset.pattern.permute.xlu1 %v3996_v44  ;;  %1027 = vmatpush.msrb.mxu0 %v3282_v22  ;;  %4084 = vst [vmem:[#allocation25_spill] sm:$0xff] %v3298_v15  ;;  %v1175_v44 = vld [vmem:[#allocation2 + $0x8f8] sm:$0xff] }
  0x9b   : > { %1047 = vmatpush.msrb.mxu1 %v993_v28  ;;  %1111 = vmatpush.msrb.mxu2 %v3285_v32  ;;  %v3302_v28 = vld [vmem:[#allocation2 + $0x870] sm:$0xff] }
  0x9c   : > { %1131 = vmatpush.msrb.mxu3 %v1077_v36  ;;  %1054 = vperm.xlu1 %2637, %v3121_v19   ;;  %4085 = vst [vmem:[#allocation26_spill] sm:$0xff] %v3302_v28  ;;  %v3306_v36 = vld.sshfl [vmem:[#allocation1] sm:$0xff pattern:$0x75316420] }
  0x9d   : > { %1028 = vmatpush.msrb.mxu0 %v3290_v48  ;;  %1048 = vmatpush.msrb.mxu1 %v992_v53  ;;  %v3308_v53 = vld.sshfl [vmem:[#allocation1 + $0x8] sm:$0xff pattern:$0x75316420] }
  0x9e   : > { %1112 = vmatpush.msrb.mxu2 %v3293_v62  ;;  %1132 = vmatpush.msrb.mxu3 %v1076_v7  ;;  %1271 = vst [vmem:[#allocation1] ss:$2 sm:$0xff] %v3108_v16  ;;  %v4002_v7 = vmov 4   ;;  %v3324_v16 = vld [vmem:[#allocation2 + $0x860] sm:$0xff] }
  0x9f   : > { %1029 = vmatmul.f32.vlgmr.msrb.gmra.mxu0 %v3180_v20  ;;  %1049 = vmatmul.f32.vlgmr.msrb.gmra.mxu1 %v3186_v24  ;;  %v3313_v20 = vld [vmem:[#allocation2 + $0x868] sm:$0xff]  ;;  %4088 = vst [vmem:[#allocation29_spill] sm:$0xff] %v3324_v16 }
  0xa0   : > { %1113 = vmatmul.f32.vlgmr.msrb.gmra.mxu2 %v3213_v40  ;;  %1133 = vmatmul.f32.vlgmr.msrb.gmra.mxu3 %v3215_v41  ;;  %4086 = vst [vmem:[#allocation27_spill] sm:$0xff] %v3313_v20  ;;  %v3315_v24 = vld [vmem:[#allocation2 + $0x8e8] sm:$0xff]  ;;  %v464_v40 = vld [vmem:[%s3987_s4] sm:$0xff]  ;;  %v3326_v41 = vld [vmem:[#allocation2 + $0x8e0] sm:$0xff] }
  0xa1   : > { %1181 = vmatpush.msra.mxu0 %v3298_v15  ;;  %1201 = vmatpush.msra.mxu1 %v1175_v44  ;;  %4087 = vst [vmem:[#allocation28_spill] sm:$0xff] %v3315_v24  ;;  %v3330_v44 = vld [vmem:[#allocation2 + $0x858] sm:$0xff] }
  0xa2   : > { %2635 = vset.pattern.permute.xlu2 %v4002_v7  ;;  %2639 = vset.pattern.permute.xlu0 %v4004_v58  ;;  %4089 = vst [vmem:[#allocation30_spill] sm:$0xff] %v3326_v41  ;;  %v3337_v7 = vld [vmem:[#allocation2 + $0x850] sm:$0xff] }
  0xa3   : > { %1182 = vmatpush.msra.mxu0 %v3302_v28  ;;  %1202 = vmatpush.msra.mxu1 %v1174_v43  ;;  %4090 = vst [vmem:[#allocation31_spill] sm:$0xff] %v3330_v44  ;;  %v3332_v43 = vld [vmem:[#allocation2 + $0x8d8] sm:$0xff]  ;;  %v3339_v58 = vld [vmem:[#allocation2 + $0x8d0] sm:$0xff] }
  0xa4   : > { %886 = vperm.xlu2 %2635, %v3121_v19   ;;  %2640 = vset.pattern.permute.xlu1 %v4006_v23  ;;  %4091 = vst [vmem:[#allocation32_spill] sm:$0xff] %v3332_v43  ;;  %v3343_v23 = vld [vmem:[#allocation2 + $0x848] sm:$0xff] }
  0xa5   : > { %1183 = vmatpush.msra.mxu0 %v3313_v20  ;;  %1203 = vmatpush.msra.mxu1 %v3315_v24  ;;  %4092 = vst [vmem:[#allocation33_spill] sm:$0xff] %v3337_v7  ;;  %v3355_v24 = vld [vmem:[#allocation2 + $0x840] sm:$0xff]  ;;  %v4028_v20 = vmov 7  }
  0xa6   : > { %1229 = vperm.xlu1 %2640, %v464_v40   ;;  %1222 = vperm.xlu0 %2639, %v3121_v19   ;;  %4093 = vst [vmem:[#allocation34_spill] sm:$0xff] %v3339_v58  ;;  %v3347_v40 = vld [vmem:[#allocation2 + $0x8c8] sm:$0xff] }
  0xa7   : > { %1184 = vmatpush.msra.mxu0 %v3324_v16  ;;  %1204 = vmatpush.msra.mxu1 %v3326_v41  ;;  %4094 = vst [vmem:[#allocation35_spill] sm:$0xff] %v3343_v23  ;;  %v4016_v41 = vmov 5   ;;  %v3372_v16 = vld [vmem:[#allocation2 + $0x8b0] sm:$0xff] }
  0xa8   : > { %4095 = vst [vmem:[#allocation36_spill] sm:$0xff] %v3347_v40 }
  0xa9   : > { %1185 = vmatpush.msra.mxu0 %v3330_v44  ;;  %1205 = vmatpush.msra.mxu1 %v3332_v43  ;;  %4096 = vst [vmem:[#allocation37_spill] sm:$0xff] %v3355_v24  ;;  %v3359_v43 = vld [vmem:[#allocation2 + $0x8c0] sm:$0xff]  ;;  %v4100_v44 = vmov 2  }
  0xaa   : > { %4097 = vst [vmem:[#allocation38_spill] sm:$0xff] %v3359_v43 }
  0xab   : > { %1186 = vmatpush.msra.mxu0 %v3337_v7  ;;  %1206 = vmatpush.msra.mxu1 %v3339_v58  ;;  %v3363_v58 = vld [vmem:[#allocation2 + $0x838] sm:$0xff]  ;;  %4102 = vst [vmem:[#allocation42_spill] sm:$0xff] %v3372_v16 }
  0xac   : > { %2636 = vset.pattern.permute.xlu2 %v4016_v41  ;;  %4098 = vst [vmem:[#allocation39_spill] sm:$0xff] %v3363_v58  ;;  %v3366_v7 = vld [vmem:[#allocation2 + $0x8b8] sm:$0xff]  ;;  %v3370_v41 = vld [vmem:[#allocation2 + $0x830] sm:$0xff] }
  0xad   : > { %970 = vperm.xlu2 %2636, %v3121_v19   ;;  %1187 = vmatpush.msra.mxu0 %v3343_v23  ;;  %4099 = vst [vmem:[#allocation40_spill] sm:$0xff] %v3366_v7  ;;  %v2662_v23 = vld [vmem:[#allocation2 + $0x78] sm:$0xff] }
  0xae   : > { %1207 = vmatpush.msra.mxu1 %v3347_v40  ;;  %1365 = vperm.xlu1 %2640, %v3352_v38   ;;  %4101 = vst [vmem:[#allocation41_spill] sm:$0xff] %v3370_v41  ;;  %v1272_v40 = vld.sshfl [vmem:[#allocation1] sm:$0xff pattern:$0x75316420] }
  0xaf   : > { %1188 = vmatpush.msra.mxu0 %v3355_v24  ;;  %2643 = vset.pattern.permute.xlu0 %v4100_v44  ;;  %v3379_v24 = vld [vmem:[%s3990_s7] sm:$0xff]  ;;  %v3382_v44 = vld [vmem:[#allocation2 + $0x828] sm:$0xff] }
  0xb0   : > { %1208 = vmatpush.msra.mxu1 %v3359_v43  ;;  %1462 = vperm.xlu0 %2643, %v3352_v38   ;;  %4103 = vst [vmem:[#allocation43_spill] sm:$0xff] %v3382_v44  ;;  %v3386_v43 = vld [vmem:[#allocation2 + $0x8a8] sm:$0xff] }
  0xb1   : > { %1189 = vmatpush.msra.mxu0 %v3363_v58  ;;  %2550 = vmatpush.msk.msra.mxu3 %vm1240_vm0, %v1272_v40  ;;  %4104 = vst [vmem:[#allocation44_spill] sm:$0xff] %v3386_v43  ;;  %v3391_v58 = vld [vmem:[#allocation2 + $0x820] sm:$0xff]  ;;  %v3399_v40 = vld [vmem:[#allocation2 + $0x818] sm:$0xff] }
  0xb2   : > { %1209 = vmatpush.msra.mxu1 %v3366_v7  ;;  %2551 = vmatmul.msk.f32.vlgmr.msra.gmra.mxu3 %vm1236_vm1, %v3379_v24  ;;  %4105 = vst [vmem:[#allocation45_spill] sm:$0xff] %v3391_v58  ;;  %v3395_v7 = vld [vmem:[#allocation2 + $0x8a0] sm:$0xff] }
  0xb3   : > { %1190 = vmatpush.msra.mxu0 %v3370_v41  ;;  %1323 = vmatpush.msrb.mxu3 %v2662_v23  ;;  %4106 = vst [vmem:[#allocation46_spill] sm:$0xff] %v3395_v7  ;;  %v3403_v41 = vld [vmem:[#allocation2 + $0x898] sm:$0xff]  ;;  %v3407_v23 = vld [vmem:[#allocation2 + $0x810] sm:$0xff] }
  0xb4   : > { %1210 = vmatpush.msra.mxu1 %v3372_v16  ;;  %4107 = vst [vmem:[#allocation47_spill] sm:$0xff] %v3399_v40  ;;  %v4108_v16 = vmov 3  }
  0xb5   : > { %2638 = vset.pattern.permute.xlu2 %v4028_v20  ;;  %1191 = vmatpush.msra.mxu0 %v3382_v44  ;;  %4109 = vst [vmem:[#allocation48_spill] sm:$0xff] %v3403_v41  ;;  %v3410_v20 = vld [vmem:[#allocation2 + $0x890] sm:$0xff]  ;;  %v3424_v44 = vld [vmem:[#allocation2 + $0x800] sm:$0xff] }
  0xb6   : > { %1211 = vmatpush.msra.mxu1 %v3386_v43  ;;  %1138 = vperm.xlu2 %2638, %v3121_v19   ;;  %4110 = vst [vmem:[#allocation49_spill] sm:$0xff] %v3407_v23  ;;  %v4112_v43 = vmov 7   ;;  %v3414_v19 = vld [vmem:[#allocation2 + $0x808] sm:$0xff] }
  0xb7   : > { %1192 = vmatpush.msra.mxu0 %v3391_v58  ;;  %2644 = vset.pattern.permute.xlu1 %v4108_v16  ;;  %4111 = vst [vmem:[#allocation50_spill] sm:$0xff] %v3410_v20  ;;  %v3418_v58 = vld [vmem:[#allocation2 + $0x888] sm:$0xff] }
  0xb8   : > { %1212 = vmatpush.msra.mxu1 %v3395_v7  ;;  %1511 = vperm.xlu1 %2644, %v3352_v38   ;;  %4113 = vst [vmem:[#allocation51_spill] sm:$0xff] %v3414_v19  ;;  %v2663_v7 = vld [vmem:[#allocation2 + $0x70] sm:$0xff] }
  0xb9   : > { %1193 = vmatpush.msra.mxu0 %v3399_v40  ;;  %2648 = vset.pattern.permute.xlu0 %v4112_v43  ;;  %4114 = vst [vmem:[#allocation52_spill] sm:$0xff] %v3418_v58  ;;  %v465_v40 = vld [vmem:[%s3987_s4 + $0x8] sm:$0xff] }
  0xba   : > { %1213 = vmatpush.msra.mxu1 %v3403_v41  ;;  %1707 = vperm.xlu0 %2648, %v3352_v38   ;;  %4115 = vst [vmem:[#allocation53_spill] sm:$0xff] %v3424_v44  ;;  %v3427_v43 = vld [vmem:[#allocation2 + $0x880] sm:$0xff]  ;;  %v2664_v41 = vld [vmem:[#allocation2 + $0x68] sm:$0xff] }
  0xbb   : > { %1194 = vmatpush.msra.mxu0 %v3407_v23  ;;  %1324 = vmatpush.msrb.mxu3 %v2663_v7  ;;  %4116 = vst [vmem:[#allocation54_spill] sm:$0xff] %v3427_v43  ;;  %v4117_v23 = vmov 0   ;;  %v4118_v7 = vmov 5  }
  0xbc   : > { %1214 = vmatpush.msra.mxu1 %v3410_v20  ;;  %v2665_v20 = vld [vmem:[#allocation2 + $0x60] sm:$0xff] }
  0xbd   : > { %1195 = vmatpush.msra.mxu0 %v3414_v19  ;;  %1325 = vmatpush.msrb.mxu3 %v2664_v41  ;;  %v2666_v41 = vld [vmem:[#allocation2 + $0x178] sm:$0xff] }
  0xbe   : > { %1215 = vmatpush.msra.mxu1 %v3418_v58  ;;  %2641 = vset.pattern.permute.xlu2 %v4117_v23  ;;  %v2667_v58 = vld [vmem:[#allocation2 + $0x1f8] sm:$0xff] }
  0xbf   : > { %1268 = vperm.xlu2 %2641, %v465_v40   ;;  %1196 = vmatpush.msra.mxu0 %v3424_v44  ;;  %v2668_v19 = vld [vmem:[#allocation2 + $0x58] sm:$0xff]  ;;  %v2669_v40 = vld [vmem:[#allocation2 + $0x170] sm:$0xff]  ;;  %v2676_v44 = vld [vmem:[#allocation2 + $0x40] sm:$0xff] }
  0xc0   : > { %1216 = vmatpush.msra.mxu1 %v3427_v43  ;;  %1197 = vmatmul.f32.vlgmr.msra.gmra.mxu0 %v3306_v36  ;;  %v2670_v43 = vld [vmem:[#allocation2 + $0x1f0] sm:$0xff] }
  0xc1   : > { %1217 = vmatmul.f32.vlgmr.msra.gmra.mxu1 %v3308_v53  ;;  %2646 = vset.pattern.permute.xlu1 %v4118_v7  ;;  %v2671_v36 = vld [vmem:[#allocation2 + $0x50] sm:$0xff]  ;;  %v4119_v53 = vmov 1   ;;  %v2672_v7 = vld [vmem:[#allocation2 + $0x168] sm:$0xff] }
  0xc2   : > { %1609 = vperm.xlu1 %2646, %v3352_v38   ;;  %1326 = vmatpush.msrb.mxu3 %v2665_v20  ;;  %v2673_v20 = vld [vmem:[#allocation2 + $0x48] sm:$0xff] }
  0xc3   : > { %1372 = vmatpush.msrb.mxu0 %v2666_v41  ;;  %1392 = vmatpush.msrb.mxu1 %v2667_v58  ;;  %v2674_v41 = vld [vmem:[#allocation2 + $0x160] sm:$0xff]  ;;  %v2675_v58 = vld [vmem:[#allocation2 + $0x1e8] sm:$0xff] }
  0xc4   : > { %1327 = vmatpush.msrb.mxu3 %v2668_v19  ;;  %2651 = vset.pattern.permute.xlu0 %v4117_v23  ;;  %v4120_v19 = vmov 8  }
  0xc5   : > { %1373 = vmatpush.msrb.mxu0 %v2669_v40  ;;  %1393 = vmatpush.msrb.mxu1 %v2670_v43  ;;  %v2677_v43 = vld [vmem:[#allocation2 + $0x158] sm:$0xff] }
  0xc6   : > { %1328 = vmatpush.msrb.mxu3 %v2671_v36  ;;  %v2678_v40 = vld [vmem:[#allocation2 + $0x38] sm:$0xff]  ;;  %v2679_v36 = vld [vmem:[#allocation2 + $0x1e0] sm:$0xff] }
  0xc7   : > { %2642 = vset.pattern.permute.xlu2 %v4119_v53  ;;  %1374 = vmatpush.msrb.mxu0 %v2672_v7  ;;  %v2680_v7 = vld [vmem:[#allocation2 + $0x150] sm:$0xff] }
  0xc8   : > { %1413 = vperm.xlu2 %2642, %v3352_v38   ;;  %1329 = vmatpush.msrb.mxu3 %v2673_v20  ;;  %v2681_v53 = vld [vmem:[#allocation2 + $0x30] sm:$0xff]  ;;  %v2682_v20 = vld [vmem:[#allocation2 + $0x1d8] sm:$0xff] }
  0xc9   : > { %1375 = vmatpush.msrb.mxu0 %v2674_v41  ;;  %1394 = vmatpush.msrb.mxu1 %v2675_v58  ;;  %v2683_v41 = vld [vmem:[#allocation2 + $0x148] sm:$0xff]  ;;  %v4121_v58 = vmov 4  }
  0xca   : > { %2649 = vset.pattern.permute.xlu1 %v4120_v19  ;;  %1330 = vmatpush.msrb.mxu3 %v2676_v44  ;;  %v2684_v19 = vld [vmem:[#allocation2 + $0x28] sm:$0xff]  ;;  %v2685_v44 = vld [vmem:[#allocation2 + $0x140] sm:$0xff] }
  0xcb   : > { %1756 = vperm.xlu1 %2649, %v3352_v38   ;;  %1376 = vmatpush.msrb.mxu0 %v2677_v43  ;;  %v2686_v43 = vld [vmem:[#allocation2 + $0x20] sm:$0xff] }
  0xcc   : > { %1331 = vmatpush.msrb.mxu3 %v2678_v40  ;;  %1395 = vmatpush.msrb.mxu1 %v2679_v36  ;;  %v2687_v40 = vld [vmem:[#allocation2 + $0x1d0] sm:$0xff]  ;;  %v2688_v36 = vld [vmem:[#allocation2 + $0x138] sm:$0xff] }
  0xcd   : > { %1377 = vmatpush.msrb.mxu0 %v2680_v7  ;;  %v2690_v7 = vld [vmem:[#allocation2 + $0x1c8] sm:$0xff] }
  0xce   : > { %1332 = vmatpush.msrb.mxu3 %v2681_v53  ;;  %1396 = vmatpush.msrb.mxu1 %v2682_v20  ;;  %v2689_v53 = vld [vmem:[#allocation2 + $0x18] sm:$0xff]  ;;  %v2691_v20 = vld [vmem:[#allocation2 + $0x130] sm:$0xff] }
  0xcf   : > { %1378 = vmatpush.msrb.mxu0 %v2683_v41  ;;  %v2692_v41 = vld [vmem:[#allocation2 + $0x10] sm:$0xff] }
  0xd0   : > { %2645 = vset.pattern.permute.xlu2 %v4121_v58  ;;  %1333 = vmatpush.msrb.mxu3 %v2684_v19  ;;  %v2693_v19 = vld [vmem:[#allocation2 + $0x1c0] sm:$0xff]  ;;  %v2694_v58 = vld [vmem:[#allocation2 + $0x128] sm:$0xff] }
  0xd1   : > { %1560 = vperm.xlu2 %2645, %v3352_v38   ;;  %1379 = vmatpush.msrb.mxu0 %v2685_v44  ;;  %v2695_v44 = vld [vmem:[#allocation2 + $0x8] sm:$0xff] }
  0xd2   : > { %1334 = vmatpush.msrb.mxu3 %v2686_v43  ;;  %1397 = vmatpush.msrb.mxu1 %v2687_v40  ;;  %v2696_v43 = vld [vmem:[#allocation2 + $0x1b8] sm:$0xff]  ;;  %v4122_v40 = vmov 6  }
  0xd3   : > { %1380 = vmatpush.msrb.mxu0 %v2688_v36  ;;  %2654 = vset.pattern.permute.xlu1 %v4108_v16  ;;  %v2697_v36 = vld [vmem:[#allocation2 + $0x120] sm:$0xff] }
  0xd4   : > { %1335 = vmatpush.msrb.mxu3 %v2689_v53  ;;  %1398 = vmatpush.msrb.mxu1 %v2690_v7  ;;  %v2698_v16 = vld [vmem:[#allocation2] sm:$0xff]  ;;  %v2699_v53 = vld [vmem:[#allocation2 + $0x278] sm:$0xff] }
  0xd5   : > { %1381 = vmatpush.msrb.mxu0 %v2691_v20  ;;  %v2700_v7 = vld [vmem:[#allocation2 + $0x118] sm:$0xff]  ;;  %v2701_v20 = vld [vmem:[#allocation2 + $0x1b0] sm:$0xff] }
  0xd6   : > { %1336 = vmatpush.msrb.mxu3 %v2692_v41  ;;  %1399 = vmatpush.msrb.mxu1 %v2693_v19  ;;  %v2702_v41 = vld [vmem:[#allocation2 + $0x270] sm:$0xff]  ;;  %v2704_v19 = vld [vmem:[#allocation2 + $0x1a8] sm:$0xff] }
  0xd7   : > { %1382 = vmatpush.msrb.mxu0 %v2694_v58  ;;  %v2703_v58 = vld [vmem:[#allocation2 + $0x110] sm:$0xff] }
  0xd8   : > { %1337 = vmatpush.msrb.mxu3 %v2695_v44  ;;  %1400 = vmatpush.msrb.mxu1 %v2696_v43  ;;  %v2705_v44 = vld [vmem:[#allocation2 + $0x268] sm:$0xff] }
  0xd9   : > { %2647 = vset.pattern.permute.xlu2 %v4122_v40  ;;  %1383 = vmatpush.msrb.mxu0 %v2697_v36  ;;  %v2706_v43 = vld [vmem:[#allocation2 + $0x108] sm:$0xff]  ;;  %v2707_v36 = vld [vmem:[#allocation2 + $0x1a0] sm:$0xff] }
  0xda   : > { %1658 = vperm.xlu2 %2647, %v3352_v38   ;;  %1338 = vmatpush.msrb.mxu3 %v2698_v16  ;;  %v2708_v38 = vld [vmem:[#allocation2 + $0x260] sm:$0xff] }
  0xdb   : > { %1384 = vmatpush.msrb.mxu0 %v2700_v7  ;;  %1401 = vmatpush.msrb.mxu1 %v2701_v20  ;;  %v2709_v16 = vld [vmem:[#allocation2 + $0x100] sm:$0xff]  ;;  %v2711_v7 = vld [vmem:[#allocation2 + $0x198] sm:$0xff] }
  0xdc   : > { %1421 = vmatpush.msra.mxu3 %v2699_v53  ;;  %v2710_v53 = vld [vmem:[#allocation2 + $0x378] sm:$0xff] }
  0xdd   : > { %1385 = vmatpush.msrb.mxu0 %v2703_v58  ;;  %1402 = vmatpush.msrb.mxu1 %v2704_v19  ;;  %v2712_v20 = vld [vmem:[#allocation2 + $0x258] sm:$0xff]  ;;  %v2714_v58 = vld [vmem:[#allocation2 + $0x190] sm:$0xff] }
  0xde   : > { %1422 = vmatpush.msra.mxu3 %v2702_v41  ;;  %v2713_v41 = vld [vmem:[#allocation2 + $0x370] sm:$0xff] }
  0xdf   : > { %1386 = vmatpush.msrb.mxu0 %v2706_v43  ;;  %1403 = vmatpush.msrb.mxu1 %v2707_v36  ;;  %v2715_v19 = vld [vmem:[#allocation2 + $0x250] sm:$0xff]  ;;  %v2717_v43 = vld [vmem:[#allocation2 + $0x188] sm:$0xff] }
  0xe0   : > { %1423 = vmatpush.msra.mxu3 %v2705_v44  ;;  %v2716_v44 = vld [vmem:[#allocation2 + $0x368] sm:$0xff] }
  0xe1   : > { %1387 = vmatpush.msrb.mxu0 %v2709_v16  ;;  %1404 = vmatpush.msrb.mxu1 %v2711_v7  ;;  %v2718_v36 = vld [vmem:[#allocation2 + $0x248] sm:$0xff]  ;;  %v2720_v16 = vld [vmem:[#allocation2 + $0x180] sm:$0xff]  ;;  %v2722_v7 = vld [vmem:[#allocation2 + $0x3f8] sm:$0xff] }
  0xe2   : > { %1424 = vmatpush.msra.mxu3 %v2708_v38  ;;  %2650 = vset.pattern.permute.xlu2 %v4117_v23  ;;  %v2719_v38 = vld [vmem:[#allocation2 + $0x360] sm:$0xff] }
  0xe3   : > { %1470 = vmatpush.msra.mxu0 %v2710_v53  ;;  %1405 = vmatpush.msrb.mxu1 %v2714_v58  ;;  %v2721_v53 = vld [vmem:[#allocation2 + $0x240] sm:$0xff]  ;;  %v2725_v58 = vld [vmem:[#allocation2 + $0x3f0] sm:$0xff] }
  0xe4   : > { %1425 = vmatpush.msra.mxu3 %v2712_v20  ;;  %v2723_v20 = vld [vmem:[#allocation2 + $0x358] sm:$0xff] }
  0xe5   : > { %1471 = vmatpush.msra.mxu0 %v2713_v41  ;;  %1406 = vmatpush.msrb.mxu1 %v2717_v43  ;;  %v2724_v41 = vld [vmem:[#allocation2 + $0x238] sm:$0xff]  ;;  %v2728_v43 = vld [vmem:[#allocation2 + $0x3e8] sm:$0xff] }
  0xe6   : > { %1426 = vmatpush.msra.mxu3 %v2715_v19  ;;  %v2726_v19 = vld [vmem:[#allocation2 + $0x350] sm:$0xff] }
  0xe7   : > { %1472 = vmatpush.msra.mxu0 %v2716_v44  ;;  %1407 = vmatpush.msrb.mxu1 %v2720_v16  ;;  %v2727_v44 = vld [vmem:[#allocation2 + $0x230] sm:$0xff]  ;;  %v2731_v16 = vld [vmem:[#allocation2 + $0x3e0] sm:$0xff] }
  0xe8   : > { %1427 = vmatpush.msra.mxu3 %v2718_v36  ;;  %v2729_v36 = vld [vmem:[#allocation2 + $0x348] sm:$0xff] }
  0xe9   : > { %1473 = vmatpush.msra.mxu0 %v2719_v38  ;;  %1490 = vmatpush.msra.mxu1 %v2722_v7  ;;  %v2730_v38 = vld [vmem:[#allocation2 + $0x228] sm:$0xff]  ;;  %v2733_v7 = vld [vmem:[#allocation2 + $0x220] sm:$0xff] }
  0xea   : > { %1428 = vmatpush.msra.mxu3 %v2721_v53  ;;  %v2732_v53 = vld [vmem:[#allocation2 + $0x340] sm:$0xff] }
  0xeb   : > { %1474 = vmatpush.msra.mxu0 %v2723_v20  ;;  %1491 = vmatpush.msra.mxu1 %v2725_v58  ;;  %v2734_v20 = vld [vmem:[#allocation2 + $0x3d8] sm:$0xff] }
  0xec   : > { %1429 = vmatpush.msra.mxu3 %v2724_v41  ;;  %v2735_v41 = vld [vmem:[#allocation2 + $0x338] sm:$0xff] }
  0xed   : > { %1475 = vmatpush.msra.mxu0 %v2726_v19  ;;  %1492 = vmatpush.msra.mxu1 %v2728_v43  ;;  %v2736_v58 = vld [vmem:[#allocation2 + $0x218] sm:$0xff]  ;;  %v2737_v19 = vld [vmem:[#allocation2 + $0x3d0] sm:$0xff] }
  0xee   : > { %1430 = vmatpush.msra.mxu3 %v2727_v44  ;;  %v2738_v44 = vld [vmem:[#allocation2 + $0x330] sm:$0xff] }
  0xef   : > { %1476 = vmatpush.msra.mxu0 %v2729_v36  ;;  %1493 = vmatpush.msra.mxu1 %v2731_v16  ;;  %v2739_v43 = vld [vmem:[#allocation2 + $0x210] sm:$0xff]  ;;  %v2740_v36 = vld [vmem:[#allocation2 + $0x3c8] sm:$0xff] }
  0xf0   : > { %1431 = vmatpush.msra.mxu3 %v2730_v38  ;;  %v2741_v38 = vld [vmem:[#allocation2 + $0x328] sm:$0xff] }
  0xf1   : > { %1477 = vmatpush.msra.mxu0 %v2732_v53  ;;  %1494 = vmatpush.msra.mxu1 %v2734_v20  ;;  %v2742_v16 = vld [vmem:[#allocation2 + $0x208] sm:$0xff]  ;;  %v2743_v53 = vld [vmem:[#allocation2 + $0x3c0] sm:$0xff]  ;;  %v2745_v20 = vld [vmem:[#allocation2 + $0x3b8] sm:$0xff] }
  0xf2   : > { %1432 = vmatpush.msra.mxu3 %v2733_v7  ;;  %v2744_v7 = vld [vmem:[#allocation2 + $0x320] sm:$0xff] }
  0xf3   : > { %1478 = vmatpush.msra.mxu0 %v2735_v41  ;;  %1495 = vmatpush.msra.mxu1 %v2737_v19  ;;  %v2746_v41 = vld [vmem:[#allocation2 + $0x318] sm:$0xff]  ;;  %v2748_v19 = vld [vmem:[#allocation2 + $0x310] sm:$0xff] }
  0xf4   : > { %1433 = vmatpush.msra.mxu3 %v2736_v58  ;;  %v2747_v58 = vld [vmem:[#allocation2 + $0x3b0] sm:$0xff] }
  0xf5   : > { %1479 = vmatpush.msra.mxu0 %v2738_v44  ;;  %1496 = vmatpush.msra.mxu1 %v2740_v36  ;;  %v2749_v44 = vld [vmem:[#allocation2 + $0x3a8] sm:$0xff]  ;;  %v2751_v36 = vld [vmem:[#allocation2 + $0x3a0] sm:$0xff] }
  0xf6   : > { %1434 = vmatpush.msra.mxu3 %v2739_v43  ;;  %v2750_v43 = vld [vmem:[#allocation2 + $0x308] sm:$0xff] }
  0xf7   : > { %1480 = vmatpush.msra.mxu0 %v2741_v38  ;;  %1497 = vmatpush.msra.mxu1 %v2743_v53  ;;  %v2752_v38 = vld [vmem:[#allocation2 + $0x300] sm:$0xff]  ;;  %v2754_v53 = vld [vmem:[#allocation2 + $0x390] sm:$0xff] }
  0xf8   : > { %1435 = vmatpush.msra.mxu3 %v2742_v16  ;;  %v2753_v16 = vld [vmem:[#allocation2 + $0x398] sm:$0xff] }
  0xf9   : > { %1481 = vmatpush.msra.mxu0 %v2744_v7  ;;  %1498 = vmatpush.msra.mxu1 %v2745_v20  ;;  %v2756_v7 = vld [vmem:[#allocation2 + $0x380] sm:$0xff]  ;;  %v630_v20 = vpop.f32.mrf.mxu3 }
  0xfa   : > { %1436 = vmatpush.msra.mxu3 %v3114_v3  ;;  %v2755_v3 = vld [vmem:[#allocation2 + $0x388] sm:$0xff] }
  0xfb   : > { %1482 = vmatpush.msra.mxu0 %v2746_v41  ;;  %1499 = vmatpush.msra.mxu1 %v2747_v58  ;;  %v526_v58 = vpop.f32.mrf.mxu0 }
  0xfd   : > { %1483 = vmatpush.msra.mxu0 %v2748_v19  ;;  %1500 = vmatpush.msra.mxu1 %v2749_v44  ;;  %v546_v19 = vpop.f32.mrf.mxu1  ;;  %v610_v44 = vpop.f32.mrf.mxu2 }
  0xfe   : > { %v3449_v41 = vpop.permute.xlu2 %886  ;;  %v631_v28 = vadd.f32 %v630_v20, %v610_v44 }
  0xff   : > { %1484 = vmatpush.msra.mxu0 %v2750_v43  ;;  %1501 = vmatpush.msra.mxu1 %v2751_v36  ;;  %v3451_v43 = vpop.permute.xlu0 %551 }
 0x101   : > { %1485 = vmatpush.msra.mxu0 %v2752_v38  ;;  %1502 = vmatpush.msra.mxu1 %v2753_v16  ;;  %v798_v23 = vpop.f32.mrf.mxu3 }
 0x103   : > { %1503 = vmatpush.msra.mxu1 %v2754_v53  ;;  %v694_v38 = vpop.f32.mrf.mxu0  ;;  %v3455_v53 = vpop.permute.xlu1 %718 }
 0x105   : > { %1504 = vmatpush.msra.mxu1 %v2755_v3  ;;  %v714_v40 = vpop.f32.mrf.mxu1  ;;  %v778_v16 = vpop.f32.mrf.mxu2  ;;  %v547_v3 = vadd.f32 %v546_v19, %v526_v58 }
 0x106   : > { %v715_v46 = vadd.f32 %v714_v40, %v694_v38  ;;  %v799_v50 = vadd.f32 %v798_v23, %v778_v16 }
 0x107   : > { %1505 = vmatpush.msra.mxu1 %v2756_v7  ;;  %v3453_v36 = vpop.permute.xlu2 %970  ;;  %v3457_v7 = vpop.permute.xlu0 %634  ;;  %v554_v57 = vmul.f32 %v3451_v43, %v547_v3 }
 0x108   : > { %v637_v2 = vmul.f32 %v3457_v7, %v631_v28  ;;  %v721_v58 = vmul.f32 %v3455_v53, %v715_v46 }
 0x109   : > { %v966_v62 = vpop.f32.mrf.mxu3 }
 0x10a   : > { %v638_v39 = vadd.f32 %v637_v2, %v554_v57 }
 0x10b   : > { %v862_v15 = vpop.f32.mrf.mxu0  ;;  %v3463_v34 = vpop.permute.xlu1 %802 }
 0x10c   : > { %v805_v26 = vmul.f32 %v3463_v34, %v799_v50  ;;  %v722_v3 = vadd.f32 %v721_v58, %v638_v39  ;;  %v2757_v39 = vld [vmem:[#allocation2 + $0x478] sm:$0xff] }
 0x10d   : > { %v882_v48 = vpop.f32.mrf.mxu1  ;;  %v946_v11 = vpop.f32.mrf.mxu2 }
 0x10e   : > { %v883_v20 = vadd.f32 %v882_v48, %v862_v15  ;;  %v967_v30 = vadd.f32 %v966_v62, %v946_v11  ;;  %v806_v38 = vadd.f32 %v805_v26, %v722_v3  ;;  %v2758_v62 = vld [vmem:[#allocation2 + $0x578] sm:$0xff]  ;;  %v2760_v15 = vld [vmem:[#allocation2 + $0x570] sm:$0xff] }
 0x110   : > { %v3459_v32 = vpop.permute.xlu2 %1138  ;;  %v889_v28 = vmul.f32 %v3449_v41, %v883_v20  ;;  %v973_v57 = vmul.f32 %v3453_v36, %v967_v30 }
 0x112   : > { %v890_v50 = vadd.f32 %v889_v28, %v806_v38 }
 0x113   : > { %v3474_v48 = vpop.permute.xlu1 %1054 }
 0x118   : > { %v3480_v20 = vpop.permute.xlu0 %1222 }
 0x119   : > { %v3467_v13 = vpop.permute.xlu2 %1268 }
 0x11c   : > { %v1030_v19 = vpop.f32.mrf.mxu0  ;;  %v1050_v44 = vpop.f32.mrf.mxu1 }
 0x11d   : > { %v1051_v40 = vadd.f32 %v1050_v44, %v1030_v19  ;;  %v2761_v19 = vld [vmem:[#allocation2 + $0x468] sm:$0xff] }
 0x11e   : > { %v2762_v44 = vld [vmem:[#allocation2 + $0x568] sm:$0xff] }
 0x11f   : > { %v1057_v11 = vmul.f32 %v3474_v48, %v1051_v40  ;;  %v2763_v40 = vld [vmem:[#allocation2 + $0x460] sm:$0xff] }
 0x123   : > { %v1134_v22 = vpop.f32.mrf.mxu3  ;;  %v1114_v18 = vpop.f32.mrf.mxu2 }
 0x124   : > { %v1135_v46 = vadd.f32 %v1134_v22, %v1114_v18  ;;  %v2759_v22 = vld [vmem:[#allocation2 + $0x470] sm:$0xff] }
 0x126   : > { %v1141_v26 = vmul.f32 %v3459_v32, %v1135_v46  ;;  %v2765_v46 = vld [vmem:[#allocation2 + $0x458] sm:$0xff] }
 0x135   : > { %v1298_v5 = vpop.f32.mrf.mxu3 }
 0x136   : > { %v1299_v23 = vadd.f32 %v1298_v5, %v3467_v13  ;;  %v974_v5 = vadd.f32 %v973_v57, %v890_v50  ;;  %v3485_v57 = vpop.permute.xlu1 %1229  ;;  %v2766_v50 = vld [vmem:[#allocation2 + $0x558] sm:$0xff] }
 0x138   : > { %v3472_v2 = vmax.f32 %v1299_v23, 0.0  ;;  %v1058_v16 = vadd.f32 %v1057_v11, %v974_v5  ;;  %v2764_v23 = vld [vmem:[#allocation2 + $0x560] sm:$0xff]  ;;  %v2767_v5 = vld [vmem:[#allocation2 + $0x450] sm:$0xff] }
 0x13a   : > { %1339 = vmatmul.f32.vlgmr.msrb.gmra.mxu3 %v3472_v2  ;;  %1388 = vmatmul.f32.vlgmr.msrb.gmra.mxu0 %v3472_v2  ;;  %v1142_v3 = vadd.f32 %v1141_v26, %v1058_v16  ;;  %v2768_v26 = vld [vmem:[#allocation2 + $0x550] sm:$0xff]  ;;  %v2773_v16 = vld [vmem:[#allocation2 + $0x540] sm:$0xff] }
 0x13b   : > { %1519 = vmatpush.msrb.mxu3 %v2757_v39  ;;  %1568 = vmatpush.msrb.mxu0 %v2758_v62  ;;  %v1233_v39 = vld [vmem:[%s3989_s6] sm:$0xf]  ;;  %v1273_v62 = vld.sshfl [vmem:[#allocation1 + $0x8] sm:$0xff pattern:$0x75316420] }
 0x13d   : > { %v1198_v30 = vpop.f32.mrf.mxu0  ;;  %1520 = vmatpush.msrb.mxu3 %v2759_v22  ;;  %1569 = vmatpush.msrb.mxu0 %v2760_v15  ;;  %v2771_v22 = vld [vmem:[#allocation2 + $0x440] sm:$0xff]  ;;  %v2772_v15 = vld [vmem:[#allocation2 + $0xf8] sm:$0xff] }
 0x13e   : > { %v1218_v18 = vpop.f32.mrf.mxu1 }
 0x13f   : > { %v1219_v58 = vadd.f32 %v1218_v18, %v1198_v30  ;;  %1521 = vmatpush.msrb.mxu3 %v2761_v19  ;;  %1570 = vmatpush.msrb.mxu0 %v2762_v44  ;;  %v2769_v30 = vld [vmem:[#allocation2 + $0x448] sm:$0xff]  ;;  %v2775_v19 = vld [vmem:[#allocation2 + $0xf0] sm:$0xff] }
 0x140   : > { %v2770_v18 = vld [vmem:[#allocation2 + $0x548] sm:$0xff] }
 0x141   : > { %v1225_v28 = vmul.f32 %v3480_v20, %v1219_v58  ;;  %1522 = vmatpush.msrb.mxu3 %v2763_v40  ;;  %1571 = vmatpush.msrb.mxu0 %v2764_v23  ;;  %v2774_v58 = vld [vmem:[#allocation2 + $0x438] sm:$0xff]  ;;  %v2776_v44 = vld [vmem:[#allocation2 + $0xe8] sm:$0xff] }
 0x142   : > { %1437 = vmatmul.f32.vlgmr.msra.gmra.mxu3 %v3472_v2  ;;  %1486 = vmatmul.f32.vlgmr.msra.gmra.mxu0 %v3472_v2  ;;  %v4136_v40 = vld [vmem:[#allocation23_spill] sm:$0xff]  ;;  %v4137_v23 = vld [vmem:[#allocation25_spill] sm:$0xff] }
 0x143   : > { %v1226_v38 = vadd.f32 %v1225_v28, %v1142_v3  ;;  %1523 = vmatpush.msrb.mxu3 %v2765_v46  ;;  %1572 = vmatpush.msrb.mxu0 %v2766_v50  ;;  %v2777_v3 = vld [vmem:[#allocation2 + $0xe0] sm:$0xff]  ;;  %v2778_v28 = vld [vmem:[#allocation2 + $0xd8] sm:$0xff]  ;;  %v4138_v46 = vld [vmem:[#allocation22_spill] sm:$0xff] }
 0x144   : > { %v4139_v50 = vld [vmem:[#allocation26_spill] sm:$0xff] }
 0x145   : > { %v1232_v11 = vadd.f32 %v3485_v57, %v1226_v38  ;;  %1524 = vmatpush.msrb.mxu3 %v2767_v5  ;;  %1573 = vmatpush.msrb.mxu0 %v2768_v26  ;;  %v2798_v38 = vld [vmem:[#allocation2 + $0x2b8] sm:$0xff]  ;;  %v2800_v5 = vld [vmem:[#allocation2 + $0x2a8] sm:$0xff] }
 0x146   : > { %v4142_v26 = vld [vmem:[#allocation29_spill] sm:$0xff] }
 0x147   : > { %2548 = vmatpush.msk.msra.mxu2 %vm1240_vm0, %v1232_v11  ;;  %1525 = vmatpush.msrb.mxu3 %v2769_v30  ;;  %v2799_v11 = vld [vmem:[#allocation2 + $0x2b0] sm:$0xff]  ;;  %v2801_v30 = vld [vmem:[#allocation2 + $0x2a0] sm:$0xff] }
 0x148   : > { %2549 = vmatmul.msk.f32.vlgmr.msra.gmra.mxu2 %vm1236_vm1, %v1233_v39  ;;  %1574 = vmatpush.msrb.mxu0 %v2770_v18  ;;  %v4140_v39 = vld [vmem:[#allocation24_spill] sm:$0xff]  ;;  %v4143_v18 = vld [vmem:[#allocation31_spill] sm:$0xff] }
 0x149   : > { %2552 = vmatpush.msk.msrb.mxu2 %vm1240_vm0, %v1273_v62  ;;  %1526 = vmatpush.msrb.mxu3 %v2771_v22  ;;  %v4141_v62 = vld [vmem:[#allocation27_spill] sm:$0xff] }
 0x14a   : > { %1575 = vmatpush.msrb.mxu0 %v2773_v16  ;;  %v2802_v22 = vld [vmem:[#allocation2 + $0x298] sm:$0xff]  ;;  %v2803_v16 = vld [vmem:[#allocation2 + $0x290] sm:$0xff] }
 0x14b   : > { %1343 = vmatpush.msra.mxu2 %v2772_v15  ;;  %1527 = vmatpush.msrb.mxu3 %v2774_v58  ;;  %v4144_v15 = vld [vmem:[#allocation33_spill] sm:$0xff]  ;;  %v4145_v58 = vld [vmem:[#allocation35_spill] sm:$0xff] }
 0x14c   : > { %1576 = vmatpush.msrb.mxu0 %v3138_v52  ;;  %v2779_v52 = vld [vmem:[#allocation2 + $0xd0] sm:$0xff] }
 0x14d   : > { %1344 = vmatpush.msra.mxu2 %v2775_v19  ;;  %1528 = vmatpush.msrb.mxu3 %v3141_v54  ;;  %v2780_v54 = vld [vmem:[#allocation2 + $0xc8] sm:$0xff] }
 0x14e   : > { %1577 = vmatpush.msrb.mxu0 %v3143_v56  ;;  %v2781_v56 = vld [vmem:[#allocation2 + $0xc0] sm:$0xff]  ;;  %v2804_v19 = vld [vmem:[#allocation2 + $0x288] sm:$0xff] }
 0x14f   : > { %1345 = vmatpush.msra.mxu2 %v2776_v44  ;;  %1529 = vmatpush.msrb.mxu3 %v3148_v59  ;;  %v2782_v59 = vld [vmem:[#allocation2 + $0xb8] sm:$0xff]  ;;  %v4146_v44 = vld [vmem:[#allocation37_spill] sm:$0xff] }
 0x150   : > { %2553 = vmatmul.msk.f32.vlgmr.msrb.gmra.mxu2 %vm1236_vm1, %v3379_v24  ;;  %1578 = vmatpush.msrb.mxu0 %v3151_v61  ;;  %v2783_v61 = vld [vmem:[#allocation2 + $0xb0] sm:$0xff]  ;;  %v4135_v24 = vld [vmem:[#allocation20_spill] sm:$0xff] }
 0x151   : > { %1346 = vmatpush.msra.mxu2 %v2777_v3  ;;  %1530 = vmatpush.msrb.mxu3 %v3154_v63  ;;  %v2784_v63 = vld [vmem:[#allocation2 + $0xa8] sm:$0xff]  ;;  %v2805_v3 = vld [vmem:[#allocation2 + $0x280] sm:$0xff] }
 0x152   : > { %1579 = vmatpush.msrb.mxu0 %v3157_v1  ;;  %v2785_v1 = vld [vmem:[#allocation2 + $0xa0] sm:$0xff] }
 0x153   : > { %1347 = vmatpush.msra.mxu2 %v2778_v28  ;;  %1531 = vmatpush.msrb.mxu3 %v3160_v4  ;;  %v2786_v4 = vld [vmem:[#allocation2 + $0x98] sm:$0xff] }
 0x154   : > { %1580 = vmatpush.msrb.mxu0 %v3163_v6  ;;  %v2787_v6 = vld [vmem:[#allocation2 + $0x90] sm:$0xff] }
 0x155   : > { %1348 = vmatpush.msra.mxu2 %v2779_v52  ;;  %1532 = vmatpush.msrb.mxu3 %v3166_v8  ;;  %v2788_v8 = vld [vmem:[#allocation2 + $0x88] sm:$0xff]  ;;  %v4147_v28 = vld [vmem:[#allocation39_spill] sm:$0xff] }
 0x156   : > { %1581 = vmatpush.msrb.mxu0 %v3169_v10  ;;  %v2789_v10 = vld [vmem:[#allocation2 + $0x80] sm:$0xff] }
 0x157   : > { %1349 = vmatpush.msra.mxu2 %v2780_v54  ;;  %1533 = vmatpush.msrb.mxu3 %v3172_v12  ;;  %v2790_v12 = vld [vmem:[#allocation2 + $0x2f8] sm:$0xff]  ;;  %v4148_v52 = vld [vmem:[#allocation41_spill] sm:$0xff] }
 0x158   : > { %1582 = vmatpush.msrb.mxu0 %v3175_v14  ;;  %v2791_v14 = vld [vmem:[#allocation2 + $0x2f0] sm:$0xff] }
 0x159   : > { %1350 = vmatpush.msra.mxu2 %v2781_v56  ;;  %1534 = vmatpush.msrb.mxu3 %v3178_v17  ;;  %v4123_v17 = vld [vmem:[#allocation9_spill] sm:$0xff]  ;;  %v4149_v54 = vld [vmem:[#allocation43_spill] sm:$0xff] }
 0x15a   : > { %1535 = vmatmul.f32.vlgmr.msrb.gmra.mxu3 %v3472_v2  ;;  %1583 = vmatpush.msrb.mxu0 %v3183_v21  ;;  %v4124_v21 = vld [vmem:[#allocation11_spill] sm:$0xff]  ;;  %v4150_v56 = vld [vmem:[#allocation45_spill] sm:$0xff] }
 0x15b   : > { %1617 = vmatpush.msra.mxu3 %v3191_v25  ;;  %1351 = vmatpush.msra.mxu2 %v2782_v59  ;;  %v2792_v25 = vld [vmem:[#allocation2 + $0x2e8] sm:$0xff]  ;;  %v4151_v59 = vld [vmem:[#allocation47_spill] sm:$0xff] }
 0x15c   : > { %1666 = vmatpush.msra.mxu0 %v3195_v27  ;;  %v4125_v27 = vld [vmem:[#allocation10_spill] sm:$0xff] }
 0x15d   : > { %1618 = vmatpush.msra.mxu3 %v3199_v29  ;;  %1352 = vmatpush.msra.mxu2 %v2783_v61  ;;  %v4126_v29 = vld [vmem:[#allocation13_spill] sm:$0xff] }
 0x15e   : > { %1667 = vmatpush.msra.mxu0 %v3202_v31  ;;  %v2793_v31 = vld [vmem:[#allocation2 + $0x2e0] sm:$0xff] }
 0x15f   : > { %1619 = vmatpush.msra.mxu3 %v3205_v33  ;;  %1353 = vmatpush.msra.mxu2 %v2784_v63  ;;  %v4127_v33 = vld [vmem:[#allocation12_spill] sm:$0xff]  ;;  %v4152_v61 = vld [vmem:[#allocation49_spill] sm:$0xff]  ;;  %v4153_v63 = vld [vmem:[#allocation51_spill] sm:$0xff] }
 0x160   : > { %1668 = vmatpush.msra.mxu0 %v3207_v35  ;;  %v4128_v35 = vld [vmem:[#allocation15_spill] sm:$0xff] }
 0x161   : > { %1620 = vmatpush.msra.mxu3 %v3210_v37  ;;  %1354 = vmatpush.msra.mxu2 %v2785_v1  ;;  %v2794_v37 = vld [vmem:[#allocation2 + $0x2d8] sm:$0xff] }
 0x162   : > { %1669 = vmatpush.msra.mxu0 %v3218_v42  ;;  %v4129_v42 = vld [vmem:[#allocation14_spill] sm:$0xff]  ;;  %v3562_v1 = vld [vmem:[#allocation4 + $0xb8] sm:$0xff] }
 0x163   : > { %1621 = vmatpush.msra.mxu3 %v3222_v45  ;;  %1355 = vmatpush.msra.mxu2 %v2786_v4  ;;  %v4130_v45 = vld [vmem:[#allocation17_spill] sm:$0xff] }
 0x164   : > { %1670 = vmatpush.msra.mxu0 %v3225_v47  ;;  %v2795_v47 = vld [vmem:[#allocation2 + $0x2d0] sm:$0xff]  ;;  %v4154_v4 = vld [vmem:[#allocation53_spill] sm:$0xff] }
 0x165   : > { %1622 = vmatpush.msra.mxu3 %v3228_v49  ;;  %1356 = vmatpush.msra.mxu2 %v2787_v6  ;;  %v4131_v49 = vld [vmem:[#allocation16_spill] sm:$0xff]  ;;  %v3565_v6 = vld [vmem:[#allocation4 + $0xb0] sm:$0xff] }
 0x166   : > { %1671 = vmatpush.msra.mxu0 %v3231_v51  ;;  %v4132_v51 = vld [vmem:[#allocation19_spill] sm:$0xff] }
 0x167   : > { %1623 = vmatpush.msra.mxu3 %v3234_v55  ;;  %1357 = vmatpush.msra.mxu2 %v2788_v8  ;;  %v2796_v55 = vld [vmem:[#allocation2 + $0x2c8] sm:$0xff] }
 0x168   : > { %1672 = vmatpush.msra.mxu0 %v3237_v60  ;;  %v4133_v60 = vld [vmem:[#allocation18_spill] sm:$0xff] }
 0x169   : > { %1624 = vmatpush.msra.mxu3 %v3240_v0  ;;  %1358 = vmatpush.msra.mxu2 %v2789_v10  ;;  %v4134_v0 = vld [vmem:[#allocation21_spill] sm:$0xff] }
 0x16a   : > { %1584 = vmatmul.f32.vlgmr.msrb.gmra.mxu0 %v3472_v2  ;;  %v3568_v8 = vld [vmem:[#allocation4 + $0xa8] sm:$0xff]  ;;  %v3572_v10 = vld [vmem:[#allocation4 + $0xa0] sm:$0xff] }
 0x16b   : > { %1441 = vmatpush.msrb.mxu2 %v2790_v12  ;;  %1625 = vmatpush.msra.mxu3 %v3246_v9  ;;  %v2797_v9 = vld [vmem:[#allocation2 + $0x2c0] sm:$0xff]  ;;  %v3575_v12 = vld [vmem:[#allocation4 + $0x98] sm:$0xff] }
 0x16c   : > { %1673 = vmatpush.msra.mxu0 %v4123_v17  ;;  %v3581_v17 = vld [vmem:[#allocation4 + $0x88] sm:$0xff] }
 0x16d   : > { %1442 = vmatpush.msrb.mxu2 %v2791_v14  ;;  %1626 = vmatpush.msra.mxu3 %v4124_v21  ;;  %v3578_v14 = vld [vmem:[#allocation4 + $0x90] sm:$0xff]  ;;  %v3584_v21 = vld [vmem:[#allocation4 + $0x80] sm:$0xff] }
 0x16e   : > { %1674 = vmatpush.msra.mxu0 %v4125_v27  ;;  %v3594_v27 = vld [vmem:[#allocation4 + $0x1a8] sm:$0xff] }
 0x16f   : > { %1443 = vmatpush.msrb.mxu2 %v2792_v25  ;;  %1627 = vmatpush.msra.mxu3 %v4126_v29  ;;  %v3591_v25 = vld [vmem:[#allocation4 + $0x1b0] sm:$0xff]  ;;  %v3597_v29 = vld [vmem:[#allocation4 + $0x1a0] sm:$0xff] }
 0x170   : > { %1675 = vmatpush.msra.mxu0 %v4127_v33  ;;  %v3603_v33 = vld [vmem:[#allocation4 + $0x190] sm:$0xff] }
 0x171   : > { %1444 = vmatpush.msrb.mxu2 %v2793_v31  ;;  %1628 = vmatpush.msra.mxu3 %v4128_v35  ;;  %v3600_v31 = vld [vmem:[#allocation4 + $0x198] sm:$0xff]  ;;  %v3606_v35 = vld [vmem:[#allocation4 + $0x188] sm:$0xff] }
 0x172   : > { %1676 = vmatpush.msra.mxu0 %v4129_v42  ;;  %v1234_v42 = vrot.slane %v3485_v57, 4  ;;  %v2807_v57 = vld [vmem:[#allocation2 + $0x5f8] sm:$0xff] }
 0x173   : > { %1445 = vmatpush.msrb.mxu2 %v2794_v37  ;;  %1629 = vmatpush.msra.mxu3 %v4130_v45  ;;  %v3609_v37 = vld [vmem:[#allocation4 + $0x180] sm:$0xff] }
 0x174   : > { %1677 = vmatpush.msra.mxu0 %v4131_v49 }
 0x175   : > { %1446 = vmatpush.msrb.mxu2 %v2795_v47  ;;  %1630 = vmatpush.msra.mxu3 %v4132_v51 }
 0x176   : > { %1678 = vmatpush.msra.mxu0 %v4133_v60 }
 0x177   : > { %1447 = vmatpush.msrb.mxu2 %v2796_v55  ;;  %1631 = vmatpush.msra.mxu3 %v4134_v0  ;;  %v2806_v0 = vld [vmem:[#allocation2 + $0x4f8] sm:$0xff] }
 0x178   : > { %1679 = vmatpush.msra.mxu0 %v4135_v24  ;;  %v2809_v24 = vld [vmem:[#allocation2 + $0x5f0] sm:$0xff] }
 0x179   : > { %1448 = vmatpush.msrb.mxu2 %v2797_v9  ;;  %1632 = vmatpush.msra.mxu3 %v4136_v40  ;;  %v2808_v9 = vld [vmem:[#allocation2 + $0x4f0] sm:$0xff]  ;;  %v2810_v40 = vld [vmem:[#allocation2 + $0x4e8] sm:$0xff] }
 0x17a   : > { %1633 = vmatmul.f32.vlgmr.msra.gmra.mxu3 %v3472_v2  ;;  %1680 = vmatpush.msra.mxu0 %v4138_v46  ;;  %v2814_v46 = vld [vmem:[#allocation2 + $0x4d8] sm:$0xff] }
 0x17b   : > { %1715 = vmatpush.msrb.mxu3 %v4137_v23  ;;  %1449 = vmatpush.msrb.mxu2 %v2798_v38  ;;  %v2812_v23 = vld [vmem:[#allocation2 + $0x4e0] sm:$0xff] }
 0x17c   : > { %1681 = vmatpush.msra.mxu0 %v4140_v39  ;;  %v2813_v38 = vld [vmem:[#allocation2 + $0x5e0] sm:$0xff]  ;;  %v2817_v39 = vld [vmem:[#allocation2 + $0x5d0] sm:$0xff] }
 0x17d   : > { %1716 = vmatpush.msrb.mxu3 %v4139_v50  ;;  %1450 = vmatpush.msrb.mxu2 %v2799_v11  ;;  %v2815_v50 = vld [vmem:[#allocation2 + $0x5d8] sm:$0xff]  ;;  %v2816_v11 = vld [vmem:[#allocation2 + $0x4d0] sm:$0xff] }
 0x17e   : > { %1682 = vmatmul.f32.vlgmr.msra.gmra.mxu0 %v3472_v2 }
 0x17f   : > { %1717 = vmatpush.msrb.mxu3 %v4141_v62  ;;  %1451 = vmatpush.msrb.mxu2 %v2800_v5  ;;  %v2818_v62 = vld [vmem:[#allocation2 + $0x4c8] sm:$0xff] }
 0x180   : > { %v2819_v5 = vld [vmem:[#allocation2 + $0x5c8] sm:$0xff] }
 0x181   : > { %1718 = vmatpush.msrb.mxu3 %v4142_v26  ;;  %1452 = vmatpush.msrb.mxu2 %v2801_v30  ;;  %v2820_v26 = vld [vmem:[#allocation2 + $0x4c0] sm:$0xff] }
 0x182   : > { %v2821_v30 = vld [vmem:[#allocation2 + $0x5c0] sm:$0xff] }
 0x183   : > { %1719 = vmatpush.msrb.mxu3 %v4143_v18  ;;  %1453 = vmatpush.msrb.mxu2 %v2802_v22  ;;  %v2822_v18 = vld [vmem:[#allocation2 + $0x4b8] sm:$0xff] }
 0x184   : > { %v2823_v22 = vld [vmem:[#allocation2 + $0x5b8] sm:$0xff] }
 0x185   : > { %1720 = vmatpush.msrb.mxu3 %v4144_v15  ;;  %1454 = vmatpush.msrb.mxu2 %v2803_v16  ;;  %v2824_v15 = vld [vmem:[#allocation2 + $0x4b0] sm:$0xff] }
 0x186   : > { %v2825_v16 = vld [vmem:[#allocation2 + $0x5b0] sm:$0xff] }
 0x187   : > { %1721 = vmatpush.msrb.mxu3 %v4145_v58  ;;  %1455 = vmatpush.msrb.mxu2 %v2804_v19  ;;  %v2826_v58 = vld [vmem:[#allocation2 + $0x4a8] sm:$0xff] }
 0x188   : > { %v2827_v19 = vld [vmem:[#allocation2 + $0x5a8] sm:$0xff] }
 0x189   : > { %1722 = vmatpush.msrb.mxu3 %v4146_v44  ;;  %1456 = vmatpush.msrb.mxu2 %v2805_v3  ;;  %v2828_v44 = vld [vmem:[#allocation2 + $0x4a0] sm:$0xff] }
 0x18a   : > { %v2829_v3 = vld [vmem:[#allocation2 + $0x5a0] sm:$0xff] }
 0x18b   : > { %1723 = vmatpush.msrb.mxu3 %v4147_v28  ;;  %v2830_v28 = vld [vmem:[#allocation2 + $0x498] sm:$0xff] }
 0x18d   : > { %1724 = vmatpush.msrb.mxu3 %v4148_v52  ;;  %v2831_v52 = vld [vmem:[#allocation2 + $0x598] sm:$0xff] }
 0x18f   : > { %1725 = vmatpush.msrb.mxu3 %v4149_v54  ;;  %v2832_v54 = vld [vmem:[#allocation2 + $0x490] sm:$0xff] }
 0x191   : > { %1726 = vmatpush.msrb.mxu3 %v4150_v56  ;;  %v2833_v56 = vld [vmem:[#allocation2 + $0x590] sm:$0xff] }
 0x193   : > { %1727 = vmatpush.msrb.mxu3 %v4151_v59  ;;  %v2834_v59 = vld [vmem:[#allocation2 + $0x488] sm:$0xff] }
 0x195   : > { %1728 = vmatpush.msrb.mxu3 %v4152_v61  ;;  %v2835_v61 = vld [vmem:[#allocation2 + $0x588] sm:$0xff] }
 0x197   : > { %1729 = vmatpush.msrb.mxu3 %v4153_v63  ;;  %v2836_v63 = vld [vmem:[#allocation2 + $0x480] sm:$0xff] }
 0x199   : > { %1730 = vmatpush.msrb.mxu3 %v4154_v4  ;;  %v2837_v4 = vld [vmem:[#allocation2 + $0x580] sm:$0xff] }
 0x19a   : > { %1731 = vmatmul.f32.vlgmr.msrb.gmra.mxu3 %v3472_v2  ;;  %v3587_v2 = vld [vmem:[#allocation4 + $0x1b8] sm:$0xff] }
 0x19b   : > { %1918 = vmatpush.msra.mxu3 %v3562_v1 }
 0x19d   : > { %1919 = vmatpush.msra.mxu3 %v3565_v6 }
 0x19f   : > { %1920 = vmatpush.msra.mxu3 %v3568_v8 }
 0x1a1   : > { %1921 = vmatpush.msra.mxu3 %v3572_v10 }
 0x1a3   : > { %1922 = vmatpush.msra.mxu3 %v3575_v12 }
 0x1a5   : > { %1923 = vmatpush.msra.mxu3 %v3578_v14 }
 0x1a7   : > { %1924 = vmatpush.msra.mxu3 %v3581_v17 }
 0x1a9   : > { %1925 = vmatpush.msra.mxu3 %v3584_v21 }
 0x1ab   : > { %2046 = vmatpush.msrb.mxu3 %v3587_v2 }
 0x1ad   : > { %2047 = vmatpush.msrb.mxu3 %v3591_v25 }
 0x1af   : > { %2048 = vmatpush.msrb.mxu3 %v3594_v27 }
 0x1b1   : > { %2049 = vmatpush.msrb.mxu3 %v3597_v29 }
 0x1b3   : > { %2050 = vmatpush.msrb.mxu3 %v3600_v31 }
 0x1b5   : > { %2051 = vmatpush.msrb.mxu3 %v3603_v33 }
 0x1b7   : > { %2052 = vmatpush.msrb.mxu3 %v3606_v35 }
 0x1b9   : > { %2053 = vmatpush.msrb.mxu3 %v3609_v37 }
 0x1cb   : > { %v1261_v45 = vpop.f32.mrf.mxu2 }
 0x1cc   : > { %v1262_v47 = vadd.f32 %v1261_v45, %v1234_v42  ;;  %v2838_v42 = vld [vmem:[#allocation2 + $0x6f8] sm:$0xff] }
 0x1cd   : > { %v2839_v45 = vld [vmem:[#allocation2 + $0x7f8] sm:$0xff] }
 0x1ce   : > { %v3613_v49 = vmax.f32 %v1262_v47, 0.0  ;;  %v2840_v47 = vld [vmem:[#allocation2 + $0x6f0] sm:$0xff] }
 0x1d0   : > { %2557 = vmatmul.msk.f32.vlgmr.msra.gmra.mxu3 %vm1770_vm2, %v3613_v49 }
 0x1d3   : > { %v1318_v51 = vpop.f32.mrf.mxu2 }
 0x1d4   : > { %v1319_v55 = vadd.f32 %v1318_v51, %v3467_v13  ;;  %v2811_v13 = vld [vmem:[#allocation2 + $0x5e8] sm:$0xff]  ;;  %v2841_v51 = vld [vmem:[#allocation2 + $0x7f0] sm:$0xff] }
 0x1d6   : > { %v3618_v60 = vmax.f32 %v1319_v55, 0.0  ;;  %v2842_v55 = vld [vmem:[#allocation2 + $0x6e8] sm:$0xff] }
 0x1d8   : > { %1359 = vmatmul.f32.vlgmr.msra.gmra.mxu2 %v3618_v60  ;;  %1408 = vmatmul.f32.vlgmr.msrb.gmra.mxu1 %v3618_v60 }
 0x1d9   : > { %1539 = vmatpush.msra.mxu2 %v2806_v0  ;;  %1588 = vmatpush.msrb.mxu1 %v2807_v57  ;;  %v2843_v0 = vld [vmem:[#allocation2 + $0x7e8] sm:$0xff]  ;;  %v2844_v57 = vld [vmem:[#allocation2 + $0x6e0] sm:$0xff] }
 0x1da   : > { %2561 = vmatmul.msk.f32.vlgmr.msrb.gmra.mxu3 %vm1770_vm2, %v3613_v49 }
 0x1db   : > { %1540 = vmatpush.msra.mxu2 %v2808_v9  ;;  %1589 = vmatpush.msrb.mxu1 %v2809_v24  ;;  %v2845_v9 = vld [vmem:[#allocation2 + $0x7e0] sm:$0xff]  ;;  %v2846_v24 = vld [vmem:[#allocation2 + $0x6d8] sm:$0xff] }
 0x1dd   : > { %1541 = vmatpush.msra.mxu2 %v2810_v40  ;;  %1590 = vmatpush.msrb.mxu1 %v2811_v13  ;;  %v2847_v40 = vld [vmem:[#allocation2 + $0x7d8] sm:$0xff]  ;;  %v2848_v13 = vld [vmem:[#allocation2 + $0x6d0] sm:$0xff] }
 0x1df   : > { %1542 = vmatpush.msra.mxu2 %v2812_v23  ;;  %1591 = vmatpush.msrb.mxu1 %v2813_v38  ;;  %v2849_v23 = vld [vmem:[#allocation2 + $0x7d0] sm:$0xff]  ;;  %v2850_v38 = vld [vmem:[#allocation2 + $0x6c8] sm:$0xff] }
 0x1e0   : > { %1457 = vmatmul.f32.vlgmr.msrb.gmra.mxu2 %v3618_v60  ;;  %1506 = vmatmul.f32.vlgmr.msra.gmra.mxu1 %v3618_v60 }
 0x1e1   : > { %1543 = vmatpush.msra.mxu2 %v2814_v46  ;;  %1592 = vmatpush.msrb.mxu1 %v2815_v50  ;;  %v2851_v46 = vld [vmem:[#allocation2 + $0x7c8] sm:$0xff]  ;;  %v2852_v50 = vld [vmem:[#allocation2 + $0x6c0] sm:$0xff] }
 0x1e3   : > { %1544 = vmatpush.msra.mxu2 %v2816_v11  ;;  %1593 = vmatpush.msrb.mxu1 %v2817_v39  ;;  %v2853_v11 = vld [vmem:[#allocation2 + $0x7c0] sm:$0xff]  ;;  %v2854_v39 = vld [vmem:[#allocation2 + $0x6b8] sm:$0xff] }
 0x1e5   : > { %1545 = vmatpush.msra.mxu2 %v2818_v62  ;;  %1594 = vmatpush.msrb.mxu1 %v2819_v5  ;;  %v2855_v62 = vld [vmem:[#allocation2 + $0x7b8] sm:$0xff]  ;;  %v2856_v5 = vld [vmem:[#allocation2 + $0x6b0] sm:$0xff] }
 0x1e7   : > { %1546 = vmatpush.msra.mxu2 %v2820_v26  ;;  %1595 = vmatpush.msrb.mxu1 %v2821_v30  ;;  %v2857_v26 = vld [vmem:[#allocation2 + $0x7b0] sm:$0xff]  ;;  %v2858_v30 = vld [vmem:[#allocation2 + $0x6a8] sm:$0xff] }
 0x1e9   : > { %1547 = vmatpush.msra.mxu2 %v2822_v18  ;;  %1596 = vmatpush.msrb.mxu1 %v2823_v22  ;;  %v2859_v18 = vld [vmem:[#allocation2 + $0x7a8] sm:$0xff]  ;;  %v2860_v22 = vld [vmem:[#allocation2 + $0x6a0] sm:$0xff] }
 0x1eb   : > { %1548 = vmatpush.msra.mxu2 %v2824_v15  ;;  %1597 = vmatpush.msrb.mxu1 %v2825_v16  ;;  %v2861_v15 = vld [vmem:[#allocation2 + $0x7a0] sm:$0xff]  ;;  %v2862_v16 = vld [vmem:[#allocation2 + $0x698] sm:$0xff] }
 0x1ed   : > { %1549 = vmatpush.msra.mxu2 %v2826_v58  ;;  %1598 = vmatpush.msrb.mxu1 %v2827_v19  ;;  %v2863_v58 = vld [vmem:[#allocation2 + $0x798] sm:$0xff]  ;;  %v2864_v19 = vld [vmem:[#allocation2 + $0x690] sm:$0xff] }
 0x1ef   : > { %1550 = vmatpush.msra.mxu2 %v2828_v44  ;;  %1599 = vmatpush.msrb.mxu1 %v2829_v3  ;;  %v2865_v44 = vld [vmem:[#allocation2 + $0x790] sm:$0xff]  ;;  %v2866_v3 = vld [vmem:[#allocation2 + $0x688] sm:$0xff] }
 0x1f1   : > { %1551 = vmatpush.msra.mxu2 %v2830_v28  ;;  %1600 = vmatpush.msrb.mxu1 %v2831_v52  ;;  %v2867_v28 = vld [vmem:[#allocation2 + $0x788] sm:$0xff]  ;;  %v3628_v52 = vld [vmem:[#allocation4 + $0x38] sm:$0xff] }
 0x1f3   : > { %1552 = vmatpush.msra.mxu2 %v2832_v54  ;;  %1601 = vmatpush.msrb.mxu1 %v2833_v56  ;;  %v2868_v54 = vld [vmem:[#allocation2 + $0x680] sm:$0xff] }
 0x1f4   : > { %v2869_v56 = vld [vmem:[#allocation2 + $0x780] sm:$0xff] }
 0x1f5   : > { %1553 = vmatpush.msra.mxu2 %v2834_v59  ;;  %1602 = vmatpush.msrb.mxu1 %v2835_v61  ;;  %v3632_v59 = vld [vmem:[#allocation4 + $0x30] sm:$0xff]  ;;  %v2870_v61 = vld [vmem:[#allocation2 + $0x8f8] sm:$0xff] }
 0x1f7   : > { %1554 = vmatpush.msra.mxu2 %v2836_v63  ;;  %1603 = vmatpush.msrb.mxu1 %v2837_v4  ;;  %v3635_v63 = vld [vmem:[#allocation4 + $0x28] sm:$0xff]  ;;  %v2871_v4 = vld [vmem:[#allocation2 + $0x8f0] sm:$0xff] }
 0x1f8   : > { %1555 = vmatmul.f32.vlgmr.msra.gmra.mxu2 %v3618_v60  ;;  %1604 = vmatmul.f32.vlgmr.msrb.gmra.mxu1 %v3618_v60 }
 0x1f9   : > { %1637 = vmatpush.msrb.mxu2 %v2838_v42  ;;  %1686 = vmatpush.msra.mxu1 %v2839_v45  ;;  %v3638_v42 = vld [vmem:[#allocation4 + $0x20] sm:$0xff] }
 0x1fa   : > { %v4155_v45 = vld [vmem:[#allocation28_spill] sm:$0xff] }
 0x1fb   : > { %1638 = vmatpush.msrb.mxu2 %v2840_v47  ;;  %1687 = vmatpush.msra.mxu1 %v2841_v51  ;;  %v3642_v47 = vld [vmem:[#allocation4 + $0x18] sm:$0xff]  ;;  %v4156_v51 = vld [vmem:[#allocation30_spill] sm:$0xff] }
 0x1fd   : > { %1639 = vmatpush.msrb.mxu2 %v2842_v55  ;;  %1688 = vmatpush.msra.mxu1 %v2843_v0  ;;  %v3646_v55 = vld [vmem:[#allocation4 + $0x10] sm:$0xff]  ;;  %v4157_v0 = vld [vmem:[#allocation32_spill] sm:$0xff] }
 0x1ff   : > { %1640 = vmatpush.msrb.mxu2 %v2844_v57  ;;  %1689 = vmatpush.msra.mxu1 %v2845_v9  ;;  %v3650_v57 = vld [vmem:[#allocation4 + $0x8] sm:$0xff] }
 0x200   : > { %v4158_v9 = vld [vmem:[#allocation34_spill] sm:$0xff] }
 0x201   : > { %1641 = vmatpush.msrb.mxu2 %v2846_v24  ;;  %1690 = vmatpush.msra.mxu1 %v2847_v40  ;;  %v3654_v24 = vld [vmem:[#allocation4] sm:$0xff] }
 0x202   : > { %v4159_v40 = vld [vmem:[#allocation36_spill] sm:$0xff] }
 0x203   : > { %1642 = vmatpush.msrb.mxu2 %v2848_v13  ;;  %1691 = vmatpush.msra.mxu1 %v2849_v23  ;;  %v3658_v13 = vld [vmem:[#allocation4 + $0xf8] sm:$0xff]  ;;  %v4160_v23 = vld [vmem:[#allocation38_spill] sm:$0xff] }
 0x205   : > { %1643 = vmatpush.msrb.mxu2 %v2850_v38  ;;  %1692 = vmatpush.msra.mxu1 %v2851_v46  ;;  %v3664_v38 = vld [vmem:[#allocation4 + $0xf0] sm:$0xff]  ;;  %v4161_v46 = vld [vmem:[#allocation40_spill] sm:$0xff] }
 0x207   : > { %1644 = vmatpush.msrb.mxu2 %v2852_v50  ;;  %1693 = vmatpush.msra.mxu1 %v2853_v11  ;;  %v3668_v50 = vld [vmem:[#allocation4 + $0xe8] sm:$0xff] }
 0x208   : > { %v4162_v11 = vld [vmem:[#allocation42_spill] sm:$0xff] }
 0x209   : > { %1645 = vmatpush.msrb.mxu2 %v2854_v39  ;;  %1694 = vmatpush.msra.mxu1 %v2855_v62  ;;  %v3672_v39 = vld [vmem:[#allocation4 + $0xe0] sm:$0xff] }
 0x20a   : > { %v4163_v62 = vld [vmem:[#allocation44_spill] sm:$0xff] }
 0x20b   : > { %1646 = vmatpush.msrb.mxu2 %v2856_v5  ;;  %1695 = vmatpush.msra.mxu1 %v2857_v26  ;;  %v3676_v5 = vld [vmem:[#allocation4 + $0xd8] sm:$0xff]  ;;  %v4164_v26 = vld [vmem:[#allocation46_spill] sm:$0xff] }
 0x20d   : > { %1647 = vmatpush.msrb.mxu2 %v2858_v30  ;;  %1696 = vmatpush.msra.mxu1 %v2859_v18  ;;  %v3680_v30 = vld [vmem:[#allocation4 + $0xd0] sm:$0xff]  ;;  %v4165_v18 = vld [vmem:[#allocation48_spill] sm:$0xff] }
 0x20f   : > { %1648 = vmatpush.msrb.mxu2 %v2860_v22  ;;  %1697 = vmatpush.msra.mxu1 %v2861_v15  ;;  %v3684_v22 = vld [vmem:[#allocation4 + $0xc8] sm:$0xff] }
 0x210   : > { %v4166_v15 = vld [vmem:[#allocation50_spill] sm:$0xff] }
 0x211   : > { %1649 = vmatpush.msrb.mxu2 %v2862_v16  ;;  %1698 = vmatpush.msra.mxu1 %v2863_v58  ;;  %v3688_v16 = vld [vmem:[#allocation4 + $0xc0] sm:$0xff] }
 0x212   : > { %v4167_v58 = vld [vmem:[#allocation52_spill] sm:$0xff] }
 0x213   : > { %1650 = vmatpush.msrb.mxu2 %v2864_v19  ;;  %1699 = vmatpush.msra.mxu1 %v2865_v44  ;;  %v3692_v19 = vld [vmem:[#allocation4 + $0x1f8] sm:$0xff] }
 0x214   : > { %v3694_v44 = vld [vmem:[#allocation4 + $0x138] sm:$0xff] }
 0x215   : > { %1651 = vmatpush.msrb.mxu2 %v2866_v3  ;;  %1700 = vmatpush.msra.mxu1 %v2867_v28  ;;  %v4168_v3 = vld [vmem:[#allocation54_spill] sm:$0xff] }
 0x216   : > { %v3701_v28 = vld [vmem:[#allocation4 + $0x1f0] sm:$0xff] }
 0x217   : > { %1652 = vmatpush.msrb.mxu2 %v2868_v54  ;;  %1701 = vmatpush.msra.mxu1 %v2869_v56  ;;  %v3703_v54 = vld [vmem:[#allocation4 + $0x130] sm:$0xff]  ;;  %v3707_v56 = vld [vmem:[#allocation4 + $0x1e8] sm:$0xff] }
 0x218   : > { %1653 = vmatmul.f32.vlgmr.msrb.gmra.mxu2 %v3618_v60  ;;  %1702 = vmatmul.f32.vlgmr.msra.gmra.mxu1 %v3618_v60 }
 0x219   : > { %1735 = vmatpush.msra.mxu2 %v2870_v61  ;;  %1855 = vmatpush.msrb.mxu1 %v3628_v52  ;;  %v3709_v61 = vld [vmem:[#allocation4 + $0x128] sm:$0xff] }
 0x21b   : > { %1736 = vmatpush.msra.mxu2 %v2871_v4  ;;  %1856 = vmatpush.msrb.mxu1 %v3632_v59  ;;  %v3713_v4 = vld [vmem:[#allocation4 + $0x1e0] sm:$0xff] }
 0x21d   : > { %1737 = vmatpush.msra.mxu2 %v4155_v45  ;;  %1857 = vmatpush.msrb.mxu1 %v3635_v63  ;;  %v3715_v45 = vld [vmem:[#allocation4 + $0x120] sm:$0xff] }
 0x21f   : > { %1738 = vmatpush.msra.mxu2 %v4156_v51  ;;  %1858 = vmatpush.msrb.mxu1 %v3638_v42  ;;  %v3721_v51 = vld [vmem:[#allocation4 + $0x118] sm:$0xff] }
 0x221   : > { %1739 = vmatpush.msra.mxu2 %v4157_v0  ;;  %1859 = vmatpush.msrb.mxu1 %v3642_v47  ;;  %v3725_v0 = vld [vmem:[#allocation4 + $0x1d0] sm:$0xff] }
 0x223   : > { %1740 = vmatpush.msra.mxu2 %v4158_v9  ;;  %1860 = vmatpush.msrb.mxu1 %v3646_v55  ;;  %v3727_v9 = vld [vmem:[#allocation4 + $0x110] sm:$0xff] }
 0x225   : > { %1741 = vmatpush.msra.mxu2 %v4159_v40  ;;  %1861 = vmatpush.msrb.mxu1 %v3650_v57  ;;  %v3731_v40 = vld [vmem:[#allocation4 + $0x1c8] sm:$0xff] }
 0x227   : > { %1742 = vmatpush.msra.mxu2 %v4160_v23  ;;  %1862 = vmatpush.msrb.mxu1 %v3654_v24  ;;  %v3733_v23 = vld [vmem:[#allocation4 + $0x108] sm:$0xff] }
 0x228   : > { %2555 = vmatmul.msk.f32.vlgmr.msrb.gmra.mxu1 %vm1770_vm2, %v3613_v49 }
 0x229   : > { %1950 = vmatpush.msra.mxu1 %v3658_v13  ;;  %1743 = vmatpush.msra.mxu2 %v4161_v46  ;;  %v3737_v46 = vld [vmem:[#allocation4 + $0x1c0] sm:$0xff] }
 0x22b   : > { %1951 = vmatpush.msra.mxu1 %v3664_v38  ;;  %1744 = vmatpush.msra.mxu2 %v4162_v11  ;;  %v3739_v11 = vld [vmem:[#allocation4 + $0x100] sm:$0xff] }
 0x22d   : > { %1952 = vmatpush.msra.mxu1 %v3668_v50  ;;  %1745 = vmatpush.msra.mxu2 %v4163_v62  ;;  %v3743_v62 = vld [vmem:[#allocation4 + $0x238] sm:$0xff] }
 0x22e   : > { %4169 = vst [vmem:[#allocation9_spill] sm:$0xff] %v3743_v62 }
 0x22f   : > { %1953 = vmatpush.msra.mxu1 %v3672_v39  ;;  %1746 = vmatpush.msra.mxu2 %v4164_v26  ;;  %v3751_v26 = vld [vmem:[#allocation4 + $0x230] sm:$0xff] }
 0x231   : > { %1954 = vmatpush.msra.mxu1 %v3676_v5  ;;  %1747 = vmatpush.msra.mxu2 %v4165_v18  ;;  %v466_v18 = vld [vmem:[%s3987_s4 + $0x10] sm:$0xff] }
 0x232   : > { %1766 = vperm.xlu2 %2650, %v466_v18   ;;  %v3774_v18 = vld [vmem:[#allocation4 + $0x208] sm:$0xff] }
 0x233   : > { %1955 = vmatpush.msra.mxu1 %v3680_v30  ;;  %1748 = vmatpush.msra.mxu2 %v4166_v15  ;;  %v3757_v15 = vld [vmem:[#allocation4 + $0x228] sm:$0xff]  ;;  %4174 = vst [vmem:[#allocation12_spill] sm:$0xff] %v3774_v18 }
 0x235   : > { %1956 = vmatpush.msra.mxu1 %v3684_v22  ;;  %1749 = vmatpush.msra.mxu2 %v4167_v58  ;;  %v3761_v58 = vld [vmem:[#allocation4 + $0x220] sm:$0xff] }
 0x236   : > { %4170 = vst [vmem:[#allocation11_spill] sm:$0xff] %v3761_v58 }
 0x237   : > { %1957 = vmatpush.msra.mxu1 %v3688_v16  ;;  %1750 = vmatpush.msra.mxu2 %v4168_v3  ;;  %v3765_v3 = vld [vmem:[#allocation4 + $0x218] sm:$0xff] }
 0x238   : > { %2558 = vmatmul.msk.f32.vlgmr.msra.gmra.mxu1 %vm1770_vm2, %v3613_v49  ;;  %1751 = vmatmul.f32.vlgmr.msra.gmra.mxu2 %v3618_v60  ;;  %v3719_v60 = vld [vmem:[#allocation4 + $0x1d8] sm:$0xff]  ;;  %4171 = vst [vmem:[#allocation10_spill] sm:$0xff] %v3765_v3 }
 0x239   : > { %2078 = vmatpush.msrb.mxu1 %v3692_v19  ;;  %1982 = vmatpush.msrb.mxu2 %v3694_v44 }
 0x23b   : > { %2079 = vmatpush.msrb.mxu1 %v3701_v28  ;;  %1983 = vmatpush.msrb.mxu2 %v3703_v54 }
 0x23d   : > { %2080 = vmatpush.msrb.mxu1 %v3707_v56  ;;  %1984 = vmatpush.msrb.mxu2 %v3709_v61 }
 0x23f   : > { %2081 = vmatpush.msrb.mxu1 %v3713_v4  ;;  %1985 = vmatpush.msrb.mxu2 %v3715_v45 }
 0x241   : > { %2082 = vmatpush.msrb.mxu1 %v3719_v60  ;;  %1986 = vmatpush.msrb.mxu2 %v3721_v51 }
 0x243   : > { %2083 = vmatpush.msrb.mxu1 %v3725_v0  ;;  %1987 = vmatpush.msrb.mxu2 %v3727_v9 }
 0x245   : > { %2084 = vmatpush.msrb.mxu1 %v3731_v40  ;;  %1988 = vmatpush.msrb.mxu2 %v3733_v23 }
 0x247   : > { %2085 = vmatpush.msrb.mxu1 %v3737_v46  ;;  %1989 = vmatpush.msrb.mxu2 %v3739_v11 }
 0x248   : > { %2562 = vmatmul.msk.f32.vlgmr.msrb.gmra.mxu1 %vm1770_vm2, %v3613_v49  ;;  %2559 = vmatmul.msk.f32.vlgmr.msrb.gmra.mxu2 %vm1770_vm2, %v3613_v49 }
 0x249   : > { %2110 = vmatpush.msra.mxu2 %v3743_v62  ;;  %2196 = vmatpush.msra.mxu1 %v3562_v1  ;;  %v3769_v62 = vld [vmem:[#allocation4 + $0x210] sm:$0xff]  ;;  %v4173_v1 = vmov 2  }
 0x24a   : > { %4172 = vst [vmem:[#allocation13_spill] sm:$0xff] %v3769_v62  ;;  %2653 = vset.pattern.permute.xlu2 %v4173_v1  ;;  %v3786_v1 = vpop.permute.xlu2 %1413 }
 0x24b   : > { %2111 = vmatpush.msra.mxu2 %v3751_v26  ;;  %2197 = vmatpush.msra.mxu1 %v3565_v6  ;;  %v3778_v6 = vld [vmem:[#allocation4 + $0x200] sm:$0xff] }
 0x24c   : > { %4175 = vst [vmem:[#allocation15_spill] sm:$0xff] %v3778_v6 }
 0x24d   : > { %2112 = vmatpush.msra.mxu2 %v3757_v15  ;;  %2198 = vmatpush.msra.mxu1 %v3568_v8  ;;  %v3783_v8 = vpop.permute.xlu1 %1365 }
 0x24f   : > { %2113 = vmatpush.msra.mxu2 %v3761_v58  ;;  %2199 = vmatpush.msra.mxu1 %v3572_v10 }
 0x251   : > { %2114 = vmatpush.msra.mxu2 %v3765_v3  ;;  %2200 = vmatpush.msra.mxu1 %v3575_v12  ;;  %v1340_v3 = vpop.f32.mrf.mxu3  ;;  %v1367_v12 = vrot.slane %v3451_v43, 4 }
 0x253   : > { %2115 = vmatpush.msra.mxu2 %v3769_v62  ;;  %2201 = vmatpush.msra.mxu1 %v3578_v14  ;;  %v1415_v14 = vrot.slane %v3457_v7, 4  ;;  %v1389_v62 = vpop.f32.mrf.mxu0 }
 0x255   : > { %2116 = vmatpush.msra.mxu2 %v3774_v18  ;;  %2202 = vmatpush.msra.mxu1 %v3581_v17  ;;  %v1409_v10 = vpop.f32.mrf.mxu1  ;;  %v1416_v18 = vrot.slane %v3786_v1, 4  ;;  %v1368_v17 = vrot.slane %v3783_v8, 4 }
 0x257   : > { %2117 = vmatpush.msra.mxu2 %v3778_v6  ;;  %2203 = vmatpush.msra.mxu1 %v3584_v21  ;;  %v1410_v6 = vadd.f32 %v1409_v10, %v1389_v62  ;;  %v1417_v43 = vsel %vm1240_vm0, %v1415_v14, %v1416_v18  ;;  %v1369_v7 = vsel %vm1240_vm0, %v1367_v12, %v1368_v17 }
 0x258   : > { %2563 = vmatmul.msk.f32.vlgmr.msra.gmra.mxu2 %vm1770_vm2, %v3613_v49 }
 0x259   : > { %2222 = vmatpush.msrb.mxu2 %v3658_v13  ;;  %2300 = vmatpush.msrb.mxu1 %v3587_v2  ;;  %v3807_v2 = vpop.permute.xlu0 %1462  ;;  %v1419_v13 = vmul.f32 %v1417_v43, %v1410_v6  ;;  %v1513_v6 = vrot.slane %v3463_v34, 4 }
 0x25b   : > { %v1360_v58 = vpop.f32.mrf.mxu2  ;;  %2223 = vmatpush.msrb.mxu2 %v3664_v38  ;;  %2301 = vmatpush.msrb.mxu1 %v3591_v25  ;;  %v1464_v38 = vrot.slane %v3455_v53, 4 }
 0x25c   : > { %v1361_v21 = vadd.f32 %v1360_v58, %v1340_v3  ;;  %v1465_v58 = vrot.slane %v3807_v2, 4 }
 0x25d   : > { %2224 = vmatpush.msrb.mxu2 %v3668_v50  ;;  %2302 = vmatpush.msrb.mxu1 %v3594_v27  ;;  %v1507_v3 = vpop.f32.mrf.mxu1  ;;  %v3815_v50 = vpop.permute.xlu1 %1511 }
 0x25e   : > { %v1371_v62 = vmul.f32 %v1369_v7, %v1361_v21  ;;  %v1438_v27 = vpop.f32.mrf.mxu3  ;;  %v1514_v10 = vrot.slane %v3815_v50, 4 }
 0x25f   : > { %2225 = vmatpush.msrb.mxu2 %v3672_v39  ;;  %2303 = vmatpush.msrb.mxu1 %v3597_v29  ;;  %v1487_v39 = vpop.f32.mrf.mxu0 }
 0x260   : > { %v1420_v25 = vadd.f32 %v1419_v13, %v1371_v62  ;;  %v1508_v53 = vadd.f32 %v1507_v3, %v1487_v39  ;;  %v1515_v34 = vsel %vm1240_vm0, %v1513_v6, %v1514_v10  ;;  %v1709_v39 = vrot.slane %v3459_v32, 4 }
 0x261   : > { %2226 = vmatpush.msrb.mxu2 %v3676_v5  ;;  %2304 = vmatpush.msrb.mxu1 %v3600_v31  ;;  %v1466_v5 = vsel %vm1240_vm0, %v1464_v38, %v1465_v58  ;;  %v1660_v38 = vrot.slane %v3474_v48, 4  ;;  %v1758_v32 = vrot.slane %v3480_v20, 4  ;;  %v1775_v20 = vld [vmem:[%s3993_s10] sm:$0xff] }
 0x263   : > { %v1458_v12 = vpop.f32.mrf.mxu2  ;;  %2227 = vmatpush.msrb.mxu2 %v3680_v30  ;;  %2305 = vmatpush.msrb.mxu1 %v3603_v33  ;;  %v1517_v33 = vmul.f32 %v1515_v34, %v1508_v53 }
 0x264   : > { %v1459_v29 = vadd.f32 %v1458_v12, %v1438_v27 }
 0x265   : > { %2228 = vmatpush.msrb.mxu2 %v3684_v22  ;;  %2306 = vmatpush.msrb.mxu1 %v3606_v35  ;;  %v3838_v35 = vpop.permute.xlu2 %1560  ;;  %v1562_v22 = vrot.slane %v3449_v41, 4 }
 0x266   : > { %v1468_v31 = vmul.f32 %v1466_v5, %v1459_v29 }
 0x267   : > { %2229 = vmatpush.msrb.mxu2 %v3688_v16  ;;  %2307 = vmatpush.msrb.mxu1 %v3609_v37  ;;  %v3841_v37 = vpop.permute.xlu1 %1609  ;;  %v1563_v16 = vrot.slane %v3838_v35, 4 }
 0x268   : > { %v1469_v30 = vadd.f32 %v1468_v31, %v1420_v25 }
 0x269   : > { %2326 = vmatpush.msra.mxu2 %v3692_v19 }
 0x26a   : > { %v1518_v14 = vadd.f32 %v1517_v33, %v1469_v30 }
 0x26b   : > { %2327 = vmatpush.msra.mxu2 %v3701_v28  ;;  %v1536_v28 = vpop.f32.mrf.mxu3 }
 0x26d   : > { %2328 = vmatpush.msra.mxu2 %v3707_v56  ;;  %v1611_v56 = vrot.slane %v3453_v36, 4  ;;  %v3853_v25 = vpop.permute.xlu2 %1658  ;;  %v3855_v36 = vpop.permute.xlu0 %1707 }
 0x26e   : > { %v1661_v3 = vrot.slane %v3853_v25, 4  ;;  %v1710_v12 = vrot.slane %v3855_v36, 4 }
 0x26f   : > { %2329 = vmatpush.msra.mxu2 %v3713_v4  ;;  %v1612_v4 = vrot.slane %v3841_v37, 4 }
 0x270   : > { %v1662_v34 = vsel %vm1240_vm0, %v1660_v38, %v1661_v3  ;;  %v1711_v48 = vsel %vm1240_vm0, %v1709_v39, %v1710_v12 }
 0x271   : > { %2330 = vmatpush.msra.mxu2 %v3719_v60  ;;  %v1585_v60 = vpop.f32.mrf.mxu0  ;;  %v1613_v41 = vsel %vm1240_vm0, %v1611_v56, %v1612_v4 }
 0x273   : > { %2331 = vmatpush.msra.mxu2 %v3725_v0  ;;  %v1634_v6 = vpop.f32.mrf.mxu3 }
 0x275   : > { %2332 = vmatpush.msra.mxu2 %v3731_v40  ;;  %v1605_v19 = vpop.f32.mrf.mxu1 }
 0x276   : > { %v1606_v21 = vadd.f32 %v1605_v19, %v1585_v60  ;;  %v3867_v19 = vpop.permute.xlu1 %1756 }
 0x277   : > { %2333 = vmatpush.msra.mxu2 %v3737_v46  ;;  %v1564_v46 = vsel %vm1240_vm0, %v1562_v22, %v1563_v16 }
 0x278   : > { %v1615_v7 = vmul.f32 %v1613_v41, %v1606_v21 }
 0x279   : > { %v1683_v53 = vpop.f32.mrf.mxu0 }
 0x27b   : > { %v1556_v0 = vpop.f32.mrf.mxu2  ;;  %v1732_v56 = vpop.f32.mrf.mxu3 }
 0x27c   : > { %v1557_v40 = vadd.f32 %v1556_v0, %v1536_v28  ;;  %v1759_v28 = vrot.slane %v3867_v19, 4 }
 0x27e   : > { %v1566_v43 = vmul.f32 %v1564_v46, %v1557_v40  ;;  %v1760_v21 = vsel %vm1240_vm0, %v1758_v32, %v1759_v28 }
 0x280   : > { %v1567_v13 = vadd.f32 %v1566_v43, %v1518_v14 }
 0x282   : > { %v1616_v62 = vadd.f32 %v1615_v7, %v1567_v13 }
 0x28c   : > { %v1767_v46 = vpop.permute.xlu2 %1766 }
 0x295   : > { %v1703_v27 = vpop.f32.mrf.mxu1 }
 0x296   : > { %v1704_v5 = vadd.f32 %v1703_v27, %v1683_v53 }
 0x298   : > { %v1713_v30 = vmul.f32 %v1711_v48, %v1704_v5 }
 0x29b   : > { %v1654_v29 = vpop.f32.mrf.mxu2 }
 0x29c   : > { %v1655_v31 = vadd.f32 %v1654_v29, %v1634_v6 }
 0x29e   : > { %v1664_v33 = vmul.f32 %v1662_v34, %v1655_v31  ;;  %v1785_v31 = vld [vmem:[#allocation6] sm:$0x1] }
 0x2a0   : > { %v1665_v14 = vadd.f32 %v1664_v33, %v1616_v62 }
 0x2a2   : > { %v1714_v22 = vadd.f32 %v1713_v30, %v1665_v14  ;;  %v1788_v30 = vld [vmem:[%s3994_s11] sm:$0xff] }
 0x2bb   : > { %v1752_v60 = vpop.f32.mrf.mxu2 }
 0x2bc   : > { %v1753_v0 = vadd.f32 %v1752_v60, %v1732_v56  ;;  %v463_v56 = vld [vmem:[%s3986_s3 + $0x10] sm:$0xf]  ;;  %v4176_v60 = vmov 6  }
 0x2be   : > { %v1762_v40 = vmul.f32 %v1760_v21, %v1753_v0  ;;  %v4177_v0 = vmov 5   ;;  %v467_v21 = vld [vmem:[%s3987_s4 + $0x18] sm:$0xff] }
 0x2c0   : > { %v1763_v43 = vadd.f32 %v1762_v40, %v1714_v22 }
 0x2c2   : > { %v3874_v41 = vadd.f32 %v1767_v46, %v1763_v43 }
 0x2c4   : > { %v1771_v7 = vsel %vm1770_vm2, %v3874_v41, 0.0 }
 0x2c5   : > { %1772 = vadd.xlane.f32.xlu1 %v1771_v7 }
 0x2de   : > { %2235 = vperm.xlu1 %2654, %v463_v56  }
 0x2e6   : > { %2657 = vset.pattern.permute.xlu1 %v4176_v60  ;;  %v2002_v60 = vld [vmem:[#allocation4 + $0x160] sm:$0xff] }
 0x2e7   : > { %2313 = vperm.xlu1 %2657, %v463_v56  }
 0x338   : > { %v1773_v13 = vpop.xlane.xlu1 %1772 }
 0x339   : > { %v1774_v62 = vmul.f32 0.015625, %v1773_v13  ;;  %v4179_v13 = vmov 8  }
 0x33b   : > { %v1776_v38 = vmul.f32 %v1775_v20, %v1774_v62  ;;  %v4178_v20 = vmov 0  }
 0x33c   : > { %2660 = vset.pattern.permute.xlu1 %v4178_v20 }
 0x33d   : > { %v1778_v27 = vsel %vm1777_vm3, %v1776_v38, 0.0 }
 0x33e   : > { %v1779_v6 = vrot.slane %v1778_v27, 4 }
 0x340   : > { %v1780_v39 = vadd.f32 %v1779_v6, %v1778_v27  ;;  %v468_v27 = vld [vmem:[%s3987_s4 + $0x20] sm:$0xff]  ;;  %v4180_v6 = vmov 1  }
 0x342   : > { %v1781_v53 = vrot.slane %v1780_v39, 2 }
 0x344   : > { %v1782_v29 = vadd.f32 %v1781_v53, %v1780_v39  ;;  %v4181_v39 = vmov 4   ;;  %v4182_v53 = vmov 7  }
 0x346   : > { %v1783_v5 = vrot.slane %v1782_v29, 1 }
 0x348   : > { %v1784_v34 = vadd.f32 %v1783_v5, %v1782_v29  ;;  %v1877_v29 = vld [vmem:[#allocation4 + $0x78] sm:$0xff]  ;;  %v1876_v5 = vld [vmem:[#allocation4 + $0x70] sm:$0xff] }
 0x349   : > { %2170 = vmatpush.msra.mxu3 %v1877_v29 }
 0x34a   : > { %v1786_v33 = vadd.f32 %v1785_v31, %v1784_v34  ;;  %v1875_v31 = vld [vmem:[#allocation4 + $0x68] sm:$0xff]  ;;  %v1874_v34 = vld [vmem:[#allocation4 + $0x60] sm:$0xff] }
 0x34b   : > { %2171 = vmatpush.msra.mxu3 %v1876_v5 }
 0x34c   : > { %v1787_v48 = vmax.f32 %v1786_v33, 0.0  ;;  %v1873_v33 = vld [vmem:[#allocation4 + $0x58] sm:$0xff] }
 0x34d   : > { %2172 = vmatpush.msra.mxu3 %v1875_v31 }
 0x34e   : > { %v1789_v14 = vperm.slane %v1787_v48, 0  ;;  %v1872_v48 = vld [vmem:[#allocation4 + $0x50] sm:$0xff] }
 0x34f   : > { %2173 = vmatpush.msra.mxu3 %v1874_v34 }
 0x350   : > { %v1790_v22 = vmul.f32 %v1789_v14, %v1788_v30  ;;  %v1871_v30 = vld [vmem:[#allocation4 + $0x48] sm:$0xff]  ;;  %v1870_v14 = vld [vmem:[#allocation4 + $0x40] sm:$0xff] }
 0x351   : > { %2174 = vmatpush.msra.mxu3 %v1873_v33 }
 0x352   : > { %v1791_v32 = vsel %vm1777_vm3, %v1790_v22, 0.0  ;;  %v2005_v22 = vld [vmem:[#allocation4 + $0x178] sm:$0xff] }
 0x353   : > { %1792 = vadd.xlane.f32.xlu2 %v1791_v32  ;;  %2175 = vmatpush.msra.mxu3 %v1872_v48  ;;  %v2004_v32 = vld [vmem:[#allocation4 + $0x170] sm:$0xff] }
 0x355   : > { %2176 = vmatpush.msra.mxu3 %v1871_v30 }
 0x357   : > { %2177 = vmatpush.msra.mxu3 %v1870_v14 }
 0x359   : > { %2274 = vmatpush.msrb.mxu3 %v2005_v22 }
 0x35b   : > { %2275 = vmatpush.msrb.mxu3 %v2004_v32 }
 0x36b   : > { %2209 = vperm.xlu2 %2653, %v463_v56  }
 0x373   : > { %2656 = vset.pattern.permute.xlu2 %v4177_v0  ;;  %v2001_v0 = vld [vmem:[#allocation4 + $0x158] sm:$0xff] }
 0x374   : > { %2287 = vperm.xlu2 %2656, %v463_v56  }
 0x37c   : > { %2659 = vset.pattern.permute.xlu2 %v4179_v13 }
 0x37d   : > { %2365 = vperm.xlu2 %2659, %v463_v56  }
 0x3c6   : > { %v1793_v40 = vpop.xlane.xlu2 %1792 }
 0x3c7   : > { %v1794_v46 = vadd.f32 %v1793_v40, %v467_v21  ;;  %v2000_v21 = vld [vmem:[#allocation4 + $0x150] sm:$0xff] }
 0x3c9   : > { %v1795_v43 = vadd.f32 3.0, %v1794_v46  ;;  %v1999_v46 = vld [vmem:[#allocation4 + $0x148] sm:$0xff] }
 0x3cb   : > { %v1796_v7 = vmax.f32 %v1795_v43, 0.0 }
 0x3cd   : > { %v1797_v62 = vmin.f32 %v1796_v7, 6.0  ;;  %v1805_v7 = vld [vmem:[%s3991_s8] sm:$0xf] }
 0x3cf   : > { %v1798_v38 = vmul.f32 0.16666667, %v1797_v62 }
 0x3d1   : > { %1801 = vperm.xlu0 %2651, %v1798_v38  }
 0x3d9   : > { %1808 = vperm.xlu0 %2651, %v468_v27  }
 0x3e1   : > { %2158 = vperm.xlu0 %2651, %v463_v56  }
 0x3e9   : > { %2652 = vset.pattern.permute.xlu0 %v4180_v6 }
 0x3ea   : > { %2183 = vperm.xlu0 %2652, %v463_v56  }
 0x3f2   : > { %2655 = vset.pattern.permute.xlu0 %v4181_v39 }
 0x3f3   : > { %2261 = vperm.xlu0 %2655, %v463_v56  }
 0x3fb   : > { %2658 = vset.pattern.permute.xlu0 %v4182_v53 }
 0x3fc   : > { %2339 = vperm.xlu0 %2658, %v463_v56   ;;  %v2003_v56 = vld [vmem:[#allocation4 + $0x168] sm:$0xff] }
 0x3fd   : > { %2276 = vmatpush.msrb.mxu3 %v2003_v56 }
 0x3ff   : > { %2277 = vmatpush.msrb.mxu3 %v2002_v60 }
 0x401   : > { %2278 = vmatpush.msrb.mxu3 %v2001_v0 }
 0x403   : > { %2279 = vmatpush.msrb.mxu3 %v2000_v21 }
 0x404   : > { %2661 = vset.pattern.permute.xlu0 %v4178_v20  ;;  %v1998_v20 = vld [vmem:[#allocation4 + $0x140] sm:$0xff] }
 0x405   : > { %2280 = vmatpush.msrb.mxu3 %v1999_v46 }
 0x407   : > { %2281 = vmatpush.msrb.mxu3 %v1998_v20 }
 0x443   : > { %v1802_v40 = vpop.permute.xlu0 %1801 }
 0x444   : > { %v1804_v43 = vmul.f32 %v1802_v40, %v3874_v41  ;;  %v1991_v41 = vpop.f32.mrf.mxu2 }
 0x445   : > { %v1995_v62 = vmul.f32 %v1991_v41, %v1563_v16 }
 0x446   : > { %1830 = vmatpush.msrb.mxu0 %v1804_v43 }
 0x447   : > { %2554 = vmatmul.msk.f32.vlgmr.msrb.gmra.mxu0 %vm1811_vm4, %v1805_v7 }
 0x448   : > { %1886 = vmatpush.msra.mxu0 %v1877_v29 }
 0x44a   : > { %1887 = vmatpush.msra.mxu0 %v1876_v5 }
 0x44c   : > { %1888 = vmatpush.msra.mxu0 %v1875_v31  ;;  %v2119_v29 = vpop.f32.mrf.mxu2 }
 0x44d   : > { %v2123_v35 = vmul.f32 %v2119_v29, %v1759_v28 }
 0x44e   : > { %1889 = vmatpush.msra.mxu0 %v1874_v34 }
 0x450   : > { %1890 = vmatpush.msra.mxu0 %v1873_v33 }
 0x452   : > { %1891 = vmatpush.msra.mxu0 %v1872_v48 }
 0x454   : > { %1892 = vmatpush.msra.mxu0 %v1871_v30 }
 0x456   : > { %1893 = vmatpush.msra.mxu0 %v1870_v14  ;;  %v2236_v14 = vpop.permute.xlu1 %2235 }
 0x457   : > { %2556 = vmatmul.msk.f32.vlgmr.msra.gmra.mxu0 %vm1770_vm2, %v3613_v49 }
 0x458   : > { %2014 = vmatpush.msrb.mxu0 %v2005_v22 }
 0x45a   : > { %2015 = vmatpush.msrb.mxu0 %v2004_v32 }
 0x45c   : > { %2016 = vmatpush.msrb.mxu0 %v2003_v56 }
 0x45e   : > { %2017 = vmatpush.msrb.mxu0 %v2002_v60 }
 0x460   : > { %2018 = vmatpush.msrb.mxu0 %v2001_v0 }
 0x462   : > { %2019 = vmatpush.msrb.mxu0 %v2000_v21 }
 0x464   : > { %2020 = vmatpush.msrb.mxu0 %v1999_v46 }
 0x466   : > { %2021 = vmatpush.msrb.mxu0 %v1998_v20 }
 0x467   : > { %2560 = vmatmul.msk.f32.vlgmr.msrb.gmra.mxu0 %vm1770_vm2, %v3613_v49  ;;  %v1809_v49 = vpop.permute.xlu0 %1808 }
 0x468   : > { %2144 = vmatpush.msra.mxu0 %v3628_v52  ;;  %v2125_v5 = vrot.slane %v1809_v49, 4 }
 0x46a   : > { %2145 = vmatpush.msra.mxu0 %v3632_v59 }
 0x46c   : > { %2146 = vmatpush.msra.mxu0 %v3635_v63  ;;  %v469_v63 = vld [vmem:[%s3987_s4 + $0x28] sm:$0xff] }
 0x46d   : > { %2372 = vperm.xlu1 %2660, %v469_v63  }
 0x46e   : > { %2147 = vmatpush.msra.mxu0 %v3638_v42 }
 0x46f   : > { %v2159_v25 = vpop.permute.xlu0 %2158 }
 0x470   : > { %2148 = vmatpush.msra.mxu0 %v3642_v47  ;;  %v4183_v47 = vld [vmem:[#allocation9_spill] sm:$0xff] }
 0x472   : > { %2149 = vmatpush.msra.mxu0 %v3646_v55  ;;  %v470_v55 = vld [vmem:[%s3987_s4 + $0x30] sm:$0xf] }
 0x474   : > { %2150 = vmatpush.msra.mxu0 %v3650_v57  ;;  %v4184_v57 = vld [vmem:[#allocation11_spill] sm:$0xff] }
 0x475   : > { %2437 = vperm.xlu1 %2660, %v470_v55  }
 0x476   : > { %2151 = vmatpush.msra.mxu0 %v3654_v24  ;;  %v4185_v24 = vld [vmem:[#allocation10_spill] sm:$0xff] }
 0x477   : > { %v2184_v36 = vpop.permute.xlu0 %2183 }
 0x478   : > { %2248 = vmatpush.msrb.mxu0 %v3694_v44  ;;  %v1864_v44 = vpop.f32.mrf.mxu1 }
 0x47a   : > { %2249 = vmatpush.msrb.mxu0 %v3703_v54 }
 0x47c   : > { %2250 = vmatpush.msrb.mxu0 %v3709_v61 }
 0x47e   : > { %2251 = vmatpush.msrb.mxu0 %v3715_v45  ;;  %v4186_v45 = vld [vmem:[#allocation13_spill] sm:$0xff] }
 0x47f   : > { %v2262_v28 = vpop.permute.xlu0 %2261 }
 0x480   : > { %2252 = vmatpush.msrb.mxu0 %v3721_v51  ;;  %v1868_v51 = vmul.f32 %v1864_v44, %v1368_v17  ;;  %v1959_v1 = vpop.f32.mrf.mxu1 }
 0x481   : > { %v1963_v17 = vmul.f32 %v1959_v1, %v1514_v10 }
 0x482   : > { %2253 = vmatpush.msrb.mxu0 %v3727_v9  ;;  %v4187_v9 = vld [vmem:[#allocation12_spill] sm:$0xff] }
 0x484   : > { %2254 = vmatpush.msrb.mxu0 %v3733_v23  ;;  %v1927_v23 = vpop.f32.mrf.mxu3 }
 0x486   : > { %2255 = vmatpush.msrb.mxu0 %v3739_v11 }
 0x487   : > { %v2340_v55 = vpop.permute.xlu0 %2339 }
 0x488   : > { %v2087_v6 = vpop.f32.mrf.mxu1 }
 0x489   : > { %v2091_v50 = vmul.f32 %v2087_v6, %v1710_v12 }
 0x48c   : > { %v2055_v38 = vpop.f32.mrf.mxu3 }
 0x48d   : > { %v2059_v39 = vmul.f32 %v2055_v38, %v1661_v3  ;;  %v2210_v3 = vpop.permute.xlu2 %2209 }
 0x495   : > { %v2288_v0 = vpop.permute.xlu2 %2287 }
 0x4c4   : > { %v1832_v52 = vpop.f32.mrf.mxu0 }
 0x4c5   : > { %v1833_v59 = vadd.f32 %v1832_v52, %v1809_v49  ;;  %v2314_v49 = vpop.permute.xlu1 %2313 }
 0x4c7   : > { %v1835_v42 = vmax.f32 %v1833_v59, 0.0 }
 0x4c9   : > { %2564 = vmatmul.msk.f32.vlgmr.msra.gmra.mxu0 %vm1770_vm2, %v1835_v42  ;;  %2565 = vmatmul.msk.f32.vlgmr.msra.gmra.mxu3 %vm1770_vm2, %v1835_v42 }
 0x4ca   : > { %2566 = vmatmul.msk.f32.vlgmr.msra.gmra.mxu1 %vm1770_vm2, %v1835_v42  ;;  %2567 = vmatmul.msk.f32.vlgmr.msrb.gmra.mxu2 %vm1770_vm2, %v1835_v42 }
 0x4cb   : > { %2352 = vmatpush.msra.mxu0 %v4183_v47 }
 0x4cd   : > { %2353 = vmatpush.msra.mxu0 %v3751_v26  ;;  %v4188_v26 = vld [vmem:[#allocation15_spill] sm:$0xff] }
 0x4cf   : > { %2354 = vmatpush.msra.mxu0 %v3757_v15  ;;  %v1931_v15 = vmul.f32 %v1927_v23, %v1465_v58 }
 0x4d1   : > { %2355 = vmatpush.msra.mxu0 %v4184_v57  ;;  %2569 = vmatmul.msk.f32.vlgmr.msrb.gmra.mxu3 %vm1770_vm2, %v1835_v42 }
 0x4d2   : > { %2568 = vmatmul.msk.f32.vlgmr.msrb.gmra.mxu0 %vm1770_vm2, %v1835_v42  ;;  %2570 = vmatmul.msk.f32.vlgmr.msrb.gmra.mxu1 %vm1770_vm2, %v1835_v42 }
 0x4d3   : > { %2571 = vmatmul.msk.f32.vlgmr.msra.gmra.mxu2 %vm1770_vm2, %v1835_v42  ;;  %2356 = vmatpush.msra.mxu0 %v4185_v24 }
 0x4d4   : > { %v1895_v54 = vpop.f32.mrf.mxu0 }
 0x4d5   : > { %v1899_v61 = vmul.f32 %v1895_v54, %v1416_v18  ;;  %2357 = vmatpush.msra.mxu0 %v4186_v45  ;;  %v2381_v18 = vld [vmem:[%s3992_s9] sm:$0xff]  ;;  %v2366_v54 = vpop.permute.xlu2 %2365 }
 0x4d6   : > { %2383 = vrot.lane.b32.xlu2 %v2381_v18, %s2992_s13 }
 0x4d7   : > { %2358 = vmatpush.msra.mxu0 %v4187_v9  ;;  %v1900_v11 = vadd.f32 %v1899_v61, %v1868_v51 }
 0x4d9   : > { %2359 = vmatpush.msra.mxu0 %v4188_v26  ;;  %v1932_v8 = vadd.f32 %v1931_v15, %v1900_v11 }
 0x4da   : > { %2572 = vmatmul.msk.f32.vlgmr.msra.gmra.mxu0 %vm1770_vm2, %v1835_v42 }
 0x4db   : > { %v1964_v13 = vadd.f32 %v1963_v17, %v1932_v8 }
 0x4dd   : > { %v1996_v2 = vadd.f32 %v1995_v62, %v1964_v13 }
 0x4df   : > { %v2373_v26 = vpop.permute.xlu1 %2372 }
 0x4e0   : > { %v2439_v38 = vrot.slane %v2373_v26, 4 }
 0x4e4   : > { %v2023_v27 = vpop.f32.mrf.mxu0 }
 0x4e5   : > { %v2027_v58 = vmul.f32 %v2023_v27, %v1612_v4 }
 0x4e7   : > { %v2028_v53 = vadd.f32 %v2027_v58, %v1996_v2  ;;  %v2438_v62 = vpop.permute.xlu1 %2437 }
 0x4e8   : > { %v2440_v27 = vrot.slane %v2438_v62, 4 }
 0x4e9   : > { %v2060_v10 = vadd.f32 %v2059_v39, %v2028_v53 }
 0x4ea   : > { %v2441_v39 = vsel %vm1240_vm0, %v2439_v38, %v2440_v27 }
 0x4eb   : > { %v2092_v16 = vadd.f32 %v2091_v50, %v2060_v10 }
 0x4ed   : > { %v2124_v31 = vadd.f32 %v2123_v35, %v2092_v16 }
 0x4ef   : > { %v2127_v34 = vadd.f32 %v2125_v5, %v2124_v31 }
 0x4f1   : > { %v2128_v33 = vadd.f32 3.0, %v2127_v34 }
 0x4f3   : > { %v2129_v37 = vmax.f32 %v2128_v33, 0.0 }
 0x4f5   : > { %v2130_v4 = vmin.f32 %v2129_v37, 6.0 }
 0x4f7   : > { %v2131_v48 = vmul.f32 0.16666667, %v2130_v4 }
 0x4f9   : > { %v2132_v30 = vmul.f32 %v2131_v48, %v2127_v34 }
 0x4fb   : > { %2575 = vmatpush.msk.msra.mxu1 %vm1240_vm0, %v2132_v30 }
 0x4fc   : > { %2576 = vmatmul.msk.f32.vlgmr.msra.gmra.mxu1 %vm1236_vm1, %v2381_v18 }
 0x530   : > { %v2384_v13 = vpop.permute.xlu2 %2383 }
 0x546   : > { %v2153_v12 = vpop.f32.mrf.mxu0 }
 0x547   : > { %v2205_v19 = vpop.f32.mrf.mxu1  ;;  %v2161_v32 = vmul.f32 %v2159_v25, %v2153_v12 }
 0x548   : > { %v2212_v21 = vmul.f32 %v2210_v3, %v2205_v19 }
 0x54c   : > { %v2179_v22 = vpop.f32.mrf.mxu3 }
 0x54d   : > { %v2186_v56 = vmul.f32 %v2184_v36, %v2179_v22  ;;  %v2231_v60 = vpop.f32.mrf.mxu2 }
 0x54e   : > { %v2238_v7 = vmul.f32 %v2236_v14, %v2231_v60 }
 0x54f   : > { %v2187_v40 = vadd.f32 %v2186_v56, %v2161_v32  ;;  %v2257_v46 = vpop.f32.mrf.mxu0  ;;  %v2309_v59 = vpop.f32.mrf.mxu1 }
 0x550   : > { %v2264_v52 = vmul.f32 %v2262_v28, %v2257_v46  ;;  %v2316_v24 = vmul.f32 %v2314_v49, %v2309_v59 }
 0x551   : > { %v2213_v43 = vadd.f32 %v2212_v21, %v2187_v40 }
 0x553   : > { %v2239_v20 = vadd.f32 %v2238_v7, %v2213_v43 }
 0x554   : > { %v2283_v63 = vpop.f32.mrf.mxu3 }
 0x555   : > { %v2265_v42 = vadd.f32 %v2264_v52, %v2239_v20  ;;  %v2290_v47 = vmul.f32 %v2288_v0, %v2283_v63 }
 0x556   : > { %v2335_v57 = vpop.f32.mrf.mxu2 }
 0x557   : > { %v2291_v44 = vadd.f32 %v2290_v47, %v2265_v42  ;;  %v2361_v61 = vpop.f32.mrf.mxu0  ;;  %v2342_v51 = vmul.f32 %v2340_v55, %v2335_v57 }
 0x558   : > { %v2368_v23 = vmul.f32 %v2366_v54, %v2361_v61 }
 0x559   : > { %v2317_v45 = vadd.f32 %v2316_v24, %v2291_v44 }
 0x55b   : > { %v2343_v9 = vadd.f32 %v2342_v51, %v2317_v45 }
 0x55d   : > { %v2369_v11 = vadd.f32 %v2368_v23, %v2343_v9 }
 0x55f   : > { %v2375_v15 = vadd.f32 %v2373_v26, %v2369_v11 }
 0x561   : > { %v2376_v18 = vadd.f32 3.0, %v2375_v15 }
 0x563   : > { %v2377_v1 = vmax.f32 %v2376_v18, 0.0 }
 0x565   : > { %v2378_v8 = vmin.f32 %v2377_v1, 6.0 }
 0x567   : > { %v2379_v17 = vmul.f32 0.16666667, %v2378_v8 }
 0x569   : > { %v2380_v41 = vmul.f32 %v2379_v17, %v2375_v15 }
 0x56b   : > { %2573 = vmatpush.msk.msra.mxu3 %vm1240_vm0, %v2380_v41 }
 0x56c   : > { %2574 = vmatmul.msk.f32.vlgmr.msra.gmra.mxu3 %vm1236_vm1, %v2384_v13 }
 0x579   : > { %v2432_v2 = vpop.f32.mrf.mxu1 }
 0x5ef   : > { %v2407_v58 = vpop.f32.mrf.mxu3 }
 0x5f0   : > { %v2433_v6 = vadd.f32 %v2432_v2, %v2407_v58 }
 0x5f2   : > { %v2443_v53 = vadd.f32 %v2441_v39, %v2433_v6 }
 0x5f4   : > { %v2444_v29 = vadd.f32 3.0, %v2443_v53 }
 0x5f6   : > { %v2445_v50 = vmax.f32 %v2444_v29, 0.0 }
 0x5f8   : > { %v2446_v10 = vmin.f32 %v2445_v50, 6.0 }
 0x5fa   : > { %v2447_v35 = vmul.f32 0.16666667, %v2446_v10 }
 0x5fc   : > { %v2448_v16 = vmul.f32 %v2447_v35, %v2443_v53 }
 0x5fe   : > { %2449 = vst.msk [vmem:[%s459_s16] sm:$0xff] %vm1770_vm2, %v2448_v16 }
 0x5ff PF: > { %s24_s21 = sadd.s32 1, %s2976_s21  }
 0x600   : > { %p21_p7 = scmp.ge.s32.totalorder %s24_s21, 4  }
 0x602   :  { %23 = sbr.rel (!%p21_p7) target bundleno = 2 (0x2), region = 127 }
 0x607   :  { %2469 = vsyncpa [#allocation3], 1 }
 0x608   :  { %2471 = vsyncpa [#allocation3 + $0x1], 1 }
 0x609   :  { %2472 = vsyncpa [#allocation5], 1 }

</bundles_post_ra>
